<compile_context>
chip_gen: v7x
topology: tpu7x:2x2x1
jax: 0.10.0
libtpu: 0.0.40
codegen_flags: <defaults>
</compile_context>

<pallas_src>
import math

import jax
import jax.numpy as jnp
import numpy as np
from jax.experimental import pallas as pl
from jax.experimental.pallas import tpu as pltpu  # noqa: F401  (TPU backend)

# ---- problem sizes (small, consistent with the module) ----------------------------
B, S = 2, 16          # batch, sequence length
IN = 64               # input feature size
D = 32                # hidden_size (FAST_MODEL_HIDDEN_SIZE)
H = 4                 # CONFORMER_ATTENTION_HEADS
HD = D // H           # head dim
DFF = 4 * D           # CONFORMER_FF_EXPANSION_FACTOR = 4
K = 7                 # CONFORMER_CONV_KERNEL_SIZE (kept small; code default is 31)
L = 2                 # CONFORMER_LAYERS
C = 8                 # num_classes (len(INTENT_CLASSES))
BS = B * S
PAD = K // 2
EPS = 1e-5            # LayerNorm / BatchNorm eps (PyTorch default)

# per-block (1, D) vectors, packed contiguously per layer inside the width-32 slab
VEC_NAMES = (
    "ln1_g", "ln1_b", "fc2_b",                         # feed-forward module 1
    "lna_g", "lna_b", "attn_out_b",                    # self-attention module
    "lnc_g", "lnc_b", "conv_shift", "pw2_b",           # conv module (BN+dw_b folded)
    "ln2_g", "ln2_b", "fc4_b",                         # feed-forward module 2
    "lnf_g", "lnf_b",                                  # block-final LayerNorm
)
VEC_IDX = {n: i for i, n in enumerate(VEC_NAMES)}
NV = len(VEC_NAMES)


# ---- static packing layout (shared by host packer and kernel unpacker) -------------
def _pad8(n):
    return ((n + 7) // 8) * 8


class _Layout:
    def __init__(self, width):
        self.width = width
        self.rows = 0
        self.off = {}
        self.size = {}

    def reserve(self, name, nrows):
        self.off[name] = self.rows
        self.size[name] = nrows
        self.rows += _pad8(nrows)        # keep every block sublane(8)-aligned


L32 = _Layout(D)                          # everything whose last dim is D (=32)
L32.reserve("w_in", IN)
L32.reserve("pe", BS)
for _l in range(L):
    L32.reserve(f"vecs_{_l}", NV)
for _f in range(2 * L):
    L32.reserve(f"ff_w2_{_f}", DFF)
for _l in range(L):
    L32.reserve(f"attn_out_{_l}", D)
for _l in range(L):
    L32.reserve(f"pw2_{_l}", D)
for _l in range(L):
    L32.reserve(f"dw_{_l}", K)
L32.reserve("pool", B)
L32.reserve("fc_w", D)
L32.reserve("fc_b", 1)

L128 = _Layout(DFF)                       # FF expansion weights/biases
for _f in range(2 * L):
    L128.reserve(f"ff_w1_{_f}", D)
    L128.reserve(f"ff_b1_{_f}", 1)

L96 = _Layout(3 * D)                      # fused qkv weights/biases
for _l in range(L):
    L96.reserve(f"qkv_w_{_l}", D)
    L96.reserve(f"qkv_b_{_l}", 1)

L64 = _Layout(2 * D)                      # fused GLU pointwise-conv1 weights/biases
for _l in range(L):
    L64.reserve(f"pw1_w_{_l}", D)
    L64.reserve(f"pw1_b_{_l}", 1)


def _take(slab, layout, name):
    """Point-of-use static slice; works on both Pallas Refs and jnp arrays."""
    o = layout.off[name]
    n = layout.size[name]
    return slab[o:o + n, :]


# ---- shared math (used by both the Pallas kernel and the pure-JAX reference) ------
def _recip(x, approx):
    return pl.reciprocal(x, approx=True) if approx else 1.0 / x


def _sigmoid(x):
    return 1.0 / (1.0 + jnp.exp(-x))


def _silu(x):
    return x * _sigmoid(x)


def _layernorm(x, g, b):
    # two independent cross-lane reductions (E[x], E[x^2]) instead of serialized
    # mean-then-centered-variance
    m1 = jnp.mean(x, axis=-1, keepdims=True)
    m2 = jnp.mean(x * x, axis=-1, keepdims=True)
    var = m2 - m1 * m1
    return (x - m1) * jax.lax.rsqrt(var + EPS) * g + b


def _softmax_last(x, approx):
    m = jnp.max(x, axis=-1, keepdims=True)
    e = jnp.exp(x - m)
    return e * _recip(jnp.sum(e, axis=-1, keepdims=True), approx)


def _dot(a, b):
    return jnp.dot(a, b, preferred_element_type=jnp.float32)


def _forward(x_flat, s32, s128, s96, s64, shift_flat, approx):
    """Full FastIntentClassifier forward on (B*S, IN) tokens -> (B, C) logits.

    s32/s128/s96/s64/shift_flat may be Pallas Refs (kernel path) or jnp arrays
    (reference path); every weight is sliced/loaded right where it is used.
    """
    # input projection + positional encoding (input-proj bias folded into the PE slab)
    xf = _dot(x_flat, _take(s32, L32, "w_in")) + _take(s32, L32, "pe")       # (BS, D)

    scale = 1.0 / math.sqrt(HD)
    for l in range(L):                                  # static unroll over blocks
        vblk = _take(s32, L32, f"vecs_{l}")             # (NV, D) — tiny per-layer load

        def vec(name, _v=vblk):
            i = VEC_IDX[name]
            return _v[i:i + 1, :]                       # (1, D) broadcast row

        # ---- FeedForwardModule 1:  x <- x + 0.5*(ff_core(x) + x) --------------------
        h = _layernorm(xf, vec("ln1_g"), vec("ln1_b"))
        h = _silu(_dot(h, _take(s128, L128, f"ff_w1_{2 * l}"))
                  + _take(s128, L128, f"ff_b1_{2 * l}"))
        h = _dot(h, _take(s32, L32, f"ff_w2_{2 * l}")) + vec("fc2_b")
        xf = 1.5 * xf + 0.5 * h

        # ---- Sequential(LayerNorm, MultiHeadSelfAttention, Dropout) -----------------
        h = _layernorm(xf, vec("lna_g"), vec("lna_b"))
        qkv = _dot(h, _take(s96, L96, f"qkv_w_{l}")) + _take(s96, L96, f"qkv_b_{l}")  # (BS, 3D)
        ctx = []
        for hh in range(H):                             # static head loop, lane slices
            q = qkv[:, hh * HD:(hh + 1) * HD].reshape(B, S, HD)
            k = qkv[:, D + hh * HD:D + (hh + 1) * HD].reshape(B, S, HD)
            v = qkv[:, 2 * D + hh * HD:2 * D + (hh + 1) * HD].reshape(B, S, HD)
            sc = jnp.einsum("bqd,bkd->bqk", q, k,
                            preferred_element_type=jnp.float32) * scale
            p = _softmax_last(sc, approx)
            c = jnp.einsum("bqk,bkd->bqd", p, v, preferred_element_type=jnp.float32)
            ctx.append(c.reshape(BS, HD))
        ctx = jnp.concatenate(ctx, axis=-1)             # (BS, D), head-major like torch
        attn = _dot(ctx, _take(s32, L32, f"attn_out_{l}")) + vec("attn_out_b")
        xf = xf + attn

        # ---- ConvModule:  x <- x + (conv_core(x) + x) --------------------------------
        h = _layernorm(xf, vec("lnc_g"), vec("lnc_b"))
        ag = _dot(h, _take(s64, L64, f"pw1_w_{l}")) + _take(s64, L64, f"pw1_b_{l}")   # (BS, 2D)
        h = ag[:, :D] * _sigmoid(ag[:, D:])             # GLU over channels
        taps = _take(s32, L32, f"dw_{l}")               # (K, D), BN scale folded in
        # depthwise conv as ONE matmul: stack K tap-scaled copies along contraction dim
        h_stacked = jnp.concatenate([h * taps[kk:kk + 1, :] for kk in range(K)], axis=0)
        acc = _dot(shift_flat[...], h_stacked) + vec("conv_shift")   # conv + dw_b + BN shift
        acc = _silu(acc)
        acc = _dot(acc, _take(s32, L32, f"pw2_{l}")) + vec("pw2_b")
        xf = 2.0 * xf + acc

        # ---- FeedForwardModule 2 -----------------------------------------------------
        h = _layernorm(xf, vec("ln2_g"), vec("ln2_b"))
        h = _silu(_dot(h, _take(s128, L128, f"ff_w1_{2 * l + 1}"))
                  + _take(s128, L128, f"ff_b1_{2 * l + 1}"))
        h = _dot(h, _take(s32, L32, f"ff_w2_{2 * l + 1}")) + vec("fc4_b")
        xf = 1.5 * xf + 0.5 * h

        # ---- block-final LayerNorm ----------------------------------------------------
        xf = _layernorm(xf, vec("lnf_g"), vec("lnf_b"))

    # mean pool over the sequence (as one matmul) + classifier head.
    # TODO(synk): nn.Dropout layers are identity (inference) and BatchNorm1d uses
    # eval-mode running statistics; training-mode noise / batch statistics are not implemented.
    pooled = _dot(_take(s32, L32, "pool"), xf)                               # (B, D)
    logits = _dot(pooled, _take(s32, L32, "fc_w")) + _take(s32, L32, "fc_b") # (B, D) zero-padded
    return logits[:, :C]


# ---- Pallas kernel & wrapper -------------------------------------------------------
def fast_classifier_kernel(x_ref, s32_ref, s128_ref, s96_ref, s64_ref, shift_ref, o_ref):
    o_ref[...] = _forward(x_ref[...], s32_ref, s128_ref, s96_ref, s64_ref, shift_ref,
                          approx=True)


def fast_intent_classifier(x, params):
    """x: (B, S, IN) -> logits (B, C).  No grid: one invocation, everything in VMEM."""
    s32, s128, s96, s64, shift_flat = params
    return pl.pallas_call(
        fast_classifier_kernel,
        out_shape=jax.ShapeDtypeStruct((B, C), jnp.float32),
    )(x.reshape(BS, IN), s32, s128, s96, s64, shift_flat)


# ---- deterministic parameter init + host-side packing ------------------------------
def init_params(key):
    keys = iter(jax.random.split(key, 256))

    def w(shape, scale=0.1):
        return np.asarray(scale * jax.random.normal(next(keys), shape),
                          dtype=np.float32)

    s32 = np.zeros((L32.rows, D), np.float32)
    s128 = np.zeros((L128.rows, DFF), np.float32)
    s96 = np.zeros((L96.rows, 3 * D), np.float32)
    s64 = np.zeros((L64.rows, 2 * D), np.float32)

    def put(slab, layout, name, val):
        val = np.asarray(val, np.float32)
        o = layout.off[name]
        slab[o:o + val.shape[0], :] = val

    # input projection + sinusoidal positional encoding (matches PyTorch PositionalEncoding)
    w_in, b_in = w((IN, D)), w((D,))
    pos = np.arange(S, dtype=np.float32)[:, None]
    div = np.exp(np.arange(0, D, 2, dtype=np.float32) * (-np.log(10000.0) / D))
    pe = np.zeros((S, D), np.float32)
    pe[:, 0::2] = np.sin(pos * div)
    pe[:, 1::2] = np.cos(pos * div)
    pe_slab = np.tile(pe, (B, 1)) + b_in[None, :]        # (BS, D), proj bias folded in
    put(s32, L32, "w_in", w_in)
    put(s32, L32, "pe", pe_slab)

    for l in range(L):
        p = {}
        p["ln1_g"], p["ln1_b"] = 1.0 + w((D,)), w((D,))
        fc1_w, fc1_b = w((D, DFF)), w((DFF,))
        fc2_w, p["fc2_b"] = w((DFF, D)), w((D,))
        p["lna_g"], p["lna_b"] = 1.0 + w((D,)), w((D,))
        wqkv, bqkv = w((D, 3 * D)), w((3 * D,))
        wout, p["attn_out_b"] = w((D, D)), w((D,))
        p["lnc_g"], p["lnc_b"] = 1.0 + w((D,)), w((D,))
        pw1_w, pw1_b = w((D, 2 * D)), w((2 * D,))
        dw_taps, dw_b = w((K, D)), w((D,))
        bn_g, bn_b = 1.0 + w((D,)), w((D,))
        bn_m, bn_v = w((D,)), 1.0 + np.abs(w((D,)))
        pw2_w, p["pw2_b"] = w((D, D)), w((D,))
        p["ln2_g"], p["ln2_b"] = 1.0 + w((D,)), w((D,))
        fc3_w, fc3_b = w((D, DFF)), w((DFF,))
        fc4_w, p["fc4_b"] = w((DFF, D)), w((D,))
        p["lnf_g"], p["lnf_b"] = 1.0 + w((D,)), w((D,))

        # fold eval-mode BatchNorm1d scale into the depthwise taps, and (BN shift +
        # depthwise-conv bias) into one per-channel add
        bn_scale = bn_g / np.sqrt(bn_v + EPS)
        dw_folded = dw_taps * bn_scale[None, :]
        p["conv_shift"] = bn_b - bn_m * bn_scale + dw_b * bn_scale

        put(s32, L32, f"vecs_{l}", np.stack([p[n] for n in VEC_NAMES]))
        put(s32, L32, f"ff_w2_{2 * l}", fc2_w)
        put(s32, L32, f"ff_w2_{2 * l + 1}", fc4_w)
        put(s32, L32, f"attn_out_{l}", wout)
        put(s32, L32, f"pw2_{l}", pw2_w)
        put(s32, L32, f"dw_{l}", dw_folded)
        put(s128, L128, f"ff_w1_{2 * l}", fc1_w)
        put(s128, L128, f"ff_b1_{2 * l}", fc1_b[None, :])
        put(s128, L128, f"ff_w1_{2 * l + 1}", fc3_w)
        put(s128, L128, f"ff_b1_{2 * l + 1}", fc3_b[None, :])
        put(s96, L96, f"qkv_w_{l}", wqkv)
        put(s96, L96, f"qkv_b_{l}", bqkv[None, :])
        put(s64, L64, f"pw1_w_{l}", pw1_w)
        put(s64, L64, f"pw1_b_{l}", pw1_b[None, :])

    # mean-pool-over-sequence as a (B, B*S) matmul (BS == D == 32 here, so it fits slab32)
    pool = np.zeros((B, BS), np.float32)
    for b in range(B):
        pool[b, b * S:(b + 1) * S] = 1.0 / S
    put(s32, L32, "pool", pool)

    # classifier head, zero-padded to D output lanes (only the first C columns are real)
    fc_w, fc_b = w((D, C)), w((C,))
    fc_w_pad = np.zeros((D, D), np.float32)
    fc_w_pad[:, :C] = fc_w
    fc_b_pad = np.zeros((1, D), np.float32)
    fc_b_pad[0, :C] = fc_b
    put(s32, L32, "fc_w", fc_w_pad)
    put(s32, L32, "fc_b", fc_b_pad)

    # single block-shift matrix for the depthwise conv:
    # shift_flat[t, k*BS + j] = 1  iff  j == t + k - PAD within the same sequence
    shift_flat = np.zeros((BS, K * BS), np.float32)
    r = np.arange(BS)
    for kk in range(K):
        d = kk - PAD
        valid = ((r % S) + d >= 0) & ((r % S) + d < S)
        shift_flat[r[valid], kk * BS + (r + d)[valid]] = 1.0

    return (jnp.asarray(s32), jnp.asarray(s128), jnp.asarray(s96),
            jnp.asarray(s64), jnp.asarray(shift_flat))


def classifier_ref(x, params):
    """Pure-JAX reference (same math, exact reciprocals, no Pallas)."""
    s32, s128, s96, s64, shift_flat = params
    return _forward(x.reshape(BS, IN), s32, s128, s96, s64, shift_flat, approx=False)


if __name__ == "__main__":
    key = jax.random.PRNGKey(0)
    kx, kp = jax.random.split(key)
    x = jax.random.normal(kx, (B, S, IN), dtype=jnp.float32)
    params = init_params(kp)

    out = jax.block_until_ready(fast_intent_classifier(x, params))
    ref = jax.block_until_ready(classifier_ref(x, params))
    np.testing.assert_allclose(np.asarray(out), np.asarray(ref), atol=2e-3, rtol=2e-3)

    print("KERNEL_OK")
</pallas_src>

<mosaic_0001>
module attributes {stable_mosaic.version = 11 : i64} {
  func.func @fast_classifier_kernel(%arg0: memref<32x64xf32, #tpu.memory_space<vmem>>, %arg1: memref<832x32xf32, #tpu.memory_space<vmem>>, %arg2: memref<160x128xf32, #tpu.memory_space<vmem>>, %arg3: memref<80x96xf32, #tpu.memory_space<vmem>>, %arg4: memref<80x64xf32, #tpu.memory_space<vmem>>, %arg5: memref<32x224xf32, #tpu.memory_space<vmem>>, %arg6: memref<2x8xf32, #tpu.memory_space<vmem>>) attributes {dimension_semantics = [], scalar_prefetch = 0 : i64, scratch_operands = 0 : i64, tpu.core_type = #tpu.core_type<tc>} {
    %c0 = arith.constant 0 : index
    %c0_0 = arith.constant 0 : index
    %0 = vector.load %arg0[%c0, %c0_0] : memref<32x64xf32, #tpu.memory_space<vmem>>, vector<32x64xf32>
    %c0_1 = arith.constant 0 : index
    %c0_2 = arith.constant 0 : index
    %1 = vector.load %arg1[%c0_1, %c0_2] : memref<832x32xf32, #tpu.memory_space<vmem>>, vector<64x32xf32>
    %cst = arith.constant dense<0.000000e+00> : vector<32x32xf32>
    %2 = tpu.matmul %0, %1, %cst {dimension_numbers = #tpu.dot_dimension_numbers<[1], [0], [0], [1], [0, 0, 1, 1], [], []>} : vector<32x64xf32>, vector<64x32xf32>, vector<32x32xf32> -> vector<32x32xf32>
    %c64 = arith.constant 64 : index
    %c0_3 = arith.constant 0 : index
    %3 = vector.load %arg1[%c64, %c0_3] : memref<832x32xf32, #tpu.memory_space<vmem>>, vector<32x32xf32>
    %4 = arith.addf %2, %3 : vector<32x32xf32>
    %c96 = arith.constant 96 : index
    %c0_4 = arith.constant 0 : index
    %5 = vector.load %arg1[%c96, %c0_4] : memref<832x32xf32, #tpu.memory_space<vmem>>, vector<15x32xf32>
    %6 = vector.extract_strided_slice %5 {offsets = [0, 0], sizes = [1, 32], strides = [1, 1]} : vector<15x32xf32> to vector<1x32xf32>
    %7 = vector.extract_strided_slice %5 {offsets = [1, 0], sizes = [1, 32], strides = [1, 1]} : vector<15x32xf32> to vector<1x32xf32>
    %cst_5 = arith.constant dense<0.000000e+00> : vector<32xf32>
    %8 = vector.multi_reduction <add>, %4, %cst_5 [1] : vector<32x32xf32> to vector<32xf32>
    %9 = vector.shape_cast %8 : vector<32xf32> to vector<32x1xf32>
    %cst_6 = arith.constant 3.200000e+01 : f32
    %10 = vector.broadcast %cst_6 : f32 to vector<32x1xf32>
    %11 = arith.divf %9, %10 : vector<32x1xf32>
    %12 = arith.mulf %4, %4 : vector<32x32xf32>
    %cst_7 = arith.constant dense<0.000000e+00> : vector<32xf32>
    %13 = vector.multi_reduction <add>, %12, %cst_7 [1] : vector<32x32xf32> to vector<32xf32>
    %14 = vector.shape_cast %13 : vector<32xf32> to vector<32x1xf32>
    %cst_8 = arith.constant 3.200000e+01 : f32
    %15 = vector.broadcast %cst_8 : f32 to vector<32x1xf32>
    %16 = arith.divf %14, %15 : vector<32x1xf32>
    %17 = arith.mulf %11, %11 : vector<32x1xf32>
    %18 = arith.subf %16, %17 : vector<32x1xf32>
    %19 = vector.broadcast %11 : vector<32x1xf32> to vector<32x32xf32>
    %20 = arith.subf %4, %19 : vector<32x32xf32>
    %cst_9 = arith.constant 9.99999974E-6 : f32
    %21 = vector.broadcast %cst_9 : f32 to vector<32x1xf32>
    %22 = arith.addf %18, %21 : vector<32x1xf32>
    %23 = math.rsqrt %22 : vector<32x1xf32>
    %24 = vector.broadcast %23 : vector<32x1xf32> to vector<32x32xf32>
    %25 = arith.mulf %20, %24 : vector<32x32xf32>
    %26 = vector.broadcast %6 : vector<1x32xf32> to vector<32x32xf32>
    %27 = arith.mulf %25, %26 : vector<32x32xf32>
    %28 = vector.broadcast %7 : vector<1x32xf32> to vector<32x32xf32>
    %29 = arith.addf %27, %28 : vector<32x32xf32>
    %c0_10 = arith.constant 0 : index
    %c0_11 = arith.constant 0 : index
    %30 = vector.load %arg2[%c0_10, %c0_11] : memref<160x128xf32, #tpu.memory_space<vmem>>, vector<32x128xf32>
    %cst_12 = arith.constant dense<0.000000e+00> : vector<32x128xf32>
    %31 = tpu.matmul %29, %30, %cst_12 {dimension_numbers = #tpu.dot_dimension_numbers<[1], [0], [0], [1], [0, 0, 1, 1], [], []>} : vector<32x32xf32>, vector<32x128xf32>, vector<32x128xf32> -> vector<32x128xf32>
    %c32 = arith.constant 32 : index
    %c0_13 = arith.constant 0 : index
    %32 = vector.load %arg2[%c32, %c0_13] : memref<160x128xf32, #tpu.memory_space<vmem>>, vector<1x128xf32>
    %33 = vector.broadcast %32 : vector<1x128xf32> to vector<32x128xf32>
    %34 = arith.addf %31, %33 : vector<32x128xf32>
    %cst_14 = arith.constant 0.000000e+00 : f32
    %35 = vector.broadcast %cst_14 : f32 to vector<32x128xf32>
    %36 = arith.subf %35, %34 : vector<32x128xf32>
    %37 = math.exp %36 : vector<32x128xf32>
    %cst_15 = arith.constant 1.000000e+00 : f32
    %38 = vector.broadcast %cst_15 : f32 to vector<32x128xf32>
    %39 = arith.addf %38, %37 : vector<32x128xf32>
    %cst_16 = arith.constant 1.000000e+00 : f32
    %40 = vector.broadcast %cst_16 : f32 to vector<32x128xf32>
    %41 = arith.divf %40, %39 : vector<32x128xf32>
    %42 = arith.mulf %34, %41 : vector<32x128xf32>
    %c128 = arith.constant 128 : index
    %c0_17 = arith.constant 0 : index
    %43 = vector.load %arg1[%c128, %c0_17] : memref<832x32xf32, #tpu.memory_space<vmem>>, vector<128x32xf32>
    %cst_18 = arith.constant dense<0.000000e+00> : vector<32x32xf32>
    %44 = tpu.matmul %42, %43, %cst_18 {dimension_numbers = #tpu.dot_dimension_numbers<[1], [0], [0], [1], [0, 0, 1, 1], [], []>} : vector<32x128xf32>, vector<128x32xf32>, vector<32x32xf32> -> vector<32x32xf32>
    %45 = vector.extract_strided_slice %5 {offsets = [2, 0], sizes = [1, 32], strides = [1, 1]} : vector<15x32xf32> to vector<1x32xf32>
    %46 = vector.broadcast %45 : vector<1x32xf32> to vector<32x32xf32>
    %47 = arith.addf %44, %46 : vector<32x32xf32>
    %cst_19 = arith.constant 1.500000e+00 : f32
    %48 = vector.broadcast %cst_19 : f32 to vector<32x32xf32>
    %49 = arith.mulf %48, %4 : vector<32x32xf32>
    %cst_20 = arith.constant 5.000000e-01 : f32
    %50 = vector.broadcast %cst_20 : f32 to vector<32x32xf32>
    %51 = arith.mulf %50, %47 : vector<32x32xf32>
    %52 = arith.addf %49, %51 : vector<32x32xf32>
    %53 = vector.extract_strided_slice %5 {offsets = [3, 0], sizes = [1, 32], strides = [1, 1]} : vector<15x32xf32> to vector<1x32xf32>
    %54 = vector.extract_strided_slice %5 {offsets = [4, 0], sizes = [1, 32], strides = [1, 1]} : vector<15x32xf32> to vector<1x32xf32>
    %cst_21 = arith.constant dense<0.000000e+00> : vector<32xf32>
    %55 = vector.multi_reduction <add>, %52, %cst_21 [1] : vector<32x32xf32> to vector<32xf32>
    %56 = vector.shape_cast %55 : vector<32xf32> to vector<32x1xf32>
    %cst_22 = arith.constant 3.200000e+01 : f32
    %57 = vector.broadcast %cst_22 : f32 to vector<32x1xf32>
    %58 = arith.divf %56, %57 : vector<32x1xf32>
    %59 = arith.mulf %52, %52 : vector<32x32xf32>
    %cst_23 = arith.constant dense<0.000000e+00> : vector<32xf32>
    %60 = vector.multi_reduction <add>, %59, %cst_23 [1] : vector<32x32xf32> to vector<32xf32>
    %61 = vector.shape_cast %60 : vector<32xf32> to vector<32x1xf32>
    %cst_24 = arith.constant 3.200000e+01 : f32
    %62 = vector.broadcast %cst_24 : f32 to vector<32x1xf32>
    %63 = arith.divf %61, %62 : vector<32x1xf32>
    %64 = arith.mulf %58, %58 : vector<32x1xf32>
    %65 = arith.subf %63, %64 : vector<32x1xf32>
    %66 = vector.broadcast %58 : vector<32x1xf32> to vector<32x32xf32>
    %67 = arith.subf %52, %66 : vector<32x32xf32>
    %cst_25 = arith.constant 9.99999974E-6 : f32
    %68 = vector.broadcast %cst_25 : f32 to vector<32x1xf32>
    %69 = arith.addf %65, %68 : vector<32x1xf32>
    %70 = math.rsqrt %69 : vector<32x1xf32>
    %71 = vector.broadcast %70 : vector<32x1xf32> to vector<32x32xf32>
    %72 = arith.mulf %67, %71 : vector<32x32xf32>
    %73 = vector.broadcast %53 : vector<1x32xf32> to vector<32x32xf32>
    %74 = arith.mulf %72, %73 : vector<32x32xf32>
    %75 = vector.broadcast %54 : vector<1x32xf32> to vector<32x32xf32>
    %76 = arith.addf %74, %75 : vector<32x32xf32>
    %c0_26 = arith.constant 0 : index
    %c0_27 = arith.constant 0 : index
    %77 = vector.load %arg3[%c0_26, %c0_27] : memref<80x96xf32, #tpu.memory_space<vmem>>, vector<32x96xf32>
    %cst_28 = arith.constant dense<0.000000e+00> : vector<32x96xf32>
    %78 = tpu.matmul %76, %77, %cst_28 {dimension_numbers = #tpu.dot_dimension_numbers<[1], [0], [0], [1], [0, 0, 1, 1], [], []>} : vector<32x32xf32>, vector<32x96xf32>, vector<32x96xf32> -> vector<32x96xf32>
    %c32_29 = arith.constant 32 : index
    %c0_30 = arith.constant 0 : index
    %79 = vector.load %arg3[%c32_29, %c0_30] : memref<80x96xf32, #tpu.memory_space<vmem>>, vector<1x96xf32>
    %80 = vector.broadcast %79 : vector<1x96xf32> to vector<32x96xf32>
    %81 = arith.addf %78, %80 : vector<32x96xf32>
    %82 = vector.extract_strided_slice %81 {offsets = [0, 0], sizes = [32, 8], strides = [1, 1]} : vector<32x96xf32> to vector<32x8xf32>
    %83 = vector.shape_cast %82 : vector<32x8xf32> to vector<2x16x8xf32>
    %84 = vector.extract_strided_slice %81 {offsets = [0, 32], sizes = [32, 8], strides = [1, 1]} : vector<32x96xf32> to vector<32x8xf32>
    %85 = vector.shape_cast %84 : vector<32x8xf32> to vector<2x16x8xf32>
    %86 = vector.extract_strided_slice %81 {offsets = [0, 64], sizes = [32, 8], strides = [1, 1]} : vector<32x96xf32> to vector<32x8xf32>
    %87 = vector.shape_cast %86 : vector<32x8xf32> to vector<2x16x8xf32>
    "tpu.trace_start"() <{level = 10 : i32, message = "bqd,bkd->bqk"}> : () -> ()
    %cst_31 = arith.constant dense<0.000000e+00> : vector<2x16x16xf32>
    %88 = tpu.matmul %83, %85, %cst_31 {dimension_numbers = #tpu.dot_dimension_numbers<[2], [2], [1], [1], [0, 0, 0, 1, 1, 1], [0], [0]>} : vector<2x16x8xf32>, vector<2x16x8xf32>, vector<2x16x16xf32> -> vector<2x16x16xf32>
    "tpu.trace_stop"() : () -> ()
    %cst_32 = arith.constant 0.353553385 : f32
    %89 = vector.broadcast %cst_32 : f32 to vector<2x16x16xf32>
    %90 = arith.mulf %88, %89 : vector<2x16x16xf32>
    %cst_33 = arith.constant dense<0xFF800000> : vector<2x16xf32>
    %91 = vector.multi_reduction <maximumf>, %90, %cst_33 [2] : vector<2x16x16xf32> to vector<2x16xf32>
    %92 = vector.shape_cast %91 : vector<2x16xf32> to vector<2x16x1xf32>
    %93 = vector.broadcast %92 : vector<2x16x1xf32> to vector<2x16x16xf32>
    %94 = arith.subf %90, %93 : vector<2x16x16xf32>
    %95 = math.exp %94 : vector<2x16x16xf32>
    %cst_34 = arith.constant dense<0.000000e+00> : vector<2x16xf32>
    %96 = vector.multi_reduction <add>, %95, %cst_34 [2] : vector<2x16x16xf32> to vector<2x16xf32>
    %97 = vector.shape_cast %96 : vector<2x16xf32> to vector<2x16x1xf32>
    %98 = tpu.reciprocal %97 {approx = true} : vector<2x16x1xf32> -> vector<2x16x1xf32>
    %99 = vector.broadcast %98 : vector<2x16x1xf32> to vector<2x16x16xf32>
    %100 = arith.mulf %95, %99 : vector<2x16x16xf32>
    "tpu.trace_start"() <{level = 10 : i32, message = "bqk,bkd->bqd"}> : () -> ()
    %cst_35 = arith.constant dense<0.000000e+00> : vector<2x16x8xf32>
    %101 = tpu.matmul %100, %87, %cst_35 {dimension_numbers = #tpu.dot_dimension_numbers<[2], [1], [1], [2], [0, 0, 0, 1, 1, 2], [0], [0]>} : vector<2x16x16xf32>, vector<2x16x8xf32>, vector<2x16x8xf32> -> vector<2x16x8xf32>
    "tpu.trace_stop"() : () -> ()
    %102 = vector.shape_cast %101 : vector<2x16x8xf32> to vector<32x8xf32>
    %103 = vector.extract_strided_slice %81 {offsets = [0, 8], sizes = [32, 8], strides = [1, 1]} : vector<32x96xf32> to vector<32x8xf32>
    %104 = vector.shape_cast %103 : vector<32x8xf32> to vector<2x16x8xf32>
    %105 = vector.extract_strided_slice %81 {offsets = [0, 40], sizes = [32, 8], strides = [1, 1]} : vector<32x96xf32> to vector<32x8xf32>
    %106 = vector.shape_cast %105 : vector<32x8xf32> to vector<2x16x8xf32>
    %107 = vector.extract_strided_slice %81 {offsets = [0, 72], sizes = [32, 8], strides = [1, 1]} : vector<32x96xf32> to vector<32x8xf32>
    %108 = vector.shape_cast %107 : vector<32x8xf32> to vector<2x16x8xf32>
    "tpu.trace_start"() <{level = 10 : i32, message = "bqd,bkd->bqk"}> : () -> ()
    %cst_36 = arith.constant dense<0.000000e+00> : vector<2x16x16xf32>
    %109 = tpu.matmul %104, %106, %cst_36 {dimension_numbers = #tpu.dot_dimension_numbers<[2], [2], [1], [1], [0, 0, 0, 1, 1, 1], [0], [0]>} : vector<2x16x8xf32>, vector<2x16x8xf32>, vector<2x16x16xf32> -> vector<2x16x16xf32>
    "tpu.trace_stop"() : () -> ()
    %cst_37 = arith.constant 0.353553385 : f32
    %110 = vector.broadcast %cst_37 : f32 to vector<2x16x16xf32>
    %111 = arith.mulf %109, %110 : vector<2x16x16xf32>
    %cst_38 = arith.constant dense<0xFF800000> : vector<2x16xf32>
    %112 = vector.multi_reduction <maximumf>, %111, %cst_38 [2] : vector<2x16x16xf32> to vector<2x16xf32>
    %113 = vector.shape_cast %112 : vector<2x16xf32> to vector<2x16x1xf32>
    %114 = vector.broadcast %113 : vector<2x16x1xf32> to vector<2x16x16xf32>
    %115 = arith.subf %111, %114 : vector<2x16x16xf32>
    %116 = math.exp %115 : vector<2x16x16xf32>
    %cst_39 = arith.constant dense<0.000000e+00> : vector<2x16xf32>
    %117 = vector.multi_reduction <add>, %116, %cst_39 [2] : vector<2x16x16xf32> to vector<2x16xf32>
    %118 = vector.shape_cast %117 : vector<2x16xf32> to vector<2x16x1xf32>
    %119 = tpu.reciprocal %118 {approx = true} : vector<2x16x1xf32> -> vector<2x16x1xf32>
    %120 = vector.broadcast %119 : vector<2x16x1xf32> to vector<2x16x16xf32>
    %121 = arith.mulf %116, %120 : vector<2x16x16xf32>
    "tpu.trace_start"() <{level = 10 : i32, message = "bqk,bkd->bqd"}> : () -> ()
    %cst_40 = arith.constant dense<0.000000e+00> : vector<2x16x8xf32>
    %122 = tpu.matmul %121, %108, %cst_40 {dimension_numbers = #tpu.dot_dimension_numbers<[2], [1], [1], [2], [0, 0, 0, 1, 1, 2], [0], [0]>} : vector<2x16x16xf32>, vector<2x16x8xf32>, vector<2x16x8xf32> -> vector<2x16x8xf32>
    "tpu.trace_stop"() : () -> ()
    %123 = vector.shape_cast %122 : vector<2x16x8xf32> to vector<32x8xf32>
    %124 = vector.extract_strided_slice %81 {offsets = [0, 16], sizes = [32, 8], strides = [1, 1]} : vector<32x96xf32> to vector<32x8xf32>
    %125 = vector.shape_cast %124 : vector<32x8xf32> to vector<2x16x8xf32>
    %126 = vector.extract_strided_slice %81 {offsets = [0, 48], sizes = [32, 8], strides = [1, 1]} : vector<32x96xf32> to vector<32x8xf32>
    %127 = vector.shape_cast %126 : vector<32x8xf32> to vector<2x16x8xf32>
    %128 = vector.extract_strided_slice %81 {offsets = [0, 80], sizes = [32, 8], strides = [1, 1]} : vector<32x96xf32> to vector<32x8xf32>
    %129 = vector.shape_cast %128 : vector<32x8xf32> to vector<2x16x8xf32>
    "tpu.trace_start"() <{level = 10 : i32, message = "bqd,bkd->bqk"}> : () -> ()
    %cst_41 = arith.constant dense<0.000000e+00> : vector<2x16x16xf32>
    %130 = tpu.matmul %125, %127, %cst_41 {dimension_numbers = #tpu.dot_dimension_numbers<[2], [2], [1], [1], [0, 0, 0, 1, 1, 1], [0], [0]>} : vector<2x16x8xf32>, vector<2x16x8xf32>, vector<2x16x16xf32> -> vector<2x16x16xf32>
    "tpu.trace_stop"() : () -> ()
    %cst_42 = arith.constant 0.353553385 : f32
    %131 = vector.broadcast %cst_42 : f32 to vector<2x16x16xf32>
    %132 = arith.mulf %130, %131 : vector<2x16x16xf32>
    %cst_43 = arith.constant dense<0xFF800000> : vector<2x16xf32>
    %133 = vector.multi_reduction <maximumf>, %132, %cst_43 [2] : vector<2x16x16xf32> to vector<2x16xf32>
    %134 = vector.shape_cast %133 : vector<2x16xf32> to vector<2x16x1xf32>
    %135 = vector.broadcast %134 : vector<2x16x1xf32> to vector<2x16x16xf32>
    %136 = arith.subf %132, %135 : vector<2x16x16xf32>
    %137 = math.exp %136 : vector<2x16x16xf32>
    %cst_44 = arith.constant dense<0.000000e+00> : vector<2x16xf32>
    %138 = vector.multi_reduction <add>, %137, %cst_44 [2] : vector<2x16x16xf32> to vector<2x16xf32>
    %139 = vector.shape_cast %138 : vector<2x16xf32> to vector<2x16x1xf32>
    %140 = tpu.reciprocal %139 {approx = true} : vector<2x16x1xf32> -> vector<2x16x1xf32>
    %141 = vector.broadcast %140 : vector<2x16x1xf32> to vector<2x16x16xf32>
    %142 = arith.mulf %137, %141 : vector<2x16x16xf32>
    "tpu.trace_start"() <{level = 10 : i32, message = "bqk,bkd->bqd"}> : () -> ()
    %cst_45 = arith.constant dense<0.000000e+00> : vector<2x16x8xf32>
    %143 = tpu.matmul %142, %129, %cst_45 {dimension_numbers = #tpu.dot_dimension_numbers<[2], [1], [1], [2], [0, 0, 0, 1, 1, 2], [0], [0]>} : vector<2x16x16xf32>, vector<2x16x8xf32>, vector<2x16x8xf32> -> vector<2x16x8xf32>
    "tpu.trace_stop"() : () -> ()
    %144 = vector.shape_cast %143 : vector<2x16x8xf32> to vector<32x8xf32>
    %145 = vector.extract_strided_slice %81 {offsets = [0, 24], sizes = [32, 8], strides = [1, 1]} : vector<32x96xf32> to vector<32x8xf32>
    %146 = vector.shape_cast %145 : vector<32x8xf32> to vector<2x16x8xf32>
    %147 = vector.extract_strided_slice %81 {offsets = [0, 56], sizes = [32, 8], strides = [1, 1]} : vector<32x96xf32> to vector<32x8xf32>
    %148 = vector.shape_cast %147 : vector<32x8xf32> to vector<2x16x8xf32>
    %149 = vector.extract_strided_slice %81 {offsets = [0, 88], sizes = [32, 8], strides = [1, 1]} : vector<32x96xf32> to vector<32x8xf32>
    %150 = vector.shape_cast %149 : vector<32x8xf32> to vector<2x16x8xf32>
    "tpu.trace_start"() <{level = 10 : i32, message = "bqd,bkd->bqk"}> : () -> ()
    %cst_46 = arith.constant dense<0.000000e+00> : vector<2x16x16xf32>
    %151 = tpu.matmul %146, %148, %cst_46 {dimension_numbers = #tpu.dot_dimension_numbers<[2], [2], [1], [1], [0, 0, 0, 1, 1, 1], [0], [0]>} : vector<2x16x8xf32>, vector<2x16x8xf32>, vector<2x16x16xf32> -> vector<2x16x16xf32>
    "tpu.trace_stop"() : () -> ()
    %cst_47 = arith.constant 0.353553385 : f32
    %152 = vector.broadcast %cst_47 : f32 to vector<2x16x16xf32>
    %153 = arith.mulf %151, %152 : vector<2x16x16xf32>
    %cst_48 = arith.constant dense<0xFF800000> : vector<2x16xf32>
    %154 = vector.multi_reduction <maximumf>, %153, %cst_48 [2] : vector<2x16x16xf32> to vector<2x16xf32>
    %155 = vector.shape_cast %154 : vector<2x16xf32> to vector<2x16x1xf32>
    %156 = vector.broadcast %155 : vector<2x16x1xf32> to vector<2x16x16xf32>
    %157 = arith.subf %153, %156 : vector<2x16x16xf32>
    %158 = math.exp %157 : vector<2x16x16xf32>
    %cst_49 = arith.constant dense<0.000000e+00> : vector<2x16xf32>
    %159 = vector.multi_reduction <add>, %158, %cst_49 [2] : vector<2x16x16xf32> to vector<2x16xf32>
    %160 = vector.shape_cast %159 : vector<2x16xf32> to vector<2x16x1xf32>
    %161 = tpu.reciprocal %160 {approx = true} : vector<2x16x1xf32> -> vector<2x16x1xf32>
    %162 = vector.broadcast %161 : vector<2x16x1xf32> to vector<2x16x16xf32>
    %163 = arith.mulf %158, %162 : vector<2x16x16xf32>
    "tpu.trace_start"() <{level = 10 : i32, message = "bqk,bkd->bqd"}> : () -> ()
    %cst_50 = arith.constant dense<0.000000e+00> : vector<2x16x8xf32>
    %164 = tpu.matmul %163, %150, %cst_50 {dimension_numbers = #tpu.dot_dimension_numbers<[2], [1], [1], [2], [0, 0, 0, 1, 1, 2], [0], [0]>} : vector<2x16x16xf32>, vector<2x16x8xf32>, vector<2x16x8xf32> -> vector<2x16x8xf32>
    "tpu.trace_stop"() : () -> ()
    %165 = vector.shape_cast %164 : vector<2x16x8xf32> to vector<32x8xf32>
    %166 = tpu.concatenate %102, %123, %144, %165 in 1 : vector<32x8xf32>, vector<32x8xf32>, vector<32x8xf32>, vector<32x8xf32> -> vector<32x32xf32>
    %c640 = arith.constant 640 : index
    %c0_51 = arith.constant 0 : index
    %167 = vector.load %arg1[%c640, %c0_51] : memref<832x32xf32, #tpu.memory_space<vmem>>, vector<32x32xf32>
    %cst_52 = arith.constant dense<0.000000e+00> : vector<32x32xf32>
    %168 = tpu.matmul %166, %167, %cst_52 {dimension_numbers = #tpu.dot_dimension_numbers<[1], [0], [0], [1], [0, 0, 1, 1], [], []>} : vector<32x32xf32>, vector<32x32xf32>, vector<32x32xf32> -> vector<32x32xf32>
    %169 = vector.extract_strided_slice %5 {offsets = [5, 0], sizes = [1, 32], strides = [1, 1]} : vector<15x32xf32> to vector<1x32xf32>
    %170 = vector.broadcast %169 : vector<1x32xf32> to vector<32x32xf32>
    %171 = arith.addf %168, %170 : vector<32x32xf32>
    %172 = arith.addf %52, %171 : vector<32x32xf32>
    %173 = vector.extract_strided_slice %5 {offsets = [6, 0], sizes = [1, 32], strides = [1, 1]} : vector<15x32xf32> to vector<1x32xf32>
    %174 = vector.extract_strided_slice %5 {offsets = [7, 0], sizes = [1, 32], strides = [1, 1]} : vector<15x32xf32> to vector<1x32xf32>
    %cst_53 = arith.constant dense<0.000000e+00> : vector<32xf32>
    %175 = vector.multi_reduction <add>, %172, %cst_53 [1] : vector<32x32xf32> to vector<32xf32>
    %176 = vector.shape_cast %175 : vector<32xf32> to vector<32x1xf32>
    %cst_54 = arith.constant 3.200000e+01 : f32
    %177 = vector.broadcast %cst_54 : f32 to vector<32x1xf32>
    %178 = arith.divf %176, %177 : vector<32x1xf32>
    %179 = arith.mulf %172, %172 : vector<32x32xf32>
    %cst_55 = arith.constant dense<0.000000e+00> : vector<32xf32>
    %180 = vector.multi_reduction <add>, %179, %cst_55 [1] : vector<32x32xf32> to vector<32xf32>
    %181 = vector.shape_cast %180 : vector<32xf32> to vector<32x1xf32>
    %cst_56 = arith.constant 3.200000e+01 : f32
    %182 = vector.broadcast %cst_56 : f32 to vector<32x1xf32>
    %183 = arith.divf %181, %182 : vector<32x1xf32>
    %184 = arith.mulf %178, %178 : vector<32x1xf32>
    %185 = arith.subf %183, %184 : vector<32x1xf32>
    %186 = vector.broadcast %178 : vector<32x1xf32> to vector<32x32xf32>
    %187 = arith.subf %172, %186 : vector<32x32xf32>
    %cst_57 = arith.constant 9.99999974E-6 : f32
    %188 = vector.broadcast %cst_57 : f32 to vector<32x1xf32>
    %189 = arith.addf %185, %188 : vector<32x1xf32>
    %190 = math.rsqrt %189 : vector<32x1xf32>
    %191 = vector.broadcast %190 : vector<32x1xf32> to vector<32x32xf32>
    %192 = arith.mulf %187, %191 : vector<32x32xf32>
    %193 = vector.broadcast %173 : vector<1x32xf32> to vector<32x32xf32>
    %194 = arith.mulf %192, %193 : vector<32x32xf32>
    %195 = vector.broadcast %174 : vector<1x32xf32> to vector<32x32xf32>
    %196 = arith.addf %194, %195 : vector<32x32xf32>
    %c0_58 = arith.constant 0 : index
    %c0_59 = arith.constant 0 : index
    %197 = vector.load %arg4[%c0_58, %c0_59] : memref<80x64xf32, #tpu.memory_space<vmem>>, vector<32x64xf32>
    %cst_60 = arith.constant dense<0.000000e+00> : vector<32x64xf32>
    %198 = tpu.matmul %196, %197, %cst_60 {dimension_numbers = #tpu.dot_dimension_numbers<[1], [0], [0], [1], [0, 0, 1, 1], [], []>} : vector<32x32xf32>, vector<32x64xf32>, vector<32x64xf32> -> vector<32x64xf32>
    %c32_61 = arith.constant 32 : index
    %c0_62 = arith.constant 0 : index
    %199 = vector.load %arg4[%c32_61, %c0_62] : memref<80x64xf32, #tpu.memory_space<vmem>>, vector<1x64xf32>
    %200 = vector.broadcast %199 : vector<1x64xf32> to vector<32x64xf32>
    %201 = arith.addf %198, %200 : vector<32x64xf32>
    %202 = vector.extract_strided_slice %201 {offsets = [0, 0], sizes = [32, 32], strides = [1, 1]} : vector<32x64xf32> to vector<32x32xf32>
    %203 = vector.extract_strided_slice %201 {offsets = [0, 32], sizes = [32, 32], strides = [1, 1]} : vector<32x64xf32> to vector<32x32xf32>
    %cst_63 = arith.constant 0.000000e+00 : f32
    %204 = vector.broadcast %cst_63 : f32 to vector<32x32xf32>
    %205 = arith.subf %204, %203 : vector<32x32xf32>
    %206 = math.exp %205 : vector<32x32xf32>
    %cst_64 = arith.constant 1.000000e+00 : f32
    %207 = vector.broadcast %cst_64 : f32 to vector<32x32xf32>
    %208 = arith.addf %207, %206 : vector<32x32xf32>
    %cst_65 = arith.constant 1.000000e+00 : f32
    %209 = vector.broadcast %cst_65 : f32 to vector<32x32xf32>
    %210 = arith.divf %209, %208 : vector<32x32xf32>
    %211 = arith.mulf %202, %210 : vector<32x32xf32>
    %c768 = arith.constant 768 : index
    %c0_66 = arith.constant 0 : index
    %212 = vector.load %arg1[%c768, %c0_66] : memref<832x32xf32, #tpu.memory_space<vmem>>, vector<7x32xf32>
    %213 = vector.extract_strided_slice %212 {offsets = [0, 0], sizes = [1, 32], strides = [1, 1]} : vector<7x32xf32> to vector<1x32xf32>
    %214 = vector.broadcast %213 : vector<1x32xf32> to vector<32x32xf32>
    %215 = arith.mulf %211, %214 : vector<32x32xf32>
    %216 = vector.extract_strided_slice %212 {offsets = [1, 0], sizes = [1, 32], strides = [1, 1]} : vector<7x32xf32> to vector<1x32xf32>
    %217 = vector.broadcast %216 : vector<1x32xf32> to vector<32x32xf32>
    %218 = arith.mulf %211, %217 : vector<32x32xf32>
    %219 = vector.extract_strided_slice %212 {offsets = [2, 0], sizes = [1, 32], strides = [1, 1]} : vector<7x32xf32> to vector<1x32xf32>
    %220 = vector.broadcast %219 : vector<1x32xf32> to vector<32x32xf32>
    %221 = arith.mulf %211, %220 : vector<32x32xf32>
    %222 = vector.extract_strided_slice %212 {offsets = [3, 0], sizes = [1, 32], strides = [1, 1]} : vector<7x32xf32> to vector<1x32xf32>
    %223 = vector.broadcast %222 : vector<1x32xf32> to vector<32x32xf32>
    %224 = arith.mulf %211, %223 : vector<32x32xf32>
    %225 = vector.extract_strided_slice %212 {offsets = [4, 0], sizes = [1, 32], strides = [1, 1]} : vector<7x32xf32> to vector<1x32xf32>
    %226 = vector.broadcast %225 : vector<1x32xf32> to vector<32x32xf32>
    %227 = arith.mulf %211, %226 : vector<32x32xf32>
    %228 = vector.extract_strided_slice %212 {offsets = [5, 0], sizes = [1, 32], strides = [1, 1]} : vector<7x32xf32> to vector<1x32xf32>
    %229 = vector.broadcast %228 : vector<1x32xf32> to vector<32x32xf32>
    %230 = arith.mulf %211, %229 : vector<32x32xf32>
    %231 = vector.extract_strided_slice %212 {offsets = [6, 0], sizes = [1, 32], strides = [1, 1]} : vector<7x32xf32> to vector<1x32xf32>
    %232 = vector.broadcast %231 : vector<1x32xf32> to vector<32x32xf32>
    %233 = arith.mulf %211, %232 : vector<32x32xf32>
    %234 = tpu.concatenate %215, %218, %221, %224, %227, %230, %233 in 0 : vector<32x32xf32>, vector<32x32xf32>, vector<32x32xf32>, vector<32x32xf32>, vector<32x32xf32>, vector<32x32xf32>, vector<32x32xf32> -> vector<224x32xf32>
    %c0_67 = arith.constant 0 : index
    %c0_68 = arith.constant 0 : index
    %235 = vector.load %arg5[%c0_67, %c0_68] : memref<32x224xf32, #tpu.memory_space<vmem>>, vector<32x224xf32>
    %cst_69 = arith.constant dense<0.000000e+00> : vector<32x32xf32>
    %236 = tpu.matmul %235, %234, %cst_69 {dimension_numbers = #tpu.dot_dimension_numbers<[1], [0], [0], [1], [0, 0, 1, 1], [], []>} : vector<32x224xf32>, vector<224x32xf32>, vector<32x32xf32> -> vector<32x32xf32>
    %237 = vector.extract_strided_slice %5 {offsets = [8, 0], sizes = [1, 32], strides = [1, 1]} : vector<15x32xf32> to vector<1x32xf32>
    %238 = vector.broadcast %237 : vector<1x32xf32> to vector<32x32xf32>
    %239 = arith.addf %236, %238 : vector<32x32xf32>
    %cst_70 = arith.constant 0.000000e+00 : f32
    %240 = vector.broadcast %cst_70 : f32 to vector<32x32xf32>
    %241 = arith.subf %240, %239 : vector<32x32xf32>
    %242 = math.exp %241 : vector<32x32xf32>
    %cst_71 = arith.constant 1.000000e+00 : f32
    %243 = vector.broadcast %cst_71 : f32 to vector<32x32xf32>
    %244 = arith.addf %243, %242 : vector<32x32xf32>
    %cst_72 = arith.constant 1.000000e+00 : f32
    %245 = vector.broadcast %cst_72 : f32 to vector<32x32xf32>
    %246 = arith.divf %245, %244 : vector<32x32xf32>
    %247 = arith.mulf %239, %246 : vector<32x32xf32>
    %c704 = arith.constant 704 : index
    %c0_73 = arith.constant 0 : index
    %248 = vector.load %arg1[%c704, %c0_73] : memref<832x32xf32, #tpu.memory_space<vmem>>, vector<32x32xf32>
    %cst_74 = arith.constant dense<0.000000e+00> : vector<32x32xf32>
    %249 = tpu.matmul %247, %248, %cst_74 {dimension_numbers = #tpu.dot_dimension_numbers<[1], [0], [0], [1], [0, 0, 1, 1], [], []>} : vector<32x32xf32>, vector<32x32xf32>, vector<32x32xf32> -> vector<32x32xf32>
    %250 = vector.extract_strided_slice %5 {offsets = [9, 0], sizes = [1, 32], strides = [1, 1]} : vector<15x32xf32> to vector<1x32xf32>
    %251 = vector.broadcast %250 : vector<1x32xf32> to vector<32x32xf32>
    %252 = arith.addf %249, %251 : vector<32x32xf32>
    %cst_75 = arith.constant 2.000000e+00 : f32
    %253 = vector.broadcast %cst_75 : f32 to vector<32x32xf32>
    %254 = arith.mulf %253, %172 : vector<32x32xf32>
    %255 = arith.addf %254, %252 : vector<32x32xf32>
    %256 = vector.extract_strided_slice %5 {offsets = [10, 0], sizes = [1, 32], strides = [1, 1]} : vector<15x32xf32> to vector<1x32xf32>
    %257 = vector.extract_strided_slice %5 {offsets = [11, 0], sizes = [1, 32], strides = [1, 1]} : vector<15x32xf32> to vector<1x32xf32>
    %cst_76 = arith.constant dense<0.000000e+00> : vector<32xf32>
    %258 = vector.multi_reduction <add>, %255, %cst_76 [1] : vector<32x32xf32> to vector<32xf32>
    %259 = vector.shape_cast %258 : vector<32xf32> to vector<32x1xf32>
    %cst_77 = arith.constant 3.200000e+01 : f32
    %260 = vector.broadcast %cst_77 : f32 to vector<32x1xf32>
    %261 = arith.divf %259, %260 : vector<32x1xf32>
    %262 = arith.mulf %255, %255 : vector<32x32xf32>
    %cst_78 = arith.constant dense<0.000000e+00> : vector<32xf32>
    %263 = vector.multi_reduction <add>, %262, %cst_78 [1] : vector<32x32xf32> to vector<32xf32>
    %264 = vector.shape_cast %263 : vector<32xf32> to vector<32x1xf32>
    %cst_79 = arith.constant 3.200000e+01 : f32
    %265 = vector.broadcast %cst_79 : f32 to vector<32x1xf32>
    %266 = arith.divf %264, %265 : vector<32x1xf32>
    %267 = arith.mulf %261, %261 : vector<32x1xf32>
    %268 = arith.subf %266, %267 : vector<32x1xf32>
    %269 = vector.broadcast %261 : vector<32x1xf32> to vector<32x32xf32>
    %270 = arith.subf %255, %269 : vector<32x32xf32>
    %cst_80 = arith.constant 9.99999974E-6 : f32
    %271 = vector.broadcast %cst_80 : f32 to vector<32x1xf32>
    %272 = arith.addf %268, %271 : vector<32x1xf32>
    %273 = math.rsqrt %272 : vector<32x1xf32>
    %274 = vector.broadcast %273 : vector<32x1xf32> to vector<32x32xf32>
    %275 = arith.mulf %270, %274 : vector<32x32xf32>
    %276 = vector.broadcast %256 : vector<1x32xf32> to vector<32x32xf32>
    %277 = arith.mulf %275, %276 : vector<32x32xf32>
    %278 = vector.broadcast %257 : vector<1x32xf32> to vector<32x32xf32>
    %279 = arith.addf %277, %278 : vector<32x32xf32>
    %c40 = arith.constant 40 : index
    %c0_81 = arith.constant 0 : index
    %280 = vector.load %arg2[%c40, %c0_81] : memref<160x128xf32, #tpu.memory_space<vmem>>, vector<32x128xf32>
    %cst_82 = arith.constant dense<0.000000e+00> : vector<32x128xf32>
    %281 = tpu.matmul %279, %280, %cst_82 {dimension_numbers = #tpu.dot_dimension_numbers<[1], [0], [0], [1], [0, 0, 1, 1], [], []>} : vector<32x32xf32>, vector<32x128xf32>, vector<32x128xf32> -> vector<32x128xf32>
    %c72 = arith.constant 72 : index
    %c0_83 = arith.constant 0 : index
    %282 = vector.load %arg2[%c72, %c0_83] : memref<160x128xf32, #tpu.memory_space<vmem>>, vector<1x128xf32>
    %283 = vector.broadcast %282 : vector<1x128xf32> to vector<32x128xf32>
    %284 = arith.addf %281, %283 : vector<32x128xf32>
    %cst_84 = arith.constant 0.000000e+00 : f32
    %285 = vector.broadcast %cst_84 : f32 to vector<32x128xf32>
    %286 = arith.subf %285, %284 : vector<32x128xf32>
    %287 = math.exp %286 : vector<32x128xf32>
    %cst_85 = arith.constant 1.000000e+00 : f32
    %288 = vector.broadcast %cst_85 : f32 to vector<32x128xf32>
    %289 = arith.addf %288, %287 : vector<32x128xf32>
    %cst_86 = arith.constant 1.000000e+00 : f32
    %290 = vector.broadcast %cst_86 : f32 to vector<32x128xf32>
    %291 = arith.divf %290, %289 : vector<32x128xf32>
    %292 = arith.mulf %284, %291 : vector<32x128xf32>
    %c256 = arith.constant 256 : index
    %c0_87 = arith.constant 0 : index
    %293 = vector.load %arg1[%c256, %c0_87] : memref<832x32xf32, #tpu.memory_space<vmem>>, vector<128x32xf32>
    %cst_88 = arith.constant dense<0.000000e+00> : vector<32x32xf32>
    %294 = tpu.matmul %292, %293, %cst_88 {dimension_numbers = #tpu.dot_dimension_numbers<[1], [0], [0], [1], [0, 0, 1, 1], [], []>} : vector<32x128xf32>, vector<128x32xf32>, vector<32x32xf32> -> vector<32x32xf32>
    %295 = vector.extract_strided_slice %5 {offsets = [12, 0], sizes = [1, 32], strides = [1, 1]} : vector<15x32xf32> to vector<1x32xf32>
    %296 = vector.broadcast %295 : vector<1x32xf32> to vector<32x32xf32>
    %297 = arith.addf %294, %296 : vector<32x32xf32>
    %cst_89 = arith.constant 1.500000e+00 : f32
    %298 = vector.broadcast %cst_89 : f32 to vector<32x32xf32>
    %299 = arith.mulf %298, %255 : vector<32x32xf32>
    %cst_90 = arith.constant 5.000000e-01 : f32
    %300 = vector.broadcast %cst_90 : f32 to vector<32x32xf32>
    %301 = arith.mulf %300, %297 : vector<32x32xf32>
    %302 = arith.addf %299, %301 : vector<32x32xf32>
    %303 = vector.extract_strided_slice %5 {offsets = [13, 0], sizes = [1, 32], strides = [1, 1]} : vector<15x32xf32> to vector<1x32xf32>
    %304 = vector.extract_strided_slice %5 {offsets = [14, 0], sizes = [1, 32], strides = [1, 1]} : vector<15x32xf32> to vector<1x32xf32>
    %cst_91 = arith.constant dense<0.000000e+00> : vector<32xf32>
    %305 = vector.multi_reduction <add>, %302, %cst_91 [1] : vector<32x32xf32> to vector<32xf32>
    %306 = vector.shape_cast %305 : vector<32xf32> to vector<32x1xf32>
    %cst_92 = arith.constant 3.200000e+01 : f32
    %307 = vector.broadcast %cst_92 : f32 to vector<32x1xf32>
    %308 = arith.divf %306, %307 : vector<32x1xf32>
    %309 = arith.mulf %302, %302 : vector<32x32xf32>
    %cst_93 = arith.constant dense<0.000000e+00> : vector<32xf32>
    %310 = vector.multi_reduction <add>, %309, %cst_93 [1] : vector<32x32xf32> to vector<32xf32>
    %311 = vector.shape_cast %310 : vector<32xf32> to vector<32x1xf32>
    %cst_94 = arith.constant 3.200000e+01 : f32
    %312 = vector.broadcast %cst_94 : f32 to vector<32x1xf32>
    %313 = arith.divf %311, %312 : vector<32x1xf32>
    %314 = arith.mulf %308, %308 : vector<32x1xf32>
    %315 = arith.subf %313, %314 : vector<32x1xf32>
    %316 = vector.broadcast %308 : vector<32x1xf32> to vector<32x32xf32>
    %317 = arith.subf %302, %316 : vector<32x32xf32>
    %cst_95 = arith.constant 9.99999974E-6 : f32
    %318 = vector.broadcast %cst_95 : f32 to vector<32x1xf32>
    %319 = arith.addf %315, %318 : vector<32x1xf32>
    %320 = math.rsqrt %319 : vector<32x1xf32>
    %321 = vector.broadcast %320 : vector<32x1xf32> to vector<32x32xf32>
    %322 = arith.mulf %317, %321 : vector<32x32xf32>
    %323 = vector.broadcast %303 : vector<1x32xf32> to vector<32x32xf32>
    %324 = arith.mulf %322, %323 : vector<32x32xf32>
    %325 = vector.broadcast %304 : vector<1x32xf32> to vector<32x32xf32>
    %326 = arith.addf %324, %325 : vector<32x32xf32>
    %c112 = arith.constant 112 : index
    %c0_96 = arith.constant 0 : index
    %327 = vector.load %arg1[%c112, %c0_96] : memref<832x32xf32, #tpu.memory_space<vmem>>, vector<15x32xf32>
    %328 = vector.extract_strided_slice %327 {offsets = [0, 0], sizes = [1, 32], strides = [1, 1]} : vector<15x32xf32> to vector<1x32xf32>
    %329 = vector.extract_strided_slice %327 {offsets = [1, 0], sizes = [1, 32], strides = [1, 1]} : vector<15x32xf32> to vector<1x32xf32>
    %cst_97 = arith.constant dense<0.000000e+00> : vector<32xf32>
    %330 = vector.multi_reduction <add>, %326, %cst_97 [1] : vector<32x32xf32> to vector<32xf32>
    %331 = vector.shape_cast %330 : vector<32xf32> to vector<32x1xf32>
    %cst_98 = arith.constant 3.200000e+01 : f32
    %332 = vector.broadcast %cst_98 : f32 to vector<32x1xf32>
    %333 = arith.divf %331, %332 : vector<32x1xf32>
    %334 = arith.mulf %326, %326 : vector<32x32xf32>
    %cst_99 = arith.constant dense<0.000000e+00> : vector<32xf32>
    %335 = vector.multi_reduction <add>, %334, %cst_99 [1] : vector<32x32xf32> to vector<32xf32>
    %336 = vector.shape_cast %335 : vector<32xf32> to vector<32x1xf32>
    %cst_100 = arith.constant 3.200000e+01 : f32
    %337 = vector.broadcast %cst_100 : f32 to vector<32x1xf32>
    %338 = arith.divf %336, %337 : vector<32x1xf32>
    %339 = arith.mulf %333, %333 : vector<32x1xf32>
    %340 = arith.subf %338, %339 : vector<32x1xf32>
    %341 = vector.broadcast %333 : vector<32x1xf32> to vector<32x32xf32>
    %342 = arith.subf %326, %341 : vector<32x32xf32>
    %cst_101 = arith.constant 9.99999974E-6 : f32
    %343 = vector.broadcast %cst_101 : f32 to vector<32x1xf32>
    %344 = arith.addf %340, %343 : vector<32x1xf32>
    %345 = math.rsqrt %344 : vector<32x1xf32>
    %346 = vector.broadcast %345 : vector<32x1xf32> to vector<32x32xf32>
    %347 = arith.mulf %342, %346 : vector<32x32xf32>
    %348 = vector.broadcast %328 : vector<1x32xf32> to vector<32x32xf32>
    %349 = arith.mulf %347, %348 : vector<32x32xf32>
    %350 = vector.broadcast %329 : vector<1x32xf32> to vector<32x32xf32>
    %351 = arith.addf %349, %350 : vector<32x32xf32>
    %c80 = arith.constant 80 : index
    %c0_102 = arith.constant 0 : index
    %352 = vector.load %arg2[%c80, %c0_102] : memref<160x128xf32, #tpu.memory_space<vmem>>, vector<32x128xf32>
    %cst_103 = arith.constant dense<0.000000e+00> : vector<32x128xf32>
    %353 = tpu.matmul %351, %352, %cst_103 {dimension_numbers = #tpu.dot_dimension_numbers<[1], [0], [0], [1], [0, 0, 1, 1], [], []>} : vector<32x32xf32>, vector<32x128xf32>, vector<32x128xf32> -> vector<32x128xf32>
    %c112_104 = arith.constant 112 : index
    %c0_105 = arith.constant 0 : index
    %354 = vector.load %arg2[%c112_104, %c0_105] : memref<160x128xf32, #tpu.memory_space<vmem>>, vector<1x128xf32>
    %355 = vector.broadcast %354 : vector<1x128xf32> to vector<32x128xf32>
    %356 = arith.addf %353, %355 : vector<32x128xf32>
    %cst_106 = arith.constant 0.000000e+00 : f32
    %357 = vector.broadcast %cst_106 : f32 to vector<32x128xf32>
    %358 = arith.subf %357, %356 : vector<32x128xf32>
    %359 = math.exp %358 : vector<32x128xf32>
    %cst_107 = arith.constant 1.000000e+00 : f32
    %360 = vector.broadcast %cst_107 : f32 to vector<32x128xf32>
    %361 = arith.addf %360, %359 : vector<32x128xf32>
    %cst_108 = arith.constant 1.000000e+00 : f32
    %362 = vector.broadcast %cst_108 : f32 to vector<32x128xf32>
    %363 = arith.divf %362, %361 : vector<32x128xf32>
    %364 = arith.mulf %356, %363 : vector<32x128xf32>
    %c384 = arith.constant 384 : index
    %c0_109 = arith.constant 0 : index
    %365 = vector.load %arg1[%c384, %c0_109] : memref<832x32xf32, #tpu.memory_space<vmem>>, vector<128x32xf32>
    %cst_110 = arith.constant dense<0.000000e+00> : vector<32x32xf32>
    %366 = tpu.matmul %364, %365, %cst_110 {dimension_numbers = #tpu.dot_dimension_numbers<[1], [0], [0], [1], [0, 0, 1, 1], [], []>} : vector<32x128xf32>, vector<128x32xf32>, vector<32x32xf32> -> vector<32x32xf32>
    %367 = vector.extract_strided_slice %327 {offsets = [2, 0], sizes = [1, 32], strides = [1, 1]} : vector<15x32xf32> to vector<1x32xf32>
    %368 = vector.broadcast %367 : vector<1x32xf32> to vector<32x32xf32>
    %369 = arith.addf %366, %368 : vector<32x32xf32>
    %cst_111 = arith.constant 1.500000e+00 : f32
    %370 = vector.broadcast %cst_111 : f32 to vector<32x32xf32>
    %371 = arith.mulf %370, %326 : vector<32x32xf32>
    %cst_112 = arith.constant 5.000000e-01 : f32
    %372 = vector.broadcast %cst_112 : f32 to vector<32x32xf32>
    %373 = arith.mulf %372, %369 : vector<32x32xf32>
    %374 = arith.addf %371, %373 : vector<32x32xf32>
    %375 = vector.extract_strided_slice %327 {offsets = [3, 0], sizes = [1, 32], strides = [1, 1]} : vector<15x32xf32> to vector<1x32xf32>
    %376 = vector.extract_strided_slice %327 {offsets = [4, 0], sizes = [1, 32], strides = [1, 1]} : vector<15x32xf32> to vector<1x32xf32>
    %cst_113 = arith.constant dense<0.000000e+00> : vector<32xf32>
    %377 = vector.multi_reduction <add>, %374, %cst_113 [1] : vector<32x32xf32> to vector<32xf32>
    %378 = vector.shape_cast %377 : vector<32xf32> to vector<32x1xf32>
    %cst_114 = arith.constant 3.200000e+01 : f32
    %379 = vector.broadcast %cst_114 : f32 to vector<32x1xf32>
    %380 = arith.divf %378, %379 : vector<32x1xf32>
    %381 = arith.mulf %374, %374 : vector<32x32xf32>
    %cst_115 = arith.constant dense<0.000000e+00> : vector<32xf32>
    %382 = vector.multi_reduction <add>, %381, %cst_115 [1] : vector<32x32xf32> to vector<32xf32>
    %383 = vector.shape_cast %382 : vector<32xf32> to vector<32x1xf32>
    %cst_116 = arith.constant 3.200000e+01 : f32
    %384 = vector.broadcast %cst_116 : f32 to vector<32x1xf32>
    %385 = arith.divf %383, %384 : vector<32x1xf32>
    %386 = arith.mulf %380, %380 : vector<32x1xf32>
    %387 = arith.subf %385, %386 : vector<32x1xf32>
    %388 = vector.broadcast %380 : vector<32x1xf32> to vector<32x32xf32>
    %389 = arith.subf %374, %388 : vector<32x32xf32>
    %cst_117 = arith.constant 9.99999974E-6 : f32
    %390 = vector.broadcast %cst_117 : f32 to vector<32x1xf32>
    %391 = arith.addf %387, %390 : vector<32x1xf32>
    %392 = math.rsqrt %391 : vector<32x1xf32>
    %393 = vector.broadcast %392 : vector<32x1xf32> to vector<32x32xf32>
    %394 = arith.mulf %389, %393 : vector<32x32xf32>
    %395 = vector.broadcast %375 : vector<1x32xf32> to vector<32x32xf32>
    %396 = arith.mulf %394, %395 : vector<32x32xf32>
    %397 = vector.broadcast %376 : vector<1x32xf32> to vector<32x32xf32>
    %398 = arith.addf %396, %397 : vector<32x32xf32>
    %c40_118 = arith.constant 40 : index
    %c0_119 = arith.constant 0 : index
    %399 = vector.load %arg3[%c40_118, %c0_119] : memref<80x96xf32, #tpu.memory_space<vmem>>, vector<32x96xf32>
    %cst_120 = arith.constant dense<0.000000e+00> : vector<32x96xf32>
    %400 = tpu.matmul %398, %399, %cst_120 {dimension_numbers = #tpu.dot_dimension_numbers<[1], [0], [0], [1], [0, 0, 1, 1], [], []>} : vector<32x32xf32>, vector<32x96xf32>, vector<32x96xf32> -> vector<32x96xf32>
    %c72_121 = arith.constant 72 : index
    %c0_122 = arith.constant 0 : index
    %401 = vector.load %arg3[%c72_121, %c0_122] : memref<80x96xf32, #tpu.memory_space<vmem>>, vector<1x96xf32>
    %402 = vector.broadcast %401 : vector<1x96xf32> to vector<32x96xf32>
    %403 = arith.addf %400, %402 : vector<32x96xf32>
    %404 = vector.extract_strided_slice %403 {offsets = [0, 0], sizes = [32, 8], strides = [1, 1]} : vector<32x96xf32> to vector<32x8xf32>
    %405 = vector.shape_cast %404 : vector<32x8xf32> to vector<2x16x8xf32>
    %406 = vector.extract_strided_slice %403 {offsets = [0, 32], sizes = [32, 8], strides = [1, 1]} : vector<32x96xf32> to vector<32x8xf32>
    %407 = vector.shape_cast %406 : vector<32x8xf32> to vector<2x16x8xf32>
    %408 = vector.extract_strided_slice %403 {offsets = [0, 64], sizes = [32, 8], strides = [1, 1]} : vector<32x96xf32> to vector<32x8xf32>
    %409 = vector.shape_cast %408 : vector<32x8xf32> to vector<2x16x8xf32>
    "tpu.trace_start"() <{level = 10 : i32, message = "bqd,bkd->bqk"}> : () -> ()
    %cst_123 = arith.constant dense<0.000000e+00> : vector<2x16x16xf32>
    %410 = tpu.matmul %405, %407, %cst_123 {dimension_numbers = #tpu.dot_dimension_numbers<[2], [2], [1], [1], [0, 0, 0, 1, 1, 1], [0], [0]>} : vector<2x16x8xf32>, vector<2x16x8xf32>, vector<2x16x16xf32> -> vector<2x16x16xf32>
    "tpu.trace_stop"() : () -> ()
    %cst_124 = arith.constant 0.353553385 : f32
    %411 = vector.broadcast %cst_124 : f32 to vector<2x16x16xf32>
    %412 = arith.mulf %410, %411 : vector<2x16x16xf32>
    %cst_125 = arith.constant dense<0xFF800000> : vector<2x16xf32>
    %413 = vector.multi_reduction <maximumf>, %412, %cst_125 [2] : vector<2x16x16xf32> to vector<2x16xf32>
    %414 = vector.shape_cast %413 : vector<2x16xf32> to vector<2x16x1xf32>
    %415 = vector.broadcast %414 : vector<2x16x1xf32> to vector<2x16x16xf32>
    %416 = arith.subf %412, %415 : vector<2x16x16xf32>
    %417 = math.exp %416 : vector<2x16x16xf32>
    %cst_126 = arith.constant dense<0.000000e+00> : vector<2x16xf32>
    %418 = vector.multi_reduction <add>, %417, %cst_126 [2] : vector<2x16x16xf32> to vector<2x16xf32>
    %419 = vector.shape_cast %418 : vector<2x16xf32> to vector<2x16x1xf32>
    %420 = tpu.reciprocal %419 {approx = true} : vector<2x16x1xf32> -> vector<2x16x1xf32>
    %421 = vector.broadcast %420 : vector<2x16x1xf32> to vector<2x16x16xf32>
    %422 = arith.mulf %417, %421 : vector<2x16x16xf32>
    "tpu.trace_start"() <{level = 10 : i32, message = "bqk,bkd->bqd"}> : () -> ()
    %cst_127 = arith.constant dense<0.000000e+00> : vector<2x16x8xf32>
    %423 = tpu.matmul %422, %409, %cst_127 {dimension_numbers = #tpu.dot_dimension_numbers<[2], [1], [1], [2], [0, 0, 0, 1, 1, 2], [0], [0]>} : vector<2x16x16xf32>, vector<2x16x8xf32>, vector<2x16x8xf32> -> vector<2x16x8xf32>
    "tpu.trace_stop"() : () -> ()
    %424 = vector.shape_cast %423 : vector<2x16x8xf32> to vector<32x8xf32>
    %425 = vector.extract_strided_slice %403 {offsets = [0, 8], sizes = [32, 8], strides = [1, 1]} : vector<32x96xf32> to vector<32x8xf32>
    %426 = vector.shape_cast %425 : vector<32x8xf32> to vector<2x16x8xf32>
    %427 = vector.extract_strided_slice %403 {offsets = [0, 40], sizes = [32, 8], strides = [1, 1]} : vector<32x96xf32> to vector<32x8xf32>
    %428 = vector.shape_cast %427 : vector<32x8xf32> to vector<2x16x8xf32>
    %429 = vector.extract_strided_slice %403 {offsets = [0, 72], sizes = [32, 8], strides = [1, 1]} : vector<32x96xf32> to vector<32x8xf32>
    %430 = vector.shape_cast %429 : vector<32x8xf32> to vector<2x16x8xf32>
    "tpu.trace_start"() <{level = 10 : i32, message = "bqd,bkd->bqk"}> : () -> ()
    %cst_128 = arith.constant dense<0.000000e+00> : vector<2x16x16xf32>
    %431 = tpu.matmul %426, %428, %cst_128 {dimension_numbers = #tpu.dot_dimension_numbers<[2], [2], [1], [1], [0, 0, 0, 1, 1, 1], [0], [0]>} : vector<2x16x8xf32>, vector<2x16x8xf32>, vector<2x16x16xf32> -> vector<2x16x16xf32>
    "tpu.trace_stop"() : () -> ()
    %cst_129 = arith.constant 0.353553385 : f32
    %432 = vector.broadcast %cst_129 : f32 to vector<2x16x16xf32>
    %433 = arith.mulf %431, %432 : vector<2x16x16xf32>
    %cst_130 = arith.constant dense<0xFF800000> : vector<2x16xf32>
    %434 = vector.multi_reduction <maximumf>, %433, %cst_130 [2] : vector<2x16x16xf32> to vector<2x16xf32>
    %435 = vector.shape_cast %434 : vector<2x16xf32> to vector<2x16x1xf32>
    %436 = vector.broadcast %435 : vector<2x16x1xf32> to vector<2x16x16xf32>
    %437 = arith.subf %433, %436 : vector<2x16x16xf32>
    %438 = math.exp %437 : vector<2x16x16xf32>
    %cst_131 = arith.constant dense<0.000000e+00> : vector<2x16xf32>
    %439 = vector.multi_reduction <add>, %438, %cst_131 [2] : vector<2x16x16xf32> to vector<2x16xf32>
    %440 = vector.shape_cast %439 : vector<2x16xf32> to vector<2x16x1xf32>
    %441 = tpu.reciprocal %440 {approx = true} : vector<2x16x1xf32> -> vector<2x16x1xf32>
    %442 = vector.broadcast %441 : vector<2x16x1xf32> to vector<2x16x16xf32>
    %443 = arith.mulf %438, %442 : vector<2x16x16xf32>
    "tpu.trace_start"() <{level = 10 : i32, message = "bqk,bkd->bqd"}> : () -> ()
    %cst_132 = arith.constant dense<0.000000e+00> : vector<2x16x8xf32>
    %444 = tpu.matmul %443, %430, %cst_132 {dimension_numbers = #tpu.dot_dimension_numbers<[2], [1], [1], [2], [0, 0, 0, 1, 1, 2], [0], [0]>} : vector<2x16x16xf32>, vector<2x16x8xf32>, vector<2x16x8xf32> -> vector<2x16x8xf32>
    "tpu.trace_stop"() : () -> ()
    %445 = vector.shape_cast %444 : vector<2x16x8xf32> to vector<32x8xf32>
    %446 = vector.extract_strided_slice %403 {offsets = [0, 16], sizes = [32, 8], strides = [1, 1]} : vector<32x96xf32> to vector<32x8xf32>
    %447 = vector.shape_cast %446 : vector<32x8xf32> to vector<2x16x8xf32>
    %448 = vector.extract_strided_slice %403 {offsets = [0, 48], sizes = [32, 8], strides = [1, 1]} : vector<32x96xf32> to vector<32x8xf32>
    %449 = vector.shape_cast %448 : vector<32x8xf32> to vector<2x16x8xf32>
    %450 = vector.extract_strided_slice %403 {offsets = [0, 80], sizes = [32, 8], strides = [1, 1]} : vector<32x96xf32> to vector<32x8xf32>
    %451 = vector.shape_cast %450 : vector<32x8xf32> to vector<2x16x8xf32>
    "tpu.trace_start"() <{level = 10 : i32, message = "bqd,bkd->bqk"}> : () -> ()
    %cst_133 = arith.constant dense<0.000000e+00> : vector<2x16x16xf32>
    %452 = tpu.matmul %447, %449, %cst_133 {dimension_numbers = #tpu.dot_dimension_numbers<[2], [2], [1], [1], [0, 0, 0, 1, 1, 1], [0], [0]>} : vector<2x16x8xf32>, vector<2x16x8xf32>, vector<2x16x16xf32> -> vector<2x16x16xf32>
    "tpu.trace_stop"() : () -> ()
    %cst_134 = arith.constant 0.353553385 : f32
    %453 = vector.broadcast %cst_134 : f32 to vector<2x16x16xf32>
    %454 = arith.mulf %452, %453 : vector<2x16x16xf32>
    %cst_135 = arith.constant dense<0xFF800000> : vector<2x16xf32>
    %455 = vector.multi_reduction <maximumf>, %454, %cst_135 [2] : vector<2x16x16xf32> to vector<2x16xf32>
    %456 = vector.shape_cast %455 : vector<2x16xf32> to vector<2x16x1xf32>
    %457 = vector.broadcast %456 : vector<2x16x1xf32> to vector<2x16x16xf32>
    %458 = arith.subf %454, %457 : vector<2x16x16xf32>
    %459 = math.exp %458 : vector<2x16x16xf32>
    %cst_136 = arith.constant dense<0.000000e+00> : vector<2x16xf32>
    %460 = vector.multi_reduction <add>, %459, %cst_136 [2] : vector<2x16x16xf32> to vector<2x16xf32>
    %461 = vector.shape_cast %460 : vector<2x16xf32> to vector<2x16x1xf32>
    %462 = tpu.reciprocal %461 {approx = true} : vector<2x16x1xf32> -> vector<2x16x1xf32>
    %463 = vector.broadcast %462 : vector<2x16x1xf32> to vector<2x16x16xf32>
    %464 = arith.mulf %459, %463 : vector<2x16x16xf32>
    "tpu.trace_start"() <{level = 10 : i32, message = "bqk,bkd->bqd"}> : () -> ()
    %cst_137 = arith.constant dense<0.000000e+00> : vector<2x16x8xf32>
    %465 = tpu.matmul %464, %451, %cst_137 {dimension_numbers = #tpu.dot_dimension_numbers<[2], [1], [1], [2], [0, 0, 0, 1, 1, 2], [0], [0]>} : vector<2x16x16xf32>, vector<2x16x8xf32>, vector<2x16x8xf32> -> vector<2x16x8xf32>
    "tpu.trace_stop"() : () -> ()
    %466 = vector.shape_cast %465 : vector<2x16x8xf32> to vector<32x8xf32>
    %467 = vector.extract_strided_slice %403 {offsets = [0, 24], sizes = [32, 8], strides = [1, 1]} : vector<32x96xf32> to vector<32x8xf32>
    %468 = vector.shape_cast %467 : vector<32x8xf32> to vector<2x16x8xf32>
    %469 = vector.extract_strided_slice %403 {offsets = [0, 56], sizes = [32, 8], strides = [1, 1]} : vector<32x96xf32> to vector<32x8xf32>
    %470 = vector.shape_cast %469 : vector<32x8xf32> to vector<2x16x8xf32>
    %471 = vector.extract_strided_slice %403 {offsets = [0, 88], sizes = [32, 8], strides = [1, 1]} : vector<32x96xf32> to vector<32x8xf32>
    %472 = vector.shape_cast %471 : vector<32x8xf32> to vector<2x16x8xf32>
    "tpu.trace_start"() <{level = 10 : i32, message = "bqd,bkd->bqk"}> : () -> ()
    %cst_138 = arith.constant dense<0.000000e+00> : vector<2x16x16xf32>
    %473 = tpu.matmul %468, %470, %cst_138 {dimension_numbers = #tpu.dot_dimension_numbers<[2], [2], [1], [1], [0, 0, 0, 1, 1, 1], [0], [0]>} : vector<2x16x8xf32>, vector<2x16x8xf32>, vector<2x16x16xf32> -> vector<2x16x16xf32>
    "tpu.trace_stop"() : () -> ()
    %cst_139 = arith.constant 0.353553385 : f32
    %474 = vector.broadcast %cst_139 : f32 to vector<2x16x16xf32>
    %475 = arith.mulf %473, %474 : vector<2x16x16xf32>
    %cst_140 = arith.constant dense<0xFF800000> : vector<2x16xf32>
    %476 = vector.multi_reduction <maximumf>, %475, %cst_140 [2] : vector<2x16x16xf32> to vector<2x16xf32>
    %477 = vector.shape_cast %476 : vector<2x16xf32> to vector<2x16x1xf32>
    %478 = vector.broadcast %477 : vector<2x16x1xf32> to vector<2x16x16xf32>
    %479 = arith.subf %475, %478 : vector<2x16x16xf32>
    %480 = math.exp %479 : vector<2x16x16xf32>
    %cst_141 = arith.constant dense<0.000000e+00> : vector<2x16xf32>
    %481 = vector.multi_reduction <add>, %480, %cst_141 [2] : vector<2x16x16xf32> to vector<2x16xf32>
    %482 = vector.shape_cast %481 : vector<2x16xf32> to vector<2x16x1xf32>
    %483 = tpu.reciprocal %482 {approx = true} : vector<2x16x1xf32> -> vector<2x16x1xf32>
    %484 = vector.broadcast %483 : vector<2x16x1xf32> to vector<2x16x16xf32>
    %485 = arith.mulf %480, %484 : vector<2x16x16xf32>
    "tpu.trace_start"() <{level = 10 : i32, message = "bqk,bkd->bqd"}> : () -> ()
    %cst_142 = arith.constant dense<0.000000e+00> : vector<2x16x8xf32>
    %486 = tpu.matmul %485, %472, %cst_142 {dimension_numbers = #tpu.dot_dimension_numbers<[2], [1], [1], [2], [0, 0, 0, 1, 1, 2], [0], [0]>} : vector<2x16x16xf32>, vector<2x16x8xf32>, vector<2x16x8xf32> -> vector<2x16x8xf32>
    "tpu.trace_stop"() : () -> ()
    %487 = vector.shape_cast %486 : vector<2x16x8xf32> to vector<32x8xf32>
    %488 = tpu.concatenate %424, %445, %466, %487 in 1 : vector<32x8xf32>, vector<32x8xf32>, vector<32x8xf32>, vector<32x8xf32> -> vector<32x32xf32>
    %c672 = arith.constant 672 : index
    %c0_143 = arith.constant 0 : index
    %489 = vector.load %arg1[%c672, %c0_143] : memref<832x32xf32, #tpu.memory_space<vmem>>, vector<32x32xf32>
    %cst_144 = arith.constant dense<0.000000e+00> : vector<32x32xf32>
    %490 = tpu.matmul %488, %489, %cst_144 {dimension_numbers = #tpu.dot_dimension_numbers<[1], [0], [0], [1], [0, 0, 1, 1], [], []>} : vector<32x32xf32>, vector<32x32xf32>, vector<32x32xf32> -> vector<32x32xf32>
    %491 = vector.extract_strided_slice %327 {offsets = [5, 0], sizes = [1, 32], strides = [1, 1]} : vector<15x32xf32> to vector<1x32xf32>
    %492 = vector.broadcast %491 : vector<1x32xf32> to vector<32x32xf32>
    %493 = arith.addf %490, %492 : vector<32x32xf32>
    %494 = arith.addf %374, %493 : vector<32x32xf32>
    %495 = vector.extract_strided_slice %327 {offsets = [6, 0], sizes = [1, 32], strides = [1, 1]} : vector<15x32xf32> to vector<1x32xf32>
    %496 = vector.extract_strided_slice %327 {offsets = [7, 0], sizes = [1, 32], strides = [1, 1]} : vector<15x32xf32> to vector<1x32xf32>
    %cst_145 = arith.constant dense<0.000000e+00> : vector<32xf32>
    %497 = vector.multi_reduction <add>, %494, %cst_145 [1] : vector<32x32xf32> to vector<32xf32>
    %498 = vector.shape_cast %497 : vector<32xf32> to vector<32x1xf32>
    %cst_146 = arith.constant 3.200000e+01 : f32
    %499 = vector.broadcast %cst_146 : f32 to vector<32x1xf32>
    %500 = arith.divf %498, %499 : vector<32x1xf32>
    %501 = arith.mulf %494, %494 : vector<32x32xf32>
    %cst_147 = arith.constant dense<0.000000e+00> : vector<32xf32>
    %502 = vector.multi_reduction <add>, %501, %cst_147 [1] : vector<32x32xf32> to vector<32xf32>
    %503 = vector.shape_cast %502 : vector<32xf32> to vector<32x1xf32>
    %cst_148 = arith.constant 3.200000e+01 : f32
    %504 = vector.broadcast %cst_148 : f32 to vector<32x1xf32>
    %505 = arith.divf %503, %504 : vector<32x1xf32>
    %506 = arith.mulf %500, %500 : vector<32x1xf32>
    %507 = arith.subf %505, %506 : vector<32x1xf32>
    %508 = vector.broadcast %500 : vector<32x1xf32> to vector<32x32xf32>
    %509 = arith.subf %494, %508 : vector<32x32xf32>
    %cst_149 = arith.constant 9.99999974E-6 : f32
    %510 = vector.broadcast %cst_149 : f32 to vector<32x1xf32>
    %511 = arith.addf %507, %510 : vector<32x1xf32>
    %512 = math.rsqrt %511 : vector<32x1xf32>
    %513 = vector.broadcast %512 : vector<32x1xf32> to vector<32x32xf32>
    %514 = arith.mulf %509, %513 : vector<32x32xf32>
    %515 = vector.broadcast %495 : vector<1x32xf32> to vector<32x32xf32>
    %516 = arith.mulf %514, %515 : vector<32x32xf32>
    %517 = vector.broadcast %496 : vector<1x32xf32> to vector<32x32xf32>
    %518 = arith.addf %516, %517 : vector<32x32xf32>
    %c40_150 = arith.constant 40 : index
    %c0_151 = arith.constant 0 : index
    %519 = vector.load %arg4[%c40_150, %c0_151] : memref<80x64xf32, #tpu.memory_space<vmem>>, vector<32x64xf32>
    %cst_152 = arith.constant dense<0.000000e+00> : vector<32x64xf32>
    %520 = tpu.matmul %518, %519, %cst_152 {dimension_numbers = #tpu.dot_dimension_numbers<[1], [0], [0], [1], [0, 0, 1, 1], [], []>} : vector<32x32xf32>, vector<32x64xf32>, vector<32x64xf32> -> vector<32x64xf32>
    %c72_153 = arith.constant 72 : index
    %c0_154 = arith.constant 0 : index
    %521 = vector.load %arg4[%c72_153, %c0_154] : memref<80x64xf32, #tpu.memory_space<vmem>>, vector<1x64xf32>
    %522 = vector.broadcast %521 : vector<1x64xf32> to vector<32x64xf32>
    %523 = arith.addf %520, %522 : vector<32x64xf32>
    %524 = vector.extract_strided_slice %523 {offsets = [0, 0], sizes = [32, 32], strides = [1, 1]} : vector<32x64xf32> to vector<32x32xf32>
    %525 = vector.extract_strided_slice %523 {offsets = [0, 32], sizes = [32, 32], strides = [1, 1]} : vector<32x64xf32> to vector<32x32xf32>
    %cst_155 = arith.constant 0.000000e+00 : f32
    %526 = vector.broadcast %cst_155 : f32 to vector<32x32xf32>
    %527 = arith.subf %526, %525 : vector<32x32xf32>
    %528 = math.exp %527 : vector<32x32xf32>
    %cst_156 = arith.constant 1.000000e+00 : f32
    %529 = vector.broadcast %cst_156 : f32 to vector<32x32xf32>
    %530 = arith.addf %529, %528 : vector<32x32xf32>
    %cst_157 = arith.constant 1.000000e+00 : f32
    %531 = vector.broadcast %cst_157 : f32 to vector<32x32xf32>
    %532 = arith.divf %531, %530 : vector<32x32xf32>
    %533 = arith.mulf %524, %532 : vector<32x32xf32>
    %c776 = arith.constant 776 : index
    %c0_158 = arith.constant 0 : index
    %534 = vector.load %arg1[%c776, %c0_158] : memref<832x32xf32, #tpu.memory_space<vmem>>, vector<7x32xf32>
    %535 = vector.extract_strided_slice %534 {offsets = [0, 0], sizes = [1, 32], strides = [1, 1]} : vector<7x32xf32> to vector<1x32xf32>
    %536 = vector.broadcast %535 : vector<1x32xf32> to vector<32x32xf32>
    %537 = arith.mulf %533, %536 : vector<32x32xf32>
    %538 = vector.extract_strided_slice %534 {offsets = [1, 0], sizes = [1, 32], strides = [1, 1]} : vector<7x32xf32> to vector<1x32xf32>
    %539 = vector.broadcast %538 : vector<1x32xf32> to vector<32x32xf32>
    %540 = arith.mulf %533, %539 : vector<32x32xf32>
    %541 = vector.extract_strided_slice %534 {offsets = [2, 0], sizes = [1, 32], strides = [1, 1]} : vector<7x32xf32> to vector<1x32xf32>
    %542 = vector.broadcast %541 : vector<1x32xf32> to vector<32x32xf32>
    %543 = arith.mulf %533, %542 : vector<32x32xf32>
    %544 = vector.extract_strided_slice %534 {offsets = [3, 0], sizes = [1, 32], strides = [1, 1]} : vector<7x32xf32> to vector<1x32xf32>
    %545 = vector.broadcast %544 : vector<1x32xf32> to vector<32x32xf32>
    %546 = arith.mulf %533, %545 : vector<32x32xf32>
    %547 = vector.extract_strided_slice %534 {offsets = [4, 0], sizes = [1, 32], strides = [1, 1]} : vector<7x32xf32> to vector<1x32xf32>
    %548 = vector.broadcast %547 : vector<1x32xf32> to vector<32x32xf32>
    %549 = arith.mulf %533, %548 : vector<32x32xf32>
    %550 = vector.extract_strided_slice %534 {offsets = [5, 0], sizes = [1, 32], strides = [1, 1]} : vector<7x32xf32> to vector<1x32xf32>
    %551 = vector.broadcast %550 : vector<1x32xf32> to vector<32x32xf32>
    %552 = arith.mulf %533, %551 : vector<32x32xf32>
    %553 = vector.extract_strided_slice %534 {offsets = [6, 0], sizes = [1, 32], strides = [1, 1]} : vector<7x32xf32> to vector<1x32xf32>
    %554 = vector.broadcast %553 : vector<1x32xf32> to vector<32x32xf32>
    %555 = arith.mulf %533, %554 : vector<32x32xf32>
    %556 = tpu.concatenate %537, %540, %543, %546, %549, %552, %555 in 0 : vector<32x32xf32>, vector<32x32xf32>, vector<32x32xf32>, vector<32x32xf32>, vector<32x32xf32>, vector<32x32xf32>, vector<32x32xf32> -> vector<224x32xf32>
    %c0_159 = arith.constant 0 : index
    %c0_160 = arith.constant 0 : index
    %557 = vector.load %arg5[%c0_159, %c0_160] : memref<32x224xf32, #tpu.memory_space<vmem>>, vector<32x224xf32>
    %cst_161 = arith.constant dense<0.000000e+00> : vector<32x32xf32>
    %558 = tpu.matmul %557, %556, %cst_161 {dimension_numbers = #tpu.dot_dimension_numbers<[1], [0], [0], [1], [0, 0, 1, 1], [], []>} : vector<32x224xf32>, vector<224x32xf32>, vector<32x32xf32> -> vector<32x32xf32>
    %559 = vector.extract_strided_slice %327 {offsets = [8, 0], sizes = [1, 32], strides = [1, 1]} : vector<15x32xf32> to vector<1x32xf32>
    %560 = vector.broadcast %559 : vector<1x32xf32> to vector<32x32xf32>
    %561 = arith.addf %558, %560 : vector<32x32xf32>
    %cst_162 = arith.constant 0.000000e+00 : f32
    %562 = vector.broadcast %cst_162 : f32 to vector<32x32xf32>
    %563 = arith.subf %562, %561 : vector<32x32xf32>
    %564 = math.exp %563 : vector<32x32xf32>
    %cst_163 = arith.constant 1.000000e+00 : f32
    %565 = vector.broadcast %cst_163 : f32 to vector<32x32xf32>
    %566 = arith.addf %565, %564 : vector<32x32xf32>
    %cst_164 = arith.constant 1.000000e+00 : f32
    %567 = vector.broadcast %cst_164 : f32 to vector<32x32xf32>
    %568 = arith.divf %567, %566 : vector<32x32xf32>
    %569 = arith.mulf %561, %568 : vector<32x32xf32>
    %c736 = arith.constant 736 : index
    %c0_165 = arith.constant 0 : index
    %570 = vector.load %arg1[%c736, %c0_165] : memref<832x32xf32, #tpu.memory_space<vmem>>, vector<32x32xf32>
    %cst_166 = arith.constant dense<0.000000e+00> : vector<32x32xf32>
    %571 = tpu.matmul %569, %570, %cst_166 {dimension_numbers = #tpu.dot_dimension_numbers<[1], [0], [0], [1], [0, 0, 1, 1], [], []>} : vector<32x32xf32>, vector<32x32xf32>, vector<32x32xf32> -> vector<32x32xf32>
    %572 = vector.extract_strided_slice %327 {offsets = [9, 0], sizes = [1, 32], strides = [1, 1]} : vector<15x32xf32> to vector<1x32xf32>
    %573 = vector.broadcast %572 : vector<1x32xf32> to vector<32x32xf32>
    %574 = arith.addf %571, %573 : vector<32x32xf32>
    %cst_167 = arith.constant 2.000000e+00 : f32
    %575 = vector.broadcast %cst_167 : f32 to vector<32x32xf32>
    %576 = arith.mulf %575, %494 : vector<32x32xf32>
    %577 = arith.addf %576, %574 : vector<32x32xf32>
    %578 = vector.extract_strided_slice %327 {offsets = [10, 0], sizes = [1, 32], strides = [1, 1]} : vector<15x32xf32> to vector<1x32xf32>
    %579 = vector.extract_strided_slice %327 {offsets = [11, 0], sizes = [1, 32], strides = [1, 1]} : vector<15x32xf32> to vector<1x32xf32>
    %cst_168 = arith.constant dense<0.000000e+00> : vector<32xf32>
    %580 = vector.multi_reduction <add>, %577, %cst_168 [1] : vector<32x32xf32> to vector<32xf32>
    %581 = vector.shape_cast %580 : vector<32xf32> to vector<32x1xf32>
    %cst_169 = arith.constant 3.200000e+01 : f32
    %582 = vector.broadcast %cst_169 : f32 to vector<32x1xf32>
    %583 = arith.divf %581, %582 : vector<32x1xf32>
    %584 = arith.mulf %577, %577 : vector<32x32xf32>
    %cst_170 = arith.constant dense<0.000000e+00> : vector<32xf32>
    %585 = vector.multi_reduction <add>, %584, %cst_170 [1] : vector<32x32xf32> to vector<32xf32>
    %586 = vector.shape_cast %585 : vector<32xf32> to vector<32x1xf32>
    %cst_171 = arith.constant 3.200000e+01 : f32
    %587 = vector.broadcast %cst_171 : f32 to vector<32x1xf32>
    %588 = arith.divf %586, %587 : vector<32x1xf32>
    %589 = arith.mulf %583, %583 : vector<32x1xf32>
    %590 = arith.subf %588, %589 : vector<32x1xf32>
    %591 = vector.broadcast %583 : vector<32x1xf32> to vector<32x32xf32>
    %592 = arith.subf %577, %591 : vector<32x32xf32>
    %cst_172 = arith.constant 9.99999974E-6 : f32
    %593 = vector.broadcast %cst_172 : f32 to vector<32x1xf32>
    %594 = arith.addf %590, %593 : vector<32x1xf32>
    %595 = math.rsqrt %594 : vector<32x1xf32>
    %596 = vector.broadcast %595 : vector<32x1xf32> to vector<32x32xf32>
    %597 = arith.mulf %592, %596 : vector<32x32xf32>
    %598 = vector.broadcast %578 : vector<1x32xf32> to vector<32x32xf32>
    %599 = arith.mulf %597, %598 : vector<32x32xf32>
    %600 = vector.broadcast %579 : vector<1x32xf32> to vector<32x32xf32>
    %601 = arith.addf %599, %600 : vector<32x32xf32>
    %c120 = arith.constant 120 : index
    %c0_173 = arith.constant 0 : index
    %602 = vector.load %arg2[%c120, %c0_173] : memref<160x128xf32, #tpu.memory_space<vmem>>, vector<32x128xf32>
    %cst_174 = arith.constant dense<0.000000e+00> : vector<32x128xf32>
    %603 = tpu.matmul %601, %602, %cst_174 {dimension_numbers = #tpu.dot_dimension_numbers<[1], [0], [0], [1], [0, 0, 1, 1], [], []>} : vector<32x32xf32>, vector<32x128xf32>, vector<32x128xf32> -> vector<32x128xf32>
    %c152 = arith.constant 152 : index
    %c0_175 = arith.constant 0 : index
    %604 = vector.load %arg2[%c152, %c0_175] : memref<160x128xf32, #tpu.memory_space<vmem>>, vector<1x128xf32>
    %605 = vector.broadcast %604 : vector<1x128xf32> to vector<32x128xf32>
    %606 = arith.addf %603, %605 : vector<32x128xf32>
    %cst_176 = arith.constant 0.000000e+00 : f32
    %607 = vector.broadcast %cst_176 : f32 to vector<32x128xf32>
    %608 = arith.subf %607, %606 : vector<32x128xf32>
    %609 = math.exp %608 : vector<32x128xf32>
    %cst_177 = arith.constant 1.000000e+00 : f32
    %610 = vector.broadcast %cst_177 : f32 to vector<32x128xf32>
    %611 = arith.addf %610, %609 : vector<32x128xf32>
    %cst_178 = arith.constant 1.000000e+00 : f32
    %612 = vector.broadcast %cst_178 : f32 to vector<32x128xf32>
    %613 = arith.divf %612, %611 : vector<32x128xf32>
    %614 = arith.mulf %606, %613 : vector<32x128xf32>
    %c512 = arith.constant 512 : index
    %c0_179 = arith.constant 0 : index
    %615 = vector.load %arg1[%c512, %c0_179] : memref<832x32xf32, #tpu.memory_space<vmem>>, vector<128x32xf32>
    %cst_180 = arith.constant dense<0.000000e+00> : vector<32x32xf32>
    %616 = tpu.matmul %614, %615, %cst_180 {dimension_numbers = #tpu.dot_dimension_numbers<[1], [0], [0], [1], [0, 0, 1, 1], [], []>} : vector<32x128xf32>, vector<128x32xf32>, vector<32x32xf32> -> vector<32x32xf32>
    %617 = vector.extract_strided_slice %327 {offsets = [12, 0], sizes = [1, 32], strides = [1, 1]} : vector<15x32xf32> to vector<1x32xf32>
    %618 = vector.broadcast %617 : vector<1x32xf32> to vector<32x32xf32>
    %619 = arith.addf %616, %618 : vector<32x32xf32>
    %cst_181 = arith.constant 1.500000e+00 : f32
    %620 = vector.broadcast %cst_181 : f32 to vector<32x32xf32>
    %621 = arith.mulf %620, %577 : vector<32x32xf32>
    %cst_182 = arith.constant 5.000000e-01 : f32
    %622 = vector.broadcast %cst_182 : f32 to vector<32x32xf32>
    %623 = arith.mulf %622, %619 : vector<32x32xf32>
    %624 = arith.addf %621, %623 : vector<32x32xf32>
    %625 = vector.extract_strided_slice %327 {offsets = [13, 0], sizes = [1, 32], strides = [1, 1]} : vector<15x32xf32> to vector<1x32xf32>
    %626 = vector.extract_strided_slice %327 {offsets = [14, 0], sizes = [1, 32], strides = [1, 1]} : vector<15x32xf32> to vector<1x32xf32>
    %cst_183 = arith.constant dense<0.000000e+00> : vector<32xf32>
    %627 = vector.multi_reduction <add>, %624, %cst_183 [1] : vector<32x32xf32> to vector<32xf32>
    %628 = vector.shape_cast %627 : vector<32xf32> to vector<32x1xf32>
    %cst_184 = arith.constant 3.200000e+01 : f32
    %629 = vector.broadcast %cst_184 : f32 to vector<32x1xf32>
    %630 = arith.divf %628, %629 : vector<32x1xf32>
    %631 = arith.mulf %624, %624 : vector<32x32xf32>
    %cst_185 = arith.constant dense<0.000000e+00> : vector<32xf32>
    %632 = vector.multi_reduction <add>, %631, %cst_185 [1] : vector<32x32xf32> to vector<32xf32>
    %633 = vector.shape_cast %632 : vector<32xf32> to vector<32x1xf32>
    %cst_186 = arith.constant 3.200000e+01 : f32
    %634 = vector.broadcast %cst_186 : f32 to vector<32x1xf32>
    %635 = arith.divf %633, %634 : vector<32x1xf32>
    %636 = arith.mulf %630, %630 : vector<32x1xf32>
    %637 = arith.subf %635, %636 : vector<32x1xf32>
    %638 = vector.broadcast %630 : vector<32x1xf32> to vector<32x32xf32>
    %639 = arith.subf %624, %638 : vector<32x32xf32>
    %cst_187 = arith.constant 9.99999974E-6 : f32
    %640 = vector.broadcast %cst_187 : f32 to vector<32x1xf32>
    %641 = arith.addf %637, %640 : vector<32x1xf32>
    %642 = math.rsqrt %641 : vector<32x1xf32>
    %643 = vector.broadcast %642 : vector<32x1xf32> to vector<32x32xf32>
    %644 = arith.mulf %639, %643 : vector<32x32xf32>
    %645 = vector.broadcast %625 : vector<1x32xf32> to vector<32x32xf32>
    %646 = arith.mulf %644, %645 : vector<32x32xf32>
    %647 = vector.broadcast %626 : vector<1x32xf32> to vector<32x32xf32>
    %648 = arith.addf %646, %647 : vector<32x32xf32>
    %c784 = arith.constant 784 : index
    %c0_188 = arith.constant 0 : index
    %649 = vector.load %arg1[%c784, %c0_188] : memref<832x32xf32, #tpu.memory_space<vmem>>, vector<2x32xf32>
    %cst_189 = arith.constant dense<0.000000e+00> : vector<2x32xf32>
    %650 = tpu.matmul %649, %648, %cst_189 {dimension_numbers = #tpu.dot_dimension_numbers<[1], [0], [0], [1], [0, 0, 1, 1], [], []>} : vector<2x32xf32>, vector<32x32xf32>, vector<2x32xf32> -> vector<2x32xf32>
    %c792 = arith.constant 792 : index
    %c0_190 = arith.constant 0 : index
    %651 = vector.load %arg1[%c792, %c0_190] : memref<832x32xf32, #tpu.memory_space<vmem>>, vector<32x32xf32>
    %cst_191 = arith.constant dense<0.000000e+00> : vector<2x32xf32>
    %652 = tpu.matmul %650, %651, %cst_191 {dimension_numbers = #tpu.dot_dimension_numbers<[1], [0], [0], [1], [0, 0, 1, 1], [], []>} : vector<2x32xf32>, vector<32x32xf32>, vector<2x32xf32> -> vector<2x32xf32>
    %c824 = arith.constant 824 : index
    %c0_192 = arith.constant 0 : index
    %653 = vector.load %arg1[%c824, %c0_192] : memref<832x32xf32, #tpu.memory_space<vmem>>, vector<1x32xf32>
    %654 = vector.broadcast %653 : vector<1x32xf32> to vector<2x32xf32>
    %655 = arith.addf %652, %654 : vector<2x32xf32>
    %656 = vector.extract_strided_slice %655 {offsets = [0, 0], sizes = [2, 8], strides = [1, 1]} : vector<2x32xf32> to vector<2x8xf32>
    %c0_193 = arith.constant 0 : index
    %c0_194 = arith.constant 0 : index
    %657 = vector.load %arg6[%c0_193, %c0_194] : memref<2x8xf32, #tpu.memory_space<vmem>>, vector<2x8xf32>
    tpu.vector_store %arg6[%c0_193, %c0_194], %656 {strides = array<i32>} : memref<2x8xf32, #tpu.memory_space<vmem>>, vector<2x8xf32>,
    return
  }
}

</mosaic_0001>

<bundles_post_ra>
// kernel: tpu_custom_call.1
= control target key start
LH: loop header
LB: loop body
LE: loop exit
PB: predicated region body
PF: predicated region fallthrough
CT: control target
= control target key end

     0   :  { %vm40_vm0 = vcmask 523264   ;;  %s10570_s0 = inlined_call_operand.vmem [shape: f32[32,64], index: 0, kind: input, shape index: {}]   ;;  %s10571_s1 = inlined_call_operand.vmem [shape: f32[832,32], index: 1, kind: input, shape index: {}]   ;;  %s10572_s2 = inlined_call_operand.vmem [shape: f32[160,128], index: 2, kind: input, shape index: {}]   ;;  %s10573_s3 = inlined_call_operand.vmem [shape: f32[80,96], index: 3, kind: input, shape index: {}]   ;;  %s10574_s4 = inlined_call_operand.vmem [shape: f32[80,64], index: 4, kind: input, shape index: {}]   ;;  %s10575_s5 = inlined_call_operand.vmem [shape: f32[32,224], index: 5, kind: input, shape index: {}]   ;;  %s10576_s6 = inlined_call_operand.hbm [shape: f32[2,8], index: 6, kind: output, shape index: {}]  }
   0x1   :  { %v28_v0 = vld [vmem:[%s10571_s1] sm:$0xff]  ;;  %v29_v1 = vld [vmem:[%s10571_s1 + $0x8] sm:$0xff]  ;;  %v30_v2 = vld [vmem:[%s10571_s1 + $0x10] sm:$0xff] }
   0x2   :  { %v7853_v3 = vpack.c.bf16 %v29_v1, %v28_v0  ;;  %v31_v4 = vld [vmem:[%s10571_s1 + $0x18] sm:$0xff]  ;;  %v32_v6 = vld [vmem:[%s10571_s1 + $0x20] sm:$0xff]  ;;  %v33_v7 = vld [vmem:[%s10571_s1 + $0x28] sm:$0xff] }
   0x3   :  { %v7857_v5 = vpack.c.bf16 %v31_v4, %v30_v2  ;;  %v24_v8 = vld [vmem:[%s10570_s0] sm:$0xff] }
   0x4   :  { %7854 = vmatprep.subr.bf16.mxu0 %v7853_v3  ;;  %7281 = vmatprep.mubr.msk.f32.mxu0 %vm40_vm0, %v24_v8 }
   0x5   :  { %7856 = vmatpush3.bf16.msra.mxu0 %v7853_v3 }
   0x6   :  { %11 = vsyncpa [#allocation3], 0  ;;  %7858 = vmatprep.subr.bf16.mxu0 %v7857_v5  ;;  %v7861_v9 = vpack.c.bf16 %v33_v7, %v32_v6  ;;  %v34_v10 = vld [vmem:[%s10571_s1 + $0x30] sm:$0xff]  ;;  %v35_v11 = vld [vmem:[%s10571_s1 + $0x38] sm:$0xff]  ;;  %vm140_vm1 = vcmask 261120   ;;  %v202_v55 = vlaneseq  ;;  %vm657_vm2 = vcmask 64512  }
   0x7   :  { %v7865_v12 = vpack.c.bf16 %v35_v11, %v34_v10  ;;  %v25_v13 = vld [vmem:[%s10570_s0 + $0x8] sm:$0xff]  ;;  %v26_v14 = vld [vmem:[%s10570_s0 + $0x10] sm:$0xff]  ;;  %v27_v15 = vld [vmem:[%s10570_s0 + $0x18] sm:$0xff]  ;;  %s8889_s8 = smov 96   ;;  %vm834_vm4 = vcmask 130048   ;;  %s8890_s9 = smov 64  }
   0x8   :  { %v37_v16 = vld [vmem:[%s10571_s1 + $0x48] sm:$0xff]  ;;  %v36_v17 = vld [vmem:[%s10571_s1 + $0x40] sm:$0xff]  ;;  %v38_v22 = vld [vmem:[%s10571_s1 + $0x50] sm:$0xff]  ;;  %v9034_v63 = vshrl.u32 %v202_v55, 7  ;;  %s8891_s10 = smov 88   ;;  %s8892_s11 = smov 120  }
   0x9   :  { %7860 = vmatpush3.bf16.msra.mxu0 %v7857_v5  ;;  %v39_v30 = vld [vmem:[%s10571_s1 + $0x58] sm:$0xff]  ;;  %v218_v40 = vld [vmem:[%s10572_s2] sm:$0xff]  ;;  %v219_v41 = vld [vmem:[%s10572_s2 + $0x8] sm:$0xff]  ;;  %s8893_s12 = smov 56   ;;  %s8894_s13 = smov 80   ;;  %vm2321_vm5 = vcmask 195584  }
   0xa   :  { %7862 = vmatprep.subr.bf16.mxu0 %v7861_v9  ;;  %v7869_v42 = vpack.c.bf16 %v219_v41, %v218_v40  ;;  %v220_v43 = vld [vmem:[%s10572_s2 + $0x10] sm:$0xff]  ;;  %v221_v44 = vld [vmem:[%s10572_s2 + $0x18] sm:$0xff]  ;;  %v9037_v6 = vsub.s32 0, %v9034_v63  ;;  %v9042_v10 = vld [vmem:[%s10571_s1 + $0x60] sm:$0xff]  ;;  %v9045_v11 = vsub.s32 1, %v9034_v63  ;;  %s8895_s14 = smov 112  }
   0xb   :  { %v7873_v45 = vpack.c.bf16 %v221_v44, %v220_v43  ;;  %v352_v41 = vld [vmem:[%s10571_s1 + $0x80] sm:$0xff]  ;;  %v354_v44 = vld [vmem:[%s10571_s1 + $0x90] sm:$0xff]  ;;  %vm9204_vm3 = vmpackc.low %vm657_vm2, %vm657_vm2  ;;  %s8896_s15 = smov 48   ;;  %s8897_s16 = smov 72   ;;  %vm2730_vm6 = vcmask 785408   ;;  %vm8904_vm7 = vmmov 0  }
   0xc   :  { %7870 = vmatprep.subr.bf16.mxu1 %v7869_v42  ;;  %s8898_s17 = smov 104   ;;  %s8899_s18 = smov 40   ;;  %vm6756_vm8 = vcmask 58368  }
   0xd   :  { %7864 = vmatpush3.bf16.msra.mxu0 %v7861_v9  ;;  %7872 = vmatpush3.bf16.msra.mxu1 %v7869_v42  ;;  %v353_v42 = vld [vmem:[%s10571_s1 + $0x88] sm:$0xff]  ;;  %s8900_s19 = smov 8   ;;  %s8901_s20 = smov 16  }
   0xe   :  { %7866 = vmatprep.subr.bf16.mxu0 %v7865_v12  ;;  %7874 = vmatprep.subr.bf16.mxu1 %v7873_v45  ;;  %v7877_v43 = vpack.c.bf16 %v353_v42, %v352_v41  ;;  %v9111_v42 = vsub.s32 2, %v9034_v63  ;;  %s8902_s28 = smov 24   ;;  %s8906_s26 = smov [#allocation2]  }
  0x11   :  { %7868 = vmatpush3.bf16.msra.mxu0 %v7865_v12  ;;  %7876 = vmatpush3.bf16.msra.mxu1 %v7873_v45  ;;  %v355_v45 = vld [vmem:[%s10571_s1 + $0x98] sm:$0xff] }
  0x12   :  { %7878 = vmatprep.subr.bf16.mxu1 %v7877_v43 }
  0x14   :  { %7282 = vmatmul.mubr.msk.f32.vlgmr.msra.gmra.mrb[0].mxu0 %vm40_vm0, %v25_v13 }
  0x15   :  { %7284 = vmatprep.mubr.msk.f32.mxu0 %vm40_vm0, %v26_v14 }
  0x18   :  { %7285 = vmatmul.mubr.msk.f32.gmra.mrb[2].mxu0 %vm40_vm0, %v27_v15  ;;  %v205_v15 = vrot.slane %v9042_v10, %v9037_v6 }
  0xe7   :  { %v7283_v18 = vpop.f32.mrb[0].mxu0 }
  0xe8   :  { %v119_v19 = vpop.f32.mrb[1].mxu0  ;;  %v8988_v20 = vadd.f32 %v7283_v18, %v37_v16 }
  0xe9   :  { %v8990_v21 = vadd.f32 %v119_v19, %v36_v17  ;;  %v213_v19 = vrot.slane %v9042_v10, %v9045_v11 }
  0xea   :  { %v159_v29 = vmul.f32 %v8988_v20, %v8988_v20  ;;  %v144_v31 = vsel %vm140_vm1, %v8988_v20, 0.0 }
  0xeb   :  { %v141_v23 = vsel %vm140_vm1, %v8990_v21, 0.0  ;;  %v158_v24 = vmul.f32 %v8990_v21, %v8990_v21  ;;  %v7286_v25 = vpop.f32.mrb[2].mxu0 }
  0xec   :  { %142 = vadd.xlane.f32.xlu0 %v141_v23  ;;  %v129_v26 = vpop.f32.mrb[3].mxu0  ;;  %v9009_v32 = vadd.f32 %v7286_v25, %v39_v30  ;;  %v165_v33 = vsel %vm140_vm1, %v159_v29, 0.0 }
  0xed   :  { %v162_v27 = vsel %vm140_vm1, %v158_v24, 0.0  ;;  %v9000_v28 = vadd.f32 %v129_v26, %v38_v22 }
  0xee   :  { %163 = vadd.xlane.f32.xlu1 %v162_v27  ;;  %v150_v36 = vsel %vm140_vm1, %v9009_v32, 0.0  ;;  %v161_v37 = vmul.f32 %v9009_v32, %v9009_v32 }
  0xef   :  { %v147_v34 = vsel %vm140_vm1, %v9000_v28, 0.0  ;;  %v160_v35 = vmul.f32 %v9000_v28, %v9000_v28 }
  0xf0   :  { %145 = vadd.xlane.f32.xlu0 %v144_v31  ;;  %v171_v39 = vsel %vm140_vm1, %v161_v37, 0.0 }
  0xf1   :  { %v168_v38 = vsel %vm140_vm1, %v160_v35, 0.0 }
  0xf2   :  { %166 = vadd.xlane.f32.xlu1 %v165_v33 }
  0xf4   :  { %148 = vadd.xlane.f32.xlu0 %v147_v34 }
  0xf6   :  { %151 = vadd.xlane.f32.xlu1 %v150_v36 }
  0xf8   :  { %169 = vadd.xlane.f32.xlu0 %v168_v38 }
  0xfa   :  { %172 = vadd.xlane.f32.xlu1 %v171_v39 }
 0x179   :  { %v143_v46 = vpop.xlane.xlu0 %142 }
 0x17a   :  { %v154_v47 = vmul.f32 0.03125, %v143_v46  ;;  %v7881_v46 = vpack.c.bf16 %v355_v45, %v354_v44 }
 0x17b   :  { %v164_v48 = vpop.xlane.xlu1 %163 }
 0x17c   :  { %v178_v49 = vmul.f32 %v154_v47, %v154_v47  ;;  %v174_v50 = vmul.f32 0.03125, %v164_v48  ;;  %v186_v14 = vsub.f32 %v8990_v21, %v154_v47  ;;  %v356_v47 = vld [vmem:[%s10571_s1 + $0xa0] sm:$0xff]  ;;  %v357_v48 = vld [vmem:[%s10571_s1 + $0xa8] sm:$0xff] }
 0x17d   :  { %v146_v51 = vpop.xlane.xlu0 %145 }
 0x17e   :  { %v182_v52 = vsub.f32 %v174_v50, %v178_v49  ;;  %v155_v53 = vmul.f32 0.03125, %v146_v51  ;;  %v7885_v49 = vpack.c.bf16 %v357_v48, %v356_v47  ;;  %v358_v50 = vld [vmem:[%s10571_s1 + $0xb0] sm:$0xff]  ;;  %v359_v51 = vld [vmem:[%s10571_s1 + $0xb8] sm:$0xff]  ;;  %v458_v48 = vmul.f32 1.5, %v8988_v20 }
 0x17f   :  { %v167_v54 = vpop.xlane.xlu1 %166 }
 0x180   :  { %v190_v56 = vadd.f32 1e-05, %v182_v52  ;;  %v179_v57 = vmul.f32 %v155_v53, %v155_v53  ;;  %v175_v58 = vmul.f32 0.03125, %v167_v54  ;;  %v187_v22 = vsub.f32 %v8988_v20, %v155_v53  ;;  %v360_v53 = vld [vmem:[%s10571_s1 + $0xc0] sm:$0xff]  ;;  %v361_v54 = vld [vmem:[%s10571_s1 + $0xc8] sm:$0xff] }
 0x181   :  { %v149_v59 = vpop.xlane.xlu0 %148  ;;  %v7889_v52 = vpack.c.bf16 %v359_v51, %v358_v50  ;;  %v7893_v55 = vpack.c.bf16 %v361_v54, %v360_v53  ;;  %v457_v50 = vmul.f32 1.5, %v8990_v21 }
 0x182   :  { %8527 = vrsqrt.f32 %v190_v56  ;;  %v183_v60 = vsub.f32 %v175_v58, %v179_v57  ;;  %v156_v61 = vmul.f32 0.03125, %v149_v59  ;;  %v362_v56 = vld [vmem:[%s10571_s1 + $0xd0] sm:$0xff]  ;;  %v363_v57 = vld [vmem:[%s10571_s1 + $0xd8] sm:$0xff]  ;;  %v364_v59 = vld [vmem:[%s10571_s1 + $0xe0] sm:$0xff] }
 0x183   :  { %v152_v62 = vpop.xlane.xlu1 %151  ;;  %v7897_v58 = vpack.c.bf16 %v363_v57, %v362_v56 }
 0x184   :  { %v191_v0 = vadd.f32 1e-05, %v183_v60  ;;  %v157_v1 = vmul.f32 0.03125, %v152_v62  ;;  %v180_v3 = vmul.f32 %v156_v61, %v156_v61  ;;  %v188_v29 = vsub.f32 %v9000_v28, %v156_v61  ;;  %v365_v60 = vld [vmem:[%s10571_s1 + $0xe8] sm:$0xff]  ;;  %v366_v62 = vld [vmem:[%s10571_s1 + $0xf0] sm:$0xff] }
 0x185   :  { %v170_v2 = vpop.xlane.xlu0 %169  ;;  %v7901_v61 = vpack.c.bf16 %v365_v60, %v364_v59  ;;  %v460_v60 = vmul.f32 1.5, %v9009_v32 }
 0x186   :  { %8529 = vrsqrt.f32 %v191_v0  ;;  %v176_v4 = vmul.f32 0.03125, %v170_v2  ;;  %v181_v7 = vmul.f32 %v157_v1, %v157_v1  ;;  %v189_v33 = vsub.f32 %v9009_v32, %v157_v1  ;;  %v367_v0 = vld [vmem:[%s10571_s1 + $0xf8] sm:$0xff]  ;;  %v6776_v2 = vld [vmem:[%s10572_s2 + $0x20] ss:$0 sm:$0xff] }
 0x187   :  { %v173_v5 = vpop.xlane.xlu1 %172  ;;  %v7905_v1 = vpack.c.bf16 %v367_v0, %v366_v62  ;;  %v459_v0 = vmul.f32 1.5, %v9000_v28 }
 0x188   :  { %v184_v8 = vsub.f32 %v176_v4, %v180_v3  ;;  %v177_v9 = vmul.f32 0.03125, %v173_v5 }
 0x18a   :  { %v192_v12 = vadd.f32 1e-05, %v184_v8  ;;  %v185_v13 = vsub.f32 %v177_v9, %v181_v7 }
 0x18c   :  { %v8528_v16 = vpop.eup %8527  ;;  %8531 = vrsqrt.f32 %v192_v12  ;;  %v193_v17 = vadd.f32 1e-05, %v185_v13 }
 0x18d   :  { %v198_v18 = vmul.f32 %v8528_v16, %v186_v14 }
 0x18e   :  { %8533 = vrsqrt.f32 %v193_v17 }
 0x18f   :  { %v206_v23 = vmul.f32 %v205_v15, %v198_v18 }
 0x190   :  { %v8530_v24 = vpop.eup %8529 }
 0x191   :  { %v214_v25 = vadd.f32 %v213_v19, %v206_v23  ;;  %v199_v26 = vmul.f32 %v8530_v24, %v187_v22 }
 0x193   :  { %7295 = vmatprep.mubr.msk.f32.mxu1 %vm140_vm1, %v214_v25  ;;  %v207_v27 = vmul.f32 %v205_v15, %v199_v26 }
 0x195   :  { %v215_v30 = vadd.f32 %v213_v19, %v207_v27 }
 0x196   :  { %v8532_v31 = vpop.eup %8531 }
 0x197   :  { %7296 = vmatmul.mubr.msk.f32.vlgmr.msra.gmra.mrb[0].mxu1 %vm140_vm1, %v215_v30  ;;  %v200_v34 = vmul.f32 %v8532_v31, %v188_v29 }
 0x198   :  { %v8534_v35 = vpop.eup %8533  ;;  %7880 = vmatpush3.bf16.msra.mxu1 %v7877_v43  ;;  %v371_v43 = vrot.slane %v9042_v10, %v9111_v42 }
 0x199   :  { %v208_v36 = vmul.f32 %v205_v15, %v200_v34  ;;  %v201_v37 = vmul.f32 %v8534_v35, %v189_v33  ;;  %7882 = vmatprep.subr.bf16.mxu1 %v7881_v46 }
 0x19b   :  { %v216_v38 = vadd.f32 %v213_v19, %v208_v36  ;;  %v209_v39 = vmul.f32 %v205_v15, %v201_v37 }
 0x19c   :  { %7884 = vmatpush3.bf16.msra.mxu1 %v7881_v46 }
 0x19d   :  { %7298 = vmatprep.mubr.msk.f32.mxu1 %vm140_vm1, %v216_v38  ;;  %v217_v40 = vadd.f32 %v213_v19, %v209_v39  ;;  %7886 = vmatprep.subr.bf16.mxu1 %v7885_v49 }
 0x19f   :  { %7299 = vmatmul.mubr.msk.f32.gmra.mrb[2].mxu1 %vm140_vm1, %v217_v40 }
 0x1a0   :  { %7888 = vmatpush3.bf16.msra.mxu1 %v7885_v49 }
 0x1a1   :  { %7890 = vmatprep.subr.bf16.mxu1 %v7889_v52 }
 0x1a4   :  { %7892 = vmatpush3.bf16.msra.mxu1 %v7889_v52 }
 0x1a5   :  { %7894 = vmatprep.subr.bf16.mxu1 %v7893_v55 }
 0x1a8   :  { %7896 = vmatpush3.bf16.msra.mxu1 %v7893_v55 }
 0x1a9   :  { %7898 = vmatprep.subr.bf16.mxu1 %v7897_v58 }
 0x1ac   :  { %7900 = vmatpush3.bf16.msra.mxu1 %v7897_v58 }
 0x1ad   :  { %7902 = vmatprep.subr.bf16.mxu1 %v7901_v61 }
 0x1b0   :  { %7904 = vmatpush3.bf16.msra.mxu1 %v7901_v61 }
 0x1b1   :  { %7906 = vmatprep.subr.bf16.mxu1 %v7905_v1 }
 0x1b4   :  { %7908 = vmatpush3.bf16.msra.mxu1 %v7905_v1 }
 0x26a   :  { %v7297_v3 = vpop.f32.mrb[0].mxu1 }
 0x26b   :  { %v311_v4 = vadd.f32 %v7297_v3, %v6776_v2  ;;  %v305_v5 = vpop.f32.mrb[1].mxu1 }
 0x26c   :  { %v306_v7 = vadd.f32 %v6776_v2, %v305_v5 }
 0x26d   :  { %v325_v8 = vsub.f32 0.0, %v311_v4 }
 0x26e   :  { %v324_v9 = vsub.f32 0.0, %v306_v7 }
 0x26f   :  { %v330_v12 = vmul.f32 1.442695, %v325_v8 }
 0x270   :  { %v328_v13 = vmul.f32 1.442695, %v324_v9 }
 0x271   :  { %8535 = vpow2.f32 %v330_v12  ;;  %v545_v12 = vld [vmem:[%s10573_s3] sm:$0xff] }
 0x272   :  { %8537 = vpow2.f32 %v328_v13  ;;  %v7300_v14 = vpop.f32.mrb[2].mxu1  ;;  %v546_v13 = vld [vmem:[%s10573_s3 + $0x8] sm:$0xff] }
 0x273   :  { %v321_v15 = vadd.f32 %v7300_v14, %v6776_v2  ;;  %v315_v16 = vpop.f32.mrb[3].mxu1  ;;  %v7909_v14 = vpack.c.bf16 %v546_v13, %v545_v12 }
 0x274   :  { %v316_v17 = vadd.f32 %v6776_v2, %v315_v16  ;;  %v548_v16 = vld [vmem:[%s10573_s3 + $0x18] sm:$0xff] }
 0x275   :  { %v327_v18 = vsub.f32 0.0, %v321_v15  ;;  %7910 = vmatprep.subr.bf16.mxu0 %v7909_v14 }
 0x276   :  { %v326_v19 = vsub.f32 0.0, %v316_v17  ;;  %7912 = vmatpush3.bf16.msra.mxu0 %v7909_v14  ;;  %v6781_v14 = vld [vmem:[%s10573_s3 + $0x20] ss:$0 sm:$0xff] }
 0x277   :  { %v334_v22 = vmul.f32 1.442695, %v327_v18 }
 0x278   :  { %v332_v23 = vmul.f32 1.442695, %v326_v19 }
 0x279   :  { %8539 = vpow2.f32 %v334_v22 }
 0x27a   :  { %8541 = vpow2.f32 %v332_v23 }
 0x27b   :  { %v8536_v24 = vpop.eup %8535 }
 0x27c   :  { %v8538_v25 = vpop.eup %8537  ;;  %v337_v26 = vadd.f32 1.0, %v8536_v24 }
 0x27d   :  { %v336_v27 = vadd.f32 1.0, %v8538_v25 }
 0x27e   :  { %8543 = vrcp.f32 %v337_v26 }
 0x27f   :  { %8545 = vrcp.f32 %v336_v27 }
 0x283   :  { %v8540_v29 = vpop.eup %8539 }
 0x284   :  { %v8542_v30 = vpop.eup %8541  ;;  %v339_v31 = vadd.f32 1.0, %v8540_v29 }
 0x285   :  { %v338_v33 = vadd.f32 1.0, %v8542_v30 }
 0x286   :  { %8547 = vrcp.f32 %v339_v31 }
 0x287   :  { %8549 = vrcp.f32 %v338_v33 }
 0x288   :  { %v8544_v34 = vpop.eup %8543 }
 0x289   :  { %v8546_v35 = vpop.eup %8545  ;;  %v349_v37 = vmul.f32 %v8544_v34, %v311_v4 }
 0x28a   :  { %v348_v36 = vmul.f32 %v8546_v35, %v306_v7 }
 0x28c   :  { %7333 = vmatprep.mubr.f32.mxu1 %v348_v36 }
 0x28d   :  { %7334 = vmatmul.mubr.f32.vlgmr.msra.gmra.mrb[4].mxu1 %v349_v37 }
 0x290   :  { %v8548_v38 = vpop.eup %8547 }
 0x291   :  { %v8550_v39 = vpop.eup %8549  ;;  %v351_v41 = vmul.f32 %v8548_v38, %v321_v15  ;;  %v547_v15 = vld [vmem:[%s10573_s3 + $0x10] sm:$0xff] }
 0x292   :  { %v350_v40 = vmul.f32 %v8550_v39, %v316_v17  ;;  %v7913_v17 = vpack.c.bf16 %v548_v16, %v547_v15 }
 0x294   :  { %7336 = vmatprep.mubr.f32.mxu1 %v350_v40  ;;  %7914 = vmatprep.subr.bf16.mxu0 %v7913_v17 }
 0x295   :  { %7337 = vmatmul.mubr.f32.gmra.mrb[6].mxu1 %v351_v41  ;;  %7916 = vmatpush3.bf16.msra.mxu0 %v7913_v17 }
 0x360   :  { %v7335_v44 = vpop.f32.mrb[4].mxu1 }
 0x361   :  { %v444_v45 = vadd.f32 %v7335_v44, %v371_v43  ;;  %v438_v46 = vpop.f32.mrb[5].mxu1 }
 0x362   :  { %v439_v47 = vadd.f32 %v438_v46, %v371_v43 }
 0x363   :  { %v462_v49 = vmul.f32 0.5, %v444_v45 }
 0x364   :  { %v461_v51 = vmul.f32 0.5, %v439_v47 }
 0x365   :  { %v9117_v52 = vadd.f32 %v462_v49, %v458_v48  ;;  %v9160_v49 = vsub.s32 3, %v9034_v63 }
 0x366   :  { %v9119_v53 = vadd.f32 %v461_v51, %v457_v50 }
 0x367   :  { %v472_v54 = vsel %vm140_vm1, %v9117_v52, 0.0  ;;  %v486_v55 = vmul.f32 %v9117_v52, %v9117_v52 }
 0x368   :  { %473 = vadd.xlane.f32.xlu1 %v472_v54  ;;  %v7338_v56 = vpop.f32.mrb[6].mxu1  ;;  %v469_v57 = vsel %vm140_vm1, %v9119_v53, 0.0  ;;  %v485_v20 = vmul.f32 %v9119_v53, %v9119_v53  ;;  %v9163_v54 = vsub.s32 4, %v9034_v63 }
 0x369   :  { %v454_v21 = vadd.f32 %v7338_v56, %v371_v43  ;;  %470 = vadd.xlane.f32.xlu0 %v469_v57  ;;  %v448_v58 = vpop.f32.mrb[7].mxu1  ;;  %v492_v62 = vsel %vm140_vm1, %v486_v55, 0.0  ;;  %v532_v56 = vrot.slane %v9042_v10, %v9160_v49 }
 0x36a   :  { %v449_v59 = vadd.f32 %v448_v58, %v371_v43  ;;  %v489_v2 = vsel %vm140_vm1, %v485_v20, 0.0 }
 0x36b   :  { %v464_v61 = vmul.f32 0.5, %v454_v21 }
 0x36c   :  { %v463_v1 = vmul.f32 0.5, %v449_v59  ;;  %493 = vadd.xlane.f32.xlu1 %v492_v62 }
 0x36d   :  { %v9133_v3 = vadd.f32 %v464_v61, %v460_v60  ;;  %490 = vadd.xlane.f32.xlu0 %v489_v2  ;;  %v540_v60 = vrot.slane %v9042_v10, %v9163_v54 }
 0x36e   :  { %v9135_v4 = vadd.f32 %v463_v1, %v459_v0 }
 0x36f   :  { %v478_v5 = vsel %vm140_vm1, %v9133_v3, 0.0  ;;  %v488_v32 = vmul.f32 %v9133_v3, %v9133_v3 }
 0x370   :  { %479 = vadd.xlane.f32.xlu1 %v478_v5  ;;  %v475_v7 = vsel %vm140_vm1, %v9135_v4, 0.0  ;;  %v487_v28 = vmul.f32 %v9135_v4, %v9135_v4 }
 0x371   :  { %476 = vadd.xlane.f32.xlu0 %v475_v7  ;;  %v498_v8 = vsel %vm140_vm1, %v488_v32, 0.0 }
 0x372   :  { %v495_v9 = vsel %vm140_vm1, %v487_v28, 0.0 }
 0x374   :  { %499 = vadd.xlane.f32.xlu1 %v498_v8 }
 0x375   :  { %496 = vadd.xlane.f32.xlu0 %v495_v9 }
 0x3f5   :  { %v474_v18 = vpop.xlane.xlu1 %473 }
 0x3f6   :  { %v482_v19 = vmul.f32 0.03125, %v474_v18  ;;  %v471_v22 = vpop.xlane.xlu0 %470 }
 0x3f7   :  { %v481_v23 = vmul.f32 0.03125, %v471_v22 }
 0x3f8   :  { %v506_v25 = vmul.f32 %v482_v19, %v482_v19  ;;  %v514_v55 = vsub.f32 %v9117_v52, %v482_v19 }
 0x3f9   :  { %v494_v24 = vpop.xlane.xlu1 %493  ;;  %v505_v29 = vmul.f32 %v481_v23, %v481_v23  ;;  %v513_v20 = vsub.f32 %v9119_v53, %v481_v23 }
 0x3fa   :  { %v502_v26 = vmul.f32 0.03125, %v494_v24  ;;  %v491_v27 = vpop.xlane.xlu0 %490 }
 0x3fb   :  { %v501_v30 = vmul.f32 0.03125, %v491_v27 }
 0x3fc   :  { %v510_v31 = vsub.f32 %v502_v26, %v506_v25 }
 0x3fd   :  { %v509_v33 = vsub.f32 %v501_v30, %v505_v29  ;;  %v480_v34 = vpop.xlane.xlu1 %479 }
 0x3fe   :  { %v518_v35 = vadd.f32 1e-05, %v510_v31  ;;  %v484_v36 = vmul.f32 0.03125, %v480_v34  ;;  %v477_v37 = vpop.xlane.xlu0 %476 }
 0x3ff   :  { %v517_v38 = vadd.f32 1e-05, %v509_v33  ;;  %v483_v39 = vmul.f32 0.03125, %v477_v37 }
 0x400   :  { %8551 = vrsqrt.f32 %v518_v35  ;;  %v508_v41 = vmul.f32 %v484_v36, %v484_v36  ;;  %v516_v1 = vsub.f32 %v9133_v3, %v484_v36 }
 0x401   :  { %8553 = vrsqrt.f32 %v517_v38  ;;  %v500_v40 = vpop.xlane.xlu1 %499  ;;  %v507_v45 = vmul.f32 %v483_v39, %v483_v39  ;;  %v515_v32 = vsub.f32 %v9135_v4, %v483_v39 }
 0x402   :  { %v504_v43 = vmul.f32 0.03125, %v500_v40  ;;  %v497_v44 = vpop.xlane.xlu0 %496 }
 0x403   :  { %v503_v46 = vmul.f32 0.03125, %v497_v44 }
 0x404   :  { %v512_v47 = vsub.f32 %v504_v43, %v508_v41 }
 0x405   :  { %v511_v48 = vsub.f32 %v503_v46, %v507_v45 }
 0x406   :  { %v520_v50 = vadd.f32 1e-05, %v512_v47 }
 0x407   :  { %v519_v51 = vadd.f32 1e-05, %v511_v48 }
 0x408   :  { %8555 = vrsqrt.f32 %v520_v50 }
 0x409   :  { %8557 = vrsqrt.f32 %v519_v51 }
 0x40a   :  { %v8552_v57 = vpop.eup %8551 }
 0x40b   :  { %v8554_v21 = vpop.eup %8553  ;;  %v526_v58 = vmul.f32 %v8552_v57, %v514_v55 }
 0x40c   :  { %v525_v59 = vmul.f32 %v8554_v21, %v513_v20 }
 0x40d   :  { %v534_v61 = vmul.f32 %v532_v56, %v526_v58 }
 0x40e   :  { %v533_v62 = vmul.f32 %v532_v56, %v525_v59 }
 0x40f   :  { %v542_v2 = vadd.f32 %v540_v60, %v534_v61 }
 0x410   :  { %v541_v0 = vadd.f32 %v540_v60, %v533_v62 }
 0x412   :  { %v8556_v5 = vpop.eup %8555  ;;  %7347 = vmatprep.mubr.msk.f32.mxu0 %vm140_vm1, %v541_v0 }
 0x413   :  { %v8558_v7 = vpop.eup %8557  ;;  %7348 = vmatmul.mubr.msk.f32.vlgmr.msra.gmra.mrb[4].mxu0 %vm140_vm1, %v542_v2  ;;  %v528_v28 = vmul.f32 %v8556_v5, %v516_v1 }
 0x414   :  { %v527_v8 = vmul.f32 %v8558_v7, %v515_v32 }
 0x415   :  { %v536_v9 = vmul.f32 %v532_v56, %v528_v28 }
 0x416   :  { %v535_v12 = vmul.f32 %v532_v56, %v527_v8 }
 0x417   :  { %v544_v10 = vadd.f32 %v540_v60, %v536_v9 }
 0x418   :  { %v543_v13 = vadd.f32 %v540_v60, %v535_v12 }
 0x41a   :  { %7350 = vmatprep.mubr.msk.f32.mxu0 %vm140_vm1, %v543_v13 }
 0x41b   :  { %7351 = vmatmul.mubr.msk.f32.gmra.mrb[6].mxu0 %vm140_vm1, %v544_v10 }
 0x4e6   :  { %v7349_v15 = vpop.f32.mrb[4].mxu0 }
 0x4e7   :  { %v9180_v16 = vadd.f32 %v7349_v15, %v6781_v14  ;;  %v632_v17 = vpop.f32.mrb[5].mxu0 }
 0x4e8   :  { %v9182_v18 = vadd.f32 %v6781_v14, %v632_v17 }
 0x4ea   :  { %7357 = vmatprep.mubr.msk.f32.mxu0 %vm657_vm2, %v9182_v18  ;;  %v9188_v19 = vpack.i.bf16 %v9180_v16, %v9182_v18 }
 0x4ec   :  { %8368 = vrot.lane.b32.xlu0 %v9188_v19, %s8889_s8 }
 0x4ee   :  { %v7352_v22 = vpop.f32.mrb[6].mxu0 }
 0x4ef   :  { %v9192_v23 = vadd.f32 %v7352_v22, %v6781_v14  ;;  %v642_v24 = vpop.f32.mrb[7].mxu0 }
 0x4f0   :  { %v9194_v25 = vadd.f32 %v6781_v14, %v642_v24 }
 0x4f2   :  { %v9198_v26 = vpack.i.bf16 %v9192_v23, %v9194_v25 }
 0x4f4   :  { %8373 = vrot.lane.b32.xlu1 %v9198_v26, %s8889_s8 }
 0x55e   :  { %v8369_v27 = vpop.permute.xlu0 %8368 }
 0x55f   :  { %v8371_v29 = vunpack.i.h.bf16 %v8369_v27  ;;  %v8370_v30 = vunpack.i.l.bf16 %v8369_v27 }
 0x561   :  { %v7917_v33 = vpack.c.bf16 %v8371_v29, %v8370_v30 }
 0x563   :  { %7919 = vmatprep.subr.msk.bf16.mxu0 %vm9204_vm3, %v7917_v33 }
 0x564   :  { %7922 = vmatpush3.bf16.xpose.msk.msra.mxu0 %vm9204_vm3, %v7917_v33 }
 0x566   :  { %v8374_v34 = vpop.permute.xlu1 %8373 }
 0x567   :  { %v8376_v35 = vunpack.i.h.bf16 %v8374_v34  ;;  %v8375_v36 = vunpack.i.l.bf16 %v8374_v34 }
 0x569   :  { %v7923_v37 = vpack.c.bf16 %v8376_v35, %v8375_v36 }
 0x56b   :  { %7358 = vmatmul.mubr.msk.f32.vlgmr.msra.gmra.mrb[8].mxu0 %vm657_vm2, %v9180_v16  ;;  %7925 = vmatprep.subr.msk.bf16.mxu0 %vm9204_vm3, %v7923_v37 }
 0x56c   :  { %7928 = vmatpush3.bf16.xpose.msk.msra.mxu0 %vm9204_vm3, %v7923_v37  ;;  %7364 = vmatprep.mubr.msk.f32.mxu0 %vm657_vm2, %v9194_v25 }
 0x573   :  { %7365 = vmatmul.mubr.msk.f32.vlgmr.msra.gmra.mrb[10].mxu0 %vm657_vm2, %v9192_v23 }
 0x63e   :  { %v7359_v38 = vpop.f32.mrb[8].mxu0 }
 0x63f   :  { %v831_v39 = vmul.f32 0.35355338, %v7359_v38  ;;  %v732_v40 = vpop.f32.mrb[9].mxu0 }
 0x640   :  { %v830_v41 = vmul.f32 0.35355338, %v732_v40 }
 0x641   :  { %v838_v43 = vsel %vm834_vm4, %v831_v39, -inf }
 0x642   :  { %839 = vmax.xlane.f32.xlu0 %v838_v43  ;;  %v835_v44 = vsel %vm834_vm4, %v830_v41, -inf }
 0x643   :  { %836 = vmax.xlane.f32.xlu1 %v835_v44 }
 0x646   :  { %v7366_v45 = vpop.f32.mrb[10].mxu0 }
 0x647   :  { %v833_v46 = vmul.f32 0.35355338, %v7366_v45  ;;  %v821_v47 = vpop.f32.mrb[11].mxu0 }
 0x648   :  { %v832_v48 = vmul.f32 0.35355338, %v821_v47 }
 0x649   :  { %v844_v50 = vsel %vm834_vm4, %v833_v46, -inf }
 0x64a   :  { %845 = vmax.xlane.f32.xlu1 %v844_v50  ;;  %v841_v51 = vsel %vm834_vm4, %v832_v48, -inf }
 0x64b   :  { %842 = vmax.xlane.f32.xlu0 %v841_v51 }
 0x65b   :  { %8383 = vrot.lane.b32.xlu1 %v9198_v26, %s8890_s9 }
 0x65f   :  { %8388 = vrot.lane.b32.xlu1 %v9188_v19, %s8891_s10 }
 0x661   :  { %8378 = vrot.lane.b32.xlu0 %v9188_v19, %s8890_s9 }
 0x663   :  { %1053 = vrot.lane.b32.xlu1 %v9182_v18, %s8892_s11 }
 0x6cf   :  { %v840_v55 = vpop.xlane.xlu0 %839 }
 0x6d0   :  { %v848_v56 = vsub.f32 %v831_v39, %v840_v55  ;;  %v837_v57 = vpop.xlane.xlu1 %836 }
 0x6d1   :  { %v847_v20 = vsub.f32 %v830_v41, %v837_v57 }
 0x6d2   :  { %v853_v21 = vmul.f32 1.442695, %v848_v56 }
 0x6d3   :  { %v851_v58 = vmul.f32 1.442695, %v847_v20 }
 0x6d4   :  { %8559 = vpow2.f32 %v853_v21 }
 0x6d5   :  { %8561 = vpow2.f32 %v851_v58 }
 0x6d7   :  { %v846_v59 = vpop.xlane.xlu1 %845 }
 0x6d8   :  { %v850_v60 = vsub.f32 %v833_v46, %v846_v59  ;;  %v843_v61 = vpop.xlane.xlu0 %842 }
 0x6d9   :  { %v849_v62 = vsub.f32 %v832_v48, %v843_v61 }
 0x6da   :  { %v857_v0 = vmul.f32 1.442695, %v850_v60 }
 0x6db   :  { %v855_v1 = vmul.f32 1.442695, %v849_v62  ;;  %v8384_v2 = vpop.permute.xlu1 %8383 }
 0x6dc   :  { %8563 = vpow2.f32 %v857_v0  ;;  %v8386_v5 = vunpack.i.h.bf16 %v8384_v2  ;;  %v8379_v32 = vpop.permute.xlu0 %8378  ;;  %v8385_v7 = vunpack.i.l.bf16 %v8384_v2 }
 0x6dd   :  { %8565 = vpow2.f32 %v855_v1  ;;  %v8381_v28 = vunpack.i.h.bf16 %v8379_v32  ;;  %v8380_v8 = vunpack.i.l.bf16 %v8379_v32 }
 0x6de   :  { %v8560_v9 = vpop.eup %8559  ;;  %v7933_v24 = vpack.c.bf16 %v8386_v5, %v8385_v7 }
 0x6df   :  { %v8562_v12 = vpop.eup %8561  ;;  %v8389_v13 = vpop.permute.xlu1 %8388  ;;  %v862_v10 = vsel %vm834_vm4, %v8560_v9, 0.0  ;;  %v7929_v14 = vpack.c.bf16 %v8381_v28, %v8380_v8 }
 0x6e0   :  { %v8391_v15 = vunpack.i.h.bf16 %v8389_v13  ;;  %v8390_v17 = vunpack.i.l.bf16 %v8389_v13  ;;  %863 = vadd.xlane.f32.xlu1 %v862_v10  ;;  %v859_v22 = vsel %vm834_vm4, %v8562_v12, 0.0 }
 0x6e1   :  { %860 = vadd.xlane.f32.xlu0 %v859_v22  ;;  %7930 = vmatprep.subr.bf16.mxu0 %v7929_v14 }
 0x6e2   :  { %v7937_v27 = vpack.c.bf16 %v8391_v15, %v8390_v17  ;;  %7932 = vmatpush3.bf16.msra.mxu0 %v7929_v14 }
 0x6e3   :  { %v1054_v29 = vpop.permute.xlu1 %1053  ;;  %7934 = vmatprep.subr.bf16.mxu0 %v7933_v24 }
 0x6e4   :  { %7939 = vmatprep.subr.msk.bf16.mxu1 %vm9204_vm3, %v7937_v27  ;;  %7385 = vmatprep.mubr.msk.f32.mxu1 %vm657_vm2, %v1054_v29 }
 0x6e5   :  { %7942 = vmatpush3.bf16.xpose.msk.msra.mxu1 %vm9204_vm3, %v7937_v27 }
 0x6e6   :  { %v8564_v30 = vpop.eup %8563 }
 0x6e7   :  { %v8566_v33 = vpop.eup %8565  ;;  %v868_v34 = vsel %vm834_vm4, %v8564_v30, 0.0 }
 0x6e8   :  { %869 = vadd.xlane.f32.xlu1 %v868_v34  ;;  %v865_v35 = vsel %vm834_vm4, %v8566_v33, 0.0 }
 0x6e9   :  { %866 = vadd.xlane.f32.xlu0 %v865_v35 }
 0x6f9   :  { %1055 = vrot.lane.b32.xlu1 %v9180_v16, %s8892_s11 }
 0x6fd   :  { %1146 = vrot.lane.b32.xlu1 %v9192_v23, %s8892_s11 }
 0x6ff   :  { %8393 = vrot.lane.b32.xlu0 %v9198_v26, %s8891_s10 }
 0x703   :  { %1144 = vrot.lane.b32.xlu0 %v9194_v25, %s8892_s11 }
 0x76d   :  { %v864_v36 = vpop.xlane.xlu1 %863 }
 0x76e   :  { %8567 = vrcp.f32 %v864_v36  ;;  %v861_v37 = vpop.xlane.xlu0 %860 }
 0x76f   :  { %8569 = vrcp.f32 %v861_v37 }
 0x775   :  { %v870_v38 = vpop.xlane.xlu1 %869 }
 0x776   :  { %8571 = vrcp.f32 %v870_v38  ;;  %v867_v39 = vpop.xlane.xlu0 %866 }
 0x777   :  { %8573 = vrcp.f32 %v867_v39 }
 0x778   :  { %v8568_v40 = vpop.eup %8567 }
 0x779   :  { %v8570_v41 = vpop.eup %8569  ;;  %v1056_v43 = vpop.permute.xlu1 %1055  ;;  %v876_v48 = vmul.f32 %v8568_v40, %v8560_v9 }
 0x77a   :  { %7386 = vmatmul.mubr.msk.f32.vlgmr.msra.gmra.mrb[8].mxu1 %vm657_vm2, %v1056_v43  ;;  %v8394_v44 = vpop.permute.xlu0 %8393  ;;  %v875_v45 = vmul.f32 %v8570_v41, %v8562_v12 }
 0x77b   :  { %v8396_v46 = vunpack.i.h.bf16 %v8394_v44  ;;  %v8395_v47 = vunpack.i.l.bf16 %v8394_v44 }
 0x77c   :  { %7371 = vmatprep.mubr.msk.f32.mxu0 %vm834_vm4, %v875_v45 }
 0x77d   :  { %v7943_v50 = vpack.c.bf16 %v8396_v46, %v8395_v47  ;;  %7372 = vmatmul.mubr.msk.f32.vlgmr.msra.gmra.mrb[12].mxu0 %vm834_vm4, %v876_v48  ;;  %v1147_v21 = vpop.permute.xlu1 %1146 }
 0x77e   :  { %7936 = vmatpush3.bf16.msra.mxu0 %v7933_v24  ;;  %v1145_v20 = vpop.permute.xlu0 %1144 }
 0x77f   :  { %7945 = vmatprep.subr.msk.bf16.mxu0 %vm9204_vm3, %v7943_v50 }
 0x780   :  { %v8572_v51 = vpop.eup %8571 }
 0x781   :  { %v8574_v55 = vpop.eup %8573  ;;  %v878_v57 = vmul.f32 %v8572_v51, %v8564_v30 }
 0x782   :  { %v877_v56 = vmul.f32 %v8574_v55, %v8566_v33 }
 0x784   :  { %7378 = vmatprep.mubr.msk.f32.mxu0 %vm834_vm4, %v877_v56 }
 0x785   :  { %7379 = vmatmul.mubr.msk.f32.vlgmr.msra.gmra.mrb[14].mxu0 %vm834_vm4, %v878_v57 }
 0x786   :  { %7392 = vmatprep.mubr.msk.f32.mxu0 %vm657_vm2, %v1145_v20 }
 0x787   :  { %7948 = vmatpush3.bf16.xpose.msk.msra.mxu0 %vm9204_vm3, %v7943_v50 }
 0x78e   :  { %7393 = vmatmul.mubr.msk.f32.vlgmr.msra.gmra.mrb[16].mxu0 %vm657_vm2, %v1147_v21 }
 0x84d   :  { %v7387_v58 = vpop.f32.mrb[8].mxu1 }
 0x84e   :  { %v1236_v59 = vmul.f32 0.35355338, %v7387_v58  ;;  %v1135_v60 = vpop.f32.mrb[9].mxu1 }
 0x84f   :  { %v1235_v61 = vmul.f32 0.35355338, %v1135_v60 }
 0x850   :  { %v9262_v62 = vpop.f32.mrb[12].mxu0  ;;  %v1242_v0 = vsel %vm834_vm4, %v1236_v59, -inf }
 0x851   :  { %1243 = vmax.xlane.f32.xlu1 %v1242_v0  ;;  %v9265_v1 = vpop.f32.mrb[13].mxu0  ;;  %v1239_v2 = vsel %vm834_vm4, %v1235_v61, -inf }
 0x852   :  { %1240 = vmax.xlane.f32.xlu0 %v1239_v2 }
 0x858   :  { %v9268_v5 = vpop.f32.mrb[14].mxu0 }
 0x859   :  { %v9270_v32 = vpop.f32.mrb[15].mxu0 }
 0x861   :  { %v7394_v7 = vpop.f32.mrb[16].mxu0 }
 0x862   :  { %v1226_v28 = vpop.f32.mrb[17].mxu0  ;;  %v1238_v9 = vmul.f32 0.35355338, %v7394_v7 }
 0x863   :  { %v1237_v8 = vmul.f32 0.35355338, %v1226_v28 }
 0x864   :  { %v1248_v13 = vsel %vm834_vm4, %v1238_v9, -inf }
 0x865   :  { %v1245_v12 = vsel %vm834_vm4, %v1237_v8, -inf }
 0x866   :  { %1246 = vmax.xlane.f32.xlu0 %v1245_v12 }
 0x86a   :  { %1249 = vmax.xlane.f32.xlu0 %v1248_v13 }
 0x8de   :  { %v1244_v10 = vpop.xlane.xlu1 %1243 }
 0x8df   :  { %v1252_v14 = vsub.f32 %v1236_v59, %v1244_v10  ;;  %v1241_v15 = vpop.xlane.xlu0 %1240 }
 0x8e0   :  { %v1251_v17 = vsub.f32 %v1235_v61, %v1241_v15 }
 0x8e1   :  { %v1257_v22 = vmul.f32 1.442695, %v1252_v14 }
 0x8e2   :  { %v1255_v24 = vmul.f32 1.442695, %v1251_v17 }
 0x8e3   :  { %8575 = vpow2.f32 %v1257_v22 }
 0x8e4   :  { %8577 = vpow2.f32 %v1255_v24 }
 0x8ed   :  { %v8576_v27 = vpop.eup %8575 }
 0x8ee   :  { %v8578_v29 = vpop.eup %8577  ;;  %v1266_v30 = vsel %vm834_vm4, %v8576_v27, 0.0 }
 0x8ef   :  { %1267 = vadd.xlane.f32.xlu1 %v1266_v30  ;;  %v1263_v33 = vsel %vm834_vm4, %v8578_v29, 0.0 }
 0x8f0   :  { %1264 = vadd.xlane.f32.xlu0 %v1263_v33 }
 0x8f3   :  { %v1247_v34 = vpop.xlane.xlu0 %1246 }
 0x8f4   :  { %v1253_v35 = vsub.f32 %v1237_v8, %v1247_v34 }
 0x8f6   :  { %v1259_v36 = vmul.f32 1.442695, %v1253_v35 }
 0x8f7   :  { %v1250_v37 = vpop.xlane.xlu0 %1249 }
 0x8f8   :  { %v1254_v38 = vsub.f32 %v1238_v9, %v1250_v37  ;;  %8579 = vpow2.f32 %v1259_v36 }
 0x8fa   :  { %v1261_v39 = vmul.f32 1.442695, %v1254_v38 }
 0x8fc   :  { %8581 = vpow2.f32 %v1261_v39 }
 0x900   :  { %8403 = vrot.lane.b32.xlu1 %v9198_v26, %s8893_s12 }
 0x902   :  { %v8580_v40 = vpop.eup %8579 }
 0x903   :  { %v1269_v41 = vsel %vm834_vm4, %v8580_v40, 0.0 }
 0x904   :  { %8408 = vrot.lane.b32.xlu1 %v9188_v19, %s8894_s13 }
 0x906   :  { %8398 = vrot.lane.b32.xlu0 %v9188_v19, %s8893_s12  ;;  %v8582_v43 = vpop.eup %8581 }
 0x907   :  { %v1272_v44 = vsel %vm834_vm4, %v8582_v43, 0.0 }
 0x908   :  { %8413 = vrot.lane.b32.xlu1 %v9198_v26, %s8894_s13 }
 0x925   :  { %1270 = vadd.xlane.f32.xlu0 %v1269_v41 }
 0x92c   :  { %1273 = vadd.xlane.f32.xlu1 %v1272_v44 }
 0x93b   :  { %1457 = vrot.lane.b32.xlu0 %v9182_v18, %s8895_s14 }
 0x93d   :  { %1459 = vrot.lane.b32.xlu1 %v9180_v16, %s8895_s14 }
 0x93f   :  { %1548 = vrot.lane.b32.xlu0 %v9194_v25, %s8895_s14 }
 0x941   :  { %1550 = vrot.lane.b32.xlu1 %v9192_v23, %s8895_s14 }
 0x97c   :  { %v1268_v45 = vpop.xlane.xlu1 %1267 }
 0x97d   :  { %8583 = vrcp.f32 %v1268_v45  ;;  %v1265_v46 = vpop.xlane.xlu0 %1264 }
 0x97e   :  { %8585 = vrcp.f32 %v1265_v46 }
 0x980   :  { %v8404_v47 = vpop.permute.xlu1 %8403 }
 0x981   :  { %v8399_v48 = vpop.permute.xlu0 %8398  ;;  %v8406_v50 = vunpack.i.h.bf16 %v8404_v47  ;;  %v8405_v51 = vunpack.i.l.bf16 %v8404_v47 }
 0x982   :  { %v8401_v55 = vunpack.i.h.bf16 %v8399_v48  ;;  %v8400_v56 = vunpack.i.l.bf16 %v8399_v48 }
 0x983   :  { %v7953_v59 = vpack.c.bf16 %v8406_v50, %v8405_v51 }
 0x984   :  { %v8409_v57 = vpop.permute.xlu1 %8408  ;;  %v7949_v20 = vpack.c.bf16 %v8401_v55, %v8400_v56 }
 0x985   :  { %v8411_v21 = vunpack.i.h.bf16 %v8409_v57  ;;  %v8410_v58 = vunpack.i.l.bf16 %v8409_v57 }
 0x986   :  { %7950 = vmatprep.subr.bf16.mxu1 %v7949_v20 }
 0x987   :  { %v8584_v60 = vpop.eup %8583  ;;  %v7957_v61 = vpack.c.bf16 %v8411_v21, %v8410_v58  ;;  %7952 = vmatpush3.bf16.msra.mxu1 %v7949_v20 }
 0x988   :  { %v8586_v0 = vpop.eup %8585  ;;  %v8414_v2 = vpop.permute.xlu1 %8413  ;;  %7954 = vmatprep.subr.bf16.mxu1 %v7953_v59  ;;  %v1280_v9 = vmul.f32 %v8584_v60, %v8576_v27 }
 0x989   :  { %v8416_v7 = vunpack.i.h.bf16 %v8414_v2  ;;  %v8415_v28 = vunpack.i.l.bf16 %v8414_v2  ;;  %7959 = vmatprep.subr.msk.bf16.mxu0 %vm9204_vm3, %v7957_v61  ;;  %v1279_v8 = vmul.f32 %v8586_v0, %v8578_v29 }
 0x98a   :  { %7962 = vmatpush3.bf16.xpose.msk.msra.mxu0 %vm9204_vm3, %v7957_v61 }
 0x98b   :  { %v7963_v12 = vpack.c.bf16 %v8416_v7, %v8415_v28  ;;  %7399 = vmatprep.mubr.msk.f32.mxu1 %vm834_vm4, %v1279_v8 }
 0x98c   :  { %7400 = vmatmul.mubr.msk.f32.vlgmr.msra.gmra.mrb[10].mxu1 %vm834_vm4, %v1280_v9 }
 0x98d   :  { %7956 = vmatpush3.bf16.msra.mxu1 %v7953_v59 }
 0x98e   :  { %7965 = vmatprep.subr.msk.bf16.mxu1 %vm9204_vm3, %v7963_v12 }
 0x9b2   :  { %v1271_v13 = vpop.xlane.xlu0 %1270 }
 0x9b3   :  { %8587 = vrcp.f32 %v1271_v13 }
 0x9b6   :  { %v1458_v10 = vpop.permute.xlu0 %1457 }
 0x9b7   :  { %7413 = vmatprep.mubr.msk.f32.mxu0 %vm657_vm2, %v1458_v10 }
 0x9b9   :  { %v1274_v14 = vpop.xlane.xlu1 %1273 }
 0x9ba   :  { %8589 = vrcp.f32 %v1274_v14  ;;  %v1549_v29 = vpop.permute.xlu0 %1548 }
 0x9bd   :  { %v8588_v15 = vpop.eup %8587  ;;  %v1460_v17 = vpop.permute.xlu1 %1459 }
 0x9be   :  { %7414 = vmatmul.mubr.msk.f32.vlgmr.msra.gmra.mrb[18].mxu0 %vm657_vm2, %v1460_v17  ;;  %v1281_v22 = vmul.f32 %v8588_v15, %v8580_v40 }
 0x9c0   :  { %7406 = vmatprep.mubr.msk.f32.mxu1 %vm834_vm4, %v1281_v22 }
 0x9c1   :  { %v1551_v30 = vpop.permute.xlu1 %1550 }
 0x9c4   :  { %v8590_v24 = vpop.eup %8589 }
 0x9c5   :  { %v1282_v27 = vmul.f32 %v8590_v24, %v8582_v43 }
 0x9c7   :  { %7407 = vmatmul.mubr.msk.f32.vlgmr.msra.gmra.mrb[12].mxu1 %vm834_vm4, %v1282_v27 }
 0x9c8   :  { %7968 = vmatpush3.bf16.xpose.msk.msra.mxu1 %vm9204_vm3, %v7963_v12  ;;  %7420 = vmatprep.mubr.msk.f32.mxu1 %vm657_vm2, %v1549_v29 }
 0x9cf   :  { %7421 = vmatmul.mubr.msk.f32.vlgmr.msra.gmra.mrb[14].mxu1 %vm657_vm2, %v1551_v30 }
 0xa5f   :  { %v9310_v33 = vpop.f32.mrb[10].mxu1 }
 0xa60   :  { %v9312_v34 = vpop.f32.mrb[11].mxu1 }
 0xa91   :  { %v7415_v35 = vpop.f32.mrb[18].mxu0 }
 0xa92   :  { %v1640_v36 = vmul.f32 0.35355338, %v7415_v35  ;;  %v1539_v37 = vpop.f32.mrb[19].mxu0 }
 0xa93   :  { %v1639_v38 = vmul.f32 0.35355338, %v1539_v37 }
 0xa94   :  { %v1646_v39 = vsel %vm834_vm4, %v1640_v36, -inf }
 0xa95   :  { %1647 = vmax.xlane.f32.xlu1 %v1646_v39  ;;  %v1643_v40 = vsel %vm834_vm4, %v1639_v38, -inf }
 0xa96   :  { %1644 = vmax.xlane.f32.xlu0 %v1643_v40 }
 0xa9a   :  { %v9316_v41 = vpop.f32.mrb[12].mxu1 }
 0xa9b   :  { %v9318_v43 = vpop.f32.mrb[13].mxu1 }
 0xaa2   :  { %v7422_v44 = vpop.f32.mrb[14].mxu1 }
 0xaa3   :  { %v1630_v45 = vpop.f32.mrb[15].mxu1  ;;  %v1642_v47 = vmul.f32 0.35355338, %v7422_v44 }
 0xaa4   :  { %v1641_v46 = vmul.f32 0.35355338, %v1630_v45 }
 0xaa5   :  { %v1652_v50 = vsel %vm834_vm4, %v1642_v47, -inf }
 0xaa6   :  { %v1649_v48 = vsel %vm834_vm4, %v1641_v46, -inf }
 0xaa7   :  { %1650 = vmax.xlane.f32.xlu0 %v1649_v48 }
 0xaab   :  { %1653 = vmax.xlane.f32.xlu0 %v1652_v50 }
 0xb22   :  { %v1648_v51 = vpop.xlane.xlu1 %1647 }
 0xb23   :  { %v1656_v55 = vsub.f32 %v1640_v36, %v1648_v51  ;;  %v1645_v56 = vpop.xlane.xlu0 %1644 }
 0xb24   :  { %v1655_v57 = vsub.f32 %v1639_v38, %v1645_v56 }
 0xb25   :  { %v1661_v20 = vmul.f32 1.442695, %v1656_v55 }
 0xb26   :  { %v1659_v21 = vmul.f32 1.442695, %v1655_v57 }
 0xb27   :  { %8591 = vpow2.f32 %v1661_v20 }
 0xb28   :  { %8593 = vpow2.f32 %v1659_v21 }
 0xb31   :  { %v8592_v58 = vpop.eup %8591 }
 0xb32   :  { %v8594_v59 = vpop.eup %8593  ;;  %v1670_v60 = vsel %vm834_vm4, %v8592_v58, 0.0 }
 0xb33   :  { %1671 = vadd.xlane.f32.xlu1 %v1670_v60  ;;  %v1667_v61 = vsel %vm834_vm4, %v8594_v59, 0.0 }
 0xb34   :  { %1668 = vadd.xlane.f32.xlu0 %v1667_v61  ;;  %v1651_v0 = vpop.xlane.xlu0 %1650 }
 0xb35   :  { %v1657_v2 = vsub.f32 %v1641_v46, %v1651_v0 }
 0xb37   :  { %v1663_v7 = vmul.f32 1.442695, %v1657_v2 }
 0xb38   :  { %v1654_v28 = vpop.xlane.xlu0 %1653 }
 0xb39   :  { %v1658_v8 = vsub.f32 %v1642_v47, %v1654_v28  ;;  %8595 = vpow2.f32 %v1663_v7 }
 0xb3b   :  { %v1665_v9 = vmul.f32 1.442695, %v1658_v8 }
 0xb3d   :  { %8597 = vpow2.f32 %v1665_v9 }
 0xb43   :  { %v8596_v12 = vpop.eup %8595 }
 0xb44   :  { %8423 = vrot.lane.b32.xlu1 %v9198_v26, %s8896_s15  ;;  %v1673_v13 = vsel %vm834_vm4, %v8596_v12, 0.0 }
 0xb47   :  { %v8598_v10 = vpop.eup %8597 }
 0xb48   :  { %8428 = vrot.lane.b32.xlu1 %v9188_v19, %s8897_s16  ;;  %v1676_v14 = vsel %vm834_vm4, %v8598_v10, 0.0 }
 0xb4a   :  { %8418 = vrot.lane.b32.xlu0 %v9188_v19, %s8896_s15 }
 0xb4c   :  { %8433 = vrot.lane.b32.xlu1 %v9198_v26, %s8897_s16 }
 0xb69   :  { %1674 = vadd.xlane.f32.xlu0 %v1673_v13 }
 0xb70   :  { %1677 = vadd.xlane.f32.xlu1 %v1676_v14 }
 0xb7f   :  { %1861 = vrot.lane.b32.xlu0 %v9182_v18, %s8898_s17 }
 0xb81   :  { %1863 = vrot.lane.b32.xlu1 %v9180_v16, %s8898_s17 }
 0xb83   :  { %1952 = vrot.lane.b32.xlu0 %v9194_v25, %s8898_s17 }
 0xb85   :  { %1954 = vrot.lane.b32.xlu1 %v9192_v23, %s8898_s17 }
 0xbc0   :  { %v1672_v15 = vpop.xlane.xlu1 %1671 }
 0xbc1   :  { %8599 = vrcp.f32 %v1672_v15  ;;  %v1669_v17 = vpop.xlane.xlu0 %1668 }
 0xbc2   :  { %8601 = vrcp.f32 %v1669_v17 }
 0xbc4   :  { %v8424_v22 = vpop.permute.xlu1 %8423 }
 0xbc5   :  { %v8426_v24 = vunpack.i.h.bf16 %v8424_v22  ;;  %v8425_v27 = vunpack.i.l.bf16 %v8424_v22  ;;  %v8419_v29 = vpop.permute.xlu0 %8418 }
 0xbc6   :  { %v8421_v30 = vunpack.i.h.bf16 %v8419_v29  ;;  %v8420_v35 = vunpack.i.l.bf16 %v8419_v29 }
 0xbc7   :  { %v7973_v18 = vpack.c.bf16 %v8426_v24, %v8425_v27 }
 0xbc8   :  { %v8429_v36 = vpop.permute.xlu1 %8428  ;;  %v7969_v37 = vpack.c.bf16 %v8421_v30, %v8420_v35 }
 0xbc9   :  { %v8431_v16 = vunpack.i.h.bf16 %v8429_v36  ;;  %v8430_v38 = vunpack.i.l.bf16 %v8429_v36  ;;  %7974 = vmatprep.subr.bf16.mxu1 %v7973_v18 }
 0xbca   :  { %7970 = vmatprep.subr.bf16.mxu0 %v7969_v37  ;;  %7976 = vmatpush3.bf16.msra.mxu1 %v7973_v18 }
 0xbcb   :  { %v8600_v25 = vpop.eup %8599  ;;  %v7977_v23 = vpack.c.bf16 %v8431_v16, %v8430_v38  ;;  %7972 = vmatpush3.bf16.msra.mxu0 %v7969_v37 }
 0xbcc   :  { %v8602_v39 = vpop.eup %8601  ;;  %v8434_v40 = vpop.permute.xlu1 %8433  ;;  %v1684_v47 = vmul.f32 %v8600_v25, %v8592_v58 }
 0xbcd   :  { %v8436_v44 = vunpack.i.h.bf16 %v8434_v40  ;;  %v8435_v45 = vunpack.i.l.bf16 %v8434_v40  ;;  %7979 = vmatprep.subr.msk.bf16.mxu0 %vm9204_vm3, %v7977_v23  ;;  %v1683_v46 = vmul.f32 %v8602_v39, %v8594_v59 }
 0xbcf   :  { %v7983_v48 = vpack.c.bf16 %v8436_v44, %v8435_v45  ;;  %7427 = vmatprep.mubr.msk.f32.mxu0 %vm834_vm4, %v1683_v46 }
 0xbd0   :  { %7428 = vmatmul.mubr.msk.f32.vlgmr.msra.gmra.mrb[20].mxu0 %vm834_vm4, %v1684_v47 }
 0xbd1   :  { %7985 = vmatprep.subr.msk.bf16.mxu1 %vm9204_vm3, %v7983_v48 }
 0xbd4   :  { %7982 = vmatpush3.bf16.xpose.msk.msra.mxu0 %vm9204_vm3, %v7977_v23 }
 0xbf6   :  { %v1675_v50 = vpop.xlane.xlu0 %1674 }
 0xbf7   :  { %8603 = vrcp.f32 %v1675_v50 }
 0xbfa   :  { %v1862_v51 = vpop.permute.xlu0 %1861 }
 0xbfb   :  { %7441 = vmatprep.mubr.msk.f32.mxu0 %vm657_vm2, %v1862_v51 }
 0xbfd   :  { %v1678_v55 = vpop.xlane.xlu1 %1677 }
 0xbfe   :  { %8605 = vrcp.f32 %v1678_v55  ;;  %v1953_v59 = vpop.permute.xlu0 %1952 }
 0xc01   :  { %v8604_v56 = vpop.eup %8603  ;;  %v1864_v57 = vpop.permute.xlu1 %1863 }
 0xc02   :  { %7442 = vmatmul.mubr.msk.f32.vlgmr.msra.gmra.mrb[22].mxu0 %vm657_vm2, %v1864_v57  ;;  %v1685_v20 = vmul.f32 %v8604_v56, %v8596_v12 }
 0xc04   :  { %7434 = vmatprep.mubr.msk.f32.mxu1 %vm834_vm4, %v1685_v20 }
 0xc05   :  { %v1955_v60 = vpop.permute.xlu1 %1954 }
 0xc08   :  { %v8606_v21 = vpop.eup %8605 }
 0xc09   :  { %v1686_v58 = vmul.f32 %v8606_v21, %v8598_v10 }
 0xc0b   :  { %7435 = vmatmul.mubr.msk.f32.vlgmr.msra.gmra.mrb[16].mxu1 %vm834_vm4, %v1686_v58 }
 0xc0c   :  { %7988 = vmatpush3.bf16.xpose.msk.msra.mxu1 %vm9204_vm3, %v7983_v48  ;;  %7448 = vmatprep.mubr.msk.f32.mxu1 %vm657_vm2, %v1953_v59 }
 0xc13   :  { %7449 = vmatmul.mubr.msk.f32.vlgmr.msra.gmra.mrb[18].mxu1 %vm657_vm2, %v1955_v60 }
 0xca3   :  { %v7429_v61 = vpop.f32.mrb[20].mxu0 }
 0xca4   :  { %v1765_v0 = vpop.f32.mrb[21].mxu0 }
 0xcd5   :  { %v7443_v2 = vpop.f32.mrb[22].mxu0 }
 0xcd6   :  { %v2044_v7 = vmul.f32 0.35355338, %v7443_v2  ;;  %v1943_v28 = vpop.f32.mrb[23].mxu0 }
 0xcd7   :  { %v2043_v8 = vmul.f32 0.35355338, %v1943_v28 }
 0xcd8   :  { %v2050_v9 = vsel %vm834_vm4, %v2044_v7, -inf }
 0xcd9   :  { %2051 = vmax.xlane.f32.xlu1 %v2050_v9  ;;  %v2047_v12 = vsel %vm834_vm4, %v2043_v8, -inf }
 0xcda   :  { %2048 = vmax.xlane.f32.xlu0 %v2047_v12 }
 0xcde   :  { %v9360_v13 = vpop.f32.mrb[16].mxu1 }
 0xcdf   :  { %v9362_v10 = vpop.f32.mrb[17].mxu1 }
 0xce6   :  { %v7450_v14 = vpop.f32.mrb[18].mxu1 }
 0xce7   :  { %v2034_v15 = vpop.f32.mrb[19].mxu1  ;;  %v2046_v22 = vmul.f32 0.35355338, %v7450_v14 }
 0xce8   :  { %v2045_v17 = vmul.f32 0.35355338, %v2034_v15  ;;  %v2326_v15 = vld [vmem:[%s10571_s1 + $0x280] sm:$0xff] }
 0xce9   :  { %v2056_v27 = vsel %vm834_vm4, %v2046_v22, -inf }
 0xcea   :  { %v2053_v24 = vsel %vm834_vm4, %v2045_v17, -inf }
 0xceb   :  { %2054 = vmax.xlane.f32.xlu0 %v2053_v24 }
 0xcef   :  { %2057 = vmax.xlane.f32.xlu0 %v2056_v27  ;;  %v2329_v27 = vld [vmem:[%s10571_s1 + $0x298] sm:$0xff] }
 0xd66   :  { %v2052_v29 = vpop.xlane.xlu1 %2051 }
 0xd67   :  { %v2060_v30 = vsub.f32 %v2044_v7, %v2052_v29  ;;  %v2049_v35 = vpop.xlane.xlu0 %2048 }
 0xd68   :  { %v2059_v18 = vsub.f32 %v2043_v8, %v2049_v35 }
 0xd69   :  { %v2065_v36 = vmul.f32 1.442695, %v2060_v30 }
 0xd6a   :  { %v2063_v37 = vmul.f32 1.442695, %v2059_v18 }
 0xd6b   :  { %8607 = vpow2.f32 %v2065_v36 }
 0xd6c   :  { %8609 = vpow2.f32 %v2063_v37 }
 0xd75   :  { %v8608_v16 = vpop.eup %8607 }
 0xd76   :  { %v8610_v38 = vpop.eup %8609  ;;  %v2074_v25 = vsel %vm834_vm4, %v8608_v16, 0.0 }
 0xd77   :  { %2075 = vadd.xlane.f32.xlu1 %v2074_v25  ;;  %v2071_v23 = vsel %vm834_vm4, %v8610_v38, 0.0 }
 0xd78   :  { %v2055_v39 = vpop.xlane.xlu0 %2054  ;;  %2072 = vadd.xlane.f32.xlu0 %v2071_v23 }
 0xd79   :  { %v2061_v40 = vsub.f32 %v2045_v17, %v2055_v39  ;;  %v2327_v17 = vld [vmem:[%s10571_s1 + $0x288] sm:$0xff] }
 0xd7a   :  { %v7997_v24 = vpack.c.bf16 %v2327_v17, %v2326_v15 }
 0xd7b   :  { %v2067_v44 = vmul.f32 1.442695, %v2061_v40 }
 0xd7c   :  { %v2058_v45 = vpop.xlane.xlu0 %2057 }
 0xd7d   :  { %8611 = vpow2.f32 %v2067_v44  ;;  %v2062_v46 = vsub.f32 %v2046_v22, %v2058_v45  ;;  %v2328_v22 = vld [vmem:[%s10571_s1 + $0x290] sm:$0xff] }
 0xd7e   :  { %v8001_v29 = vpack.c.bf16 %v2329_v27, %v2328_v22  ;;  %v2511_v27 = vld [vmem:[%s10574_s4] sm:$0xff] }
 0xd7f   :  { %v2069_v47 = vmul.f32 1.442695, %v2062_v46 }
 0xd81   :  { %8613 = vpow2.f32 %v2069_v47 }
 0xd87   :  { %v8612_v48 = vpop.eup %8611 }
 0xd88   :  { %v2077_v50 = vsel %vm834_vm4, %v8612_v48, 0.0 }
 0xd89   :  { %2078 = vadd.xlane.f32.xlu0 %v2077_v50 }
 0xd8b   :  { %v8614_v51 = vpop.eup %8613 }
 0xd8c   :  { %v2080_v55 = vsel %vm834_vm4, %v8614_v51, 0.0 }
 0xd8d   :  { %2081 = vadd.xlane.f32.xlu1 %v2080_v55 }
 0xd9e   :  { %8443 = vrot.lane.b32.xlu1 %v9198_v26, %s8899_s18 }
 0xd9f   :  { %8438 = vrot.lane.b32.xlu0 %v9188_v19, %s8899_s18 }
 0xda2   :  { %2269 = vrot.lane.b32.xlu1 %v9312_v34, %s8900_s19 }
 0xda3   :  { %2285 = vrot.lane.b32.xlu0 %v1765_v0, %s8901_s20 }
 0xda6   :  { %2271 = vrot.lane.b32.xlu1 %v9310_v33, %s8900_s19 }
 0xdaa   :  { %2287 = vrot.lane.b32.xlu1 %v7429_v61, %s8901_s20 }
 0xe04   :  { %v2076_v20 = vpop.xlane.xlu1 %2075 }
 0xe05   :  { %v2073_v56 = vpop.xlane.xlu0 %2072 }
 0xe06   :  { %8615 = vrcp.f32 %v2073_v56 }
 0xe07   :  { %8617 = vrcp.f32 %v2076_v20 }
 0xe10   :  { %v8616_v57 = vpop.eup %8615 }
 0xe11   :  { %v2087_v26 = vmul.f32 %v8616_v57, %v8610_v38  ;;  %v8618_v0 = vpop.eup %8617 }
 0xe12   :  { %v2088_v28 = vmul.f32 %v8618_v0, %v8608_v16 }
 0xe13   :  { %7455 = vmatprep.mubr.msk.f32.mxu0 %vm834_vm4, %v2087_v26  ;;  %v9429_v26 = vsub.s32 5, %v9034_v63 }
 0xe16   :  { %v2079_v19 = vpop.xlane.xlu0 %2078 }
 0xe17   :  { %8619 = vrcp.f32 %v2079_v19 }
 0xe1a   :  { %v2082_v21 = vpop.xlane.xlu1 %2081  ;;  %v8439_v34 = vpop.permute.xlu0 %8438 }
 0xe1b   :  { %8621 = vrcp.f32 %v2082_v21  ;;  %v8441_v58 = vunpack.i.h.bf16 %v8439_v34  ;;  %v8440_v59 = vunpack.i.l.bf16 %v8439_v34 }
 0xe1d   :  { %v7989_v60 = vpack.c.bf16 %v8441_v58, %v8440_v59 }
 0xe1e   :  { %v8444_v33 = vpop.permute.xlu1 %8443  ;;  %v2286_v25 = vpop.permute.xlu0 %2285 }
 0xe1f   :  { %v8446_v2 = vunpack.i.h.bf16 %v8444_v33  ;;  %v8445_v61 = vunpack.i.l.bf16 %v8444_v33  ;;  %7990 = vmatprep.subr.bf16.mxu0 %v7989_v60 }
 0xe20   :  { %7992 = vmatpush3.bf16.msra.mxu0 %v7989_v60 }
 0xe21   :  { %v8620_v7 = vpop.eup %8619  ;;  %v7993_v8 = vpack.c.bf16 %v8446_v2, %v8445_v61  ;;  %7998 = vmatprep.subr.bf16.mxu0 %v7997_v24 }
 0xe22   :  { %v2089_v9 = vmul.f32 %v8620_v7, %v8612_v48  ;;  %v2270_v37 = vpop.permute.xlu1 %2269 }
 0xe23   :  { %7456 = vmatmul.mubr.msk.f32.vlgmr.msra.gmra.mrb[24].mxu0 %vm834_vm4, %v2088_v28  ;;  %7994 = vmatprep.subr.bf16.mxu1 %v7993_v8 }
 0xe24   :  { %7996 = vmatpush3.bf16.msra.mxu1 %v7993_v8  ;;  %7462 = vmatprep.mubr.msk.f32.mxu1 %vm834_vm4, %v2089_v9 }
 0xe25   :  { %v8622_v12 = vpop.eup %8621  ;;  %8000 = vmatpush3.bf16.msra.mxu0 %v7997_v24 }
 0xe26   :  { %v2090_v14 = vmul.f32 %v8622_v12, %v8614_v51  ;;  %8002 = vmatprep.subr.bf16.mxu0 %v8001_v29  ;;  %v2272_v16 = vpop.permute.xlu1 %2271 }
 0xe28   :  { %7463 = vmatmul.mubr.msk.f32.vlgmr.msra.gmra.mrb[20].mxu1 %vm834_vm4, %v2090_v14 }
 0xe29   :  { %8004 = vmatpush3.bf16.msra.mxu0 %v8001_v29  ;;  %v2512_v29 = vld [vmem:[%s10574_s4 + $0x8] sm:$0xff] }
 0xe2a   :  { %v2288_v38 = vpop.permute.xlu1 %2287 }
 0xef6   :  { %v7457_v30 = vpop.f32.mrb[24].mxu0 }
 0xef7   :  { %2303 = vrot.lane.b32.xlu1 %v7457_v30, %s8902_s28  ;;  %v2169_v35 = vpop.f32.mrb[25].mxu0  ;;  %v8005_v30 = vpack.c.bf16 %v2512_v29, %v2511_v27 }
 0xef8   :  { %2301 = vrot.lane.b32.xlu0 %v2169_v35, %s8902_s28  ;;  %v2513_v35 = vld [vmem:[%s10574_s4 + $0x10] sm:$0xff] }
 0xef9   :  { %8006 = vmatprep.subr.bf16.mxu1 %v8005_v30 }
 0xefa   :  { %8008 = vmatpush3.bf16.msra.mxu1 %v8005_v30 }
 0xefb   :  { %v7464_v18 = vpop.f32.mrb[20].mxu1  ;;  %2275 = vrot.lane.b32.xlu1 %v9316_v41, %s8900_s19  ;;  %v2313_v41 = vsel %vm657_vm2, %v9265_v1, %v2270_v37 }
 0xefc   :  { %v2256_v36 = vpop.f32.mrb[21].mxu1  ;;  %2273 = vrot.lane.b32.xlu0 %v9318_v43, %s8900_s19  ;;  %v2314_v43 = vsel %vm657_vm2, %v9262_v62, %v2272_v16 }
 0xeff   :  { %2291 = vrot.lane.b32.xlu1 %v9360_v13, %s8901_s20  ;;  %v2317_v13 = vsel %vm834_vm4, %v2313_v41, %v2286_v25 }
 0xf00   :  { %2289 = vrot.lane.b32.xlu0 %v9362_v10, %s8901_s20  ;;  %v2318_v10 = vsel %vm834_vm4, %v2314_v43, %v2288_v38 }
 0xf03   :  { %2307 = vrot.lane.b32.xlu1 %v7464_v18, %s8902_s28  ;;  %v2514_v18 = vld [vmem:[%s10574_s4 + $0x18] sm:$0xff] }
 0xf04   :  { %2305 = vrot.lane.b32.xlu0 %v2256_v36, %s8902_s28  ;;  %v8009_v36 = vpack.c.bf16 %v2514_v18, %v2513_v35 }
 0xf06   :  { %8010 = vmatprep.subr.bf16.mxu1 %v8009_v36 }
 0xf07   :  { %8012 = vmatpush3.bf16.msra.mxu1 %v8009_v36 }
 0xf69   :  { %v2304_v23 = vpop.permute.xlu1 %2303 }
 0xf6a   :  { %v2302_v39 = vpop.permute.xlu0 %2301  ;;  %v2323_v44 = vsel %vm2321_vm5, %v2318_v10, %v2304_v23 }
 0xf6b   :  { %v2322_v40 = vsel %vm2321_vm5, %v2317_v13, %v2302_v39 }
 0xf6c   :  { %7473 = vmatprep.mubr.msk.f32.mxu0 %vm140_vm1, %v2322_v40 }
 0xf6d   :  { %v2276_v45 = vpop.permute.xlu1 %2275  ;;  %7474 = vmatmul.mubr.msk.f32.vlgmr.msra.gmra.mrb[26].mxu0 %vm140_vm1, %v2323_v44 }
 0xf6e   :  { %v2274_v1 = vpop.permute.xlu0 %2273  ;;  %v2316_v50 = vsel %vm657_vm2, %v9268_v5, %v2276_v45  ;;  %v9434_v5 = vld [vmem:[%s10571_s1 + $0x60] sm:$0xff] }
 0xf6f   :  { %v2315_v62 = vsel %vm657_vm2, %v9270_v32, %v2274_v1  ;;  %v2333_v32 = vrot.slane %v9434_v5, %v9429_v26 }
 0xf71   :  { %v2292_v46 = vpop.permute.xlu1 %2291 }
 0xf72   :  { %v2290_v47 = vpop.permute.xlu0 %2289  ;;  %v2320_v56 = vsel %vm834_vm4, %v2316_v50, %v2292_v46 }
 0xf73   :  { %v2319_v51 = vsel %vm834_vm4, %v2315_v62, %v2290_v47 }
 0xf75   :  { %v2308_v48 = vpop.permute.xlu1 %2307 }
 0xf76   :  { %v2306_v55 = vpop.permute.xlu0 %2305  ;;  %v2325_v20 = vsel %vm2321_vm5, %v2320_v56, %v2308_v48 }
 0xf77   :  { %v2324_v57 = vsel %vm2321_vm5, %v2319_v51, %v2306_v55 }
 0xf78   :  { %7476 = vmatprep.mubr.msk.f32.mxu0 %vm140_vm1, %v2324_v57  ;;  %v9483_v57 = vsub.s32 6, %v9034_v63 }
 0xf79   :  { %7477 = vmatmul.mubr.msk.f32.gmra.mrb[28].mxu0 %vm140_vm1, %v2325_v20 }
0x1040   :  { %v7475_v19 = vpop.f32.mrb[26].mxu0 }
0x1041   :  { %v2418_v21 = vadd.f32 %v7475_v19, %v2333_v32  ;;  %v2412_v34 = vpop.f32.mrb[27].mxu0 }
0x1042   :  { %v2413_v58 = vadd.f32 %v2412_v34, %v2333_v32 }
0x1043   :  { %v9439_v59 = vadd.f32 %v2418_v21, %v9117_v52  ;;  %v2505_v21 = vsub.s32 7, %v9034_v63 }
0x1044   :  { %v9442_v60 = vadd.f32 %v2413_v58, %v9119_v53 }
0x1045   :  { %v2438_v0 = vsel %vm140_vm1, %v9439_v59, 0.0  ;;  %v2452_v52 = vmul.f32 %v9439_v59, %v9439_v59 }
0x1046   :  { %2439 = vadd.xlane.f32.xlu1 %v2438_v0  ;;  %v2435_v33 = vsel %vm140_vm1, %v9442_v60, 0.0  ;;  %v2451_v2 = vmul.f32 %v9442_v60, %v9442_v60 }
0x1047   :  { %2436 = vadd.xlane.f32.xlu0 %v2435_v33  ;;  %v2458_v9 = vsel %vm140_vm1, %v2452_v52, 0.0  ;;  %v2498_v33 = vrot.slane %v9434_v5, %v9483_v57 }
0x1048   :  { %v2455_v61 = vsel %vm140_vm1, %v2451_v2, 0.0 }
0x104b   :  { %2456 = vadd.xlane.f32.xlu0 %v2455_v61 }
0x104c   :  { %v7478_v7 = vpop.f32.mrb[28].mxu0 }
0x104d   :  { %v2428_v53 = vadd.f32 %v7478_v7, %v2333_v32  ;;  %v2422_v28 = vpop.f32.mrb[29].mxu0  ;;  %v2506_v7 = vrot.slane %v9434_v5, %v2505_v21 }
0x104e   :  { %v2423_v8 = vadd.f32 %v2422_v28, %v2333_v32 }
0x104f   :  { %v9455_v12 = vadd.f32 %v2428_v53, %v9133_v3  ;;  %2459 = vadd.xlane.f32.xlu0 %v2458_v9 }
0x1050   :  { %v9458_v14 = vadd.f32 %v2423_v8, %v9135_v4 }
0x1051   :  { %v2444_v15 = vsel %vm140_vm1, %v9455_v12, 0.0  ;;  %v2454_v17 = vmul.f32 %v9455_v12, %v9455_v12 }
0x1052   :  { %2445 = vadd.xlane.f32.xlu1 %v2444_v15  ;;  %v2441_v22 = vsel %vm140_vm1, %v9458_v14, 0.0  ;;  %v2453_v24 = vmul.f32 %v9458_v14, %v9458_v14 }
0x1053   :  { %2442 = vadd.xlane.f32.xlu0 %v2441_v22  ;;  %v2464_v3 = vsel %vm140_vm1, %v2454_v17, 0.0 }
0x1054   :  { %v2461_v4 = vsel %vm140_vm1, %v2453_v24, 0.0 }
0x1056   :  { %2465 = vadd.xlane.f32.xlu1 %v2464_v3 }
0x1057   :  { %2462 = vadd.xlane.f32.xlu0 %v2461_v4 }
0x10d3   :  { %v2440_v38 = vpop.xlane.xlu1 %2439 }
0x10d4   :  { %v2437_v37 = vpop.xlane.xlu0 %2436  ;;  %v2448_v41 = vmul.f32 0.03125, %v2440_v38 }
0x10d5   :  { %v2447_v16 = vmul.f32 0.03125, %v2437_v37  ;;  %v6838_v37 = vld [vmem:[%s10574_s4 + $0x20] ss:$0 sm:$0xff] }
0x10d6   :  { %v2472_v10 = vmul.f32 %v2448_v41, %v2448_v41  ;;  %v2480_v53 = vsub.f32 %v9439_v59, %v2448_v41 }
0x10d7   :  { %v2471_v23 = vmul.f32 %v2447_v16, %v2447_v16  ;;  %v2479_v58 = vsub.f32 %v9442_v60, %v2447_v16 }
0x10d8   :  { %v2457_v25 = vpop.xlane.xlu0 %2456 }
0x10d9   :  { %v2467_v43 = vmul.f32 0.03125, %v2457_v25 }
0x10db   :  { %v2475_v13 = vsub.f32 %v2467_v43, %v2471_v23 }
0x10dc   :  { %v2460_v39 = vpop.xlane.xlu0 %2459 }
0x10dd   :  { %v2483_v40 = vadd.f32 1e-05, %v2475_v13  ;;  %v2468_v44 = vmul.f32 0.03125, %v2460_v39 }
0x10df   :  { %8623 = vrsqrt.f32 %v2483_v40  ;;  %v2476_v45 = vsub.f32 %v2468_v44, %v2472_v10  ;;  %v2446_v1 = vpop.xlane.xlu1 %2445 }
0x10e0   :  { %v2450_v46 = vmul.f32 0.03125, %v2446_v1  ;;  %v2443_v47 = vpop.xlane.xlu0 %2442 }
0x10e1   :  { %v2484_v62 = vadd.f32 1e-05, %v2476_v45  ;;  %v2449_v48 = vmul.f32 0.03125, %v2443_v47 }
0x10e2   :  { %v2474_v51 = vmul.f32 %v2450_v46, %v2450_v46  ;;  %v2482_v24 = vsub.f32 %v9455_v12, %v2450_v46 }
0x10e3   :  { %8625 = vrsqrt.f32 %v2484_v62  ;;  %v2466_v50 = vpop.xlane.xlu1 %2465  ;;  %v2473_v20 = vmul.f32 %v2449_v48, %v2449_v48  ;;  %v2481_v4 = vsub.f32 %v9458_v14, %v2449_v48 }
0x10e4   :  { %v2470_v55 = vmul.f32 0.03125, %v2466_v50  ;;  %v2463_v56 = vpop.xlane.xlu0 %2462 }
0x10e5   :  { %v2469_v32 = vmul.f32 0.03125, %v2463_v56  ;;  %v8903_v56 = vmov 0.0|0.0  }
0x10e6   :  { %v2478_v19 = vsub.f32 %v2470_v55, %v2474_v51  ;;  %8013 = vmatprep.subr.bf16.mxu0 %v8903_v56 }
0x10e7   :  { %v2477_v34 = vsub.f32 %v2469_v32, %v2473_v20 }
0x10e8   :  { %v2486_v0 = vadd.f32 1e-05, %v2478_v19 }
0x10e9   :  { %v8624_v2 = vpop.eup %8623  ;;  %v2485_v61 = vadd.f32 1e-05, %v2477_v34 }
0x10ea   :  { %8627 = vrsqrt.f32 %v2486_v0  ;;  %v2491_v52 = vmul.f32 %v8624_v2, %v2479_v58 }
0x10eb   :  { %8629 = vrsqrt.f32 %v2485_v61  ;;  %v2719_v61 = vld [vmem:[%s10575_s5 + $0x8] sm:$0xff] }
0x10ec   :  { %v2499_v28 = vmul.f32 %v2498_v33, %v2491_v52  ;;  %6843 = vmatprep.mubr.msk.f32.mxu0 %vm2730_vm6, %v2719_v61  ;;  %v9514_v52 = vld [vmem:[%s10571_s1 + $0x300] sm:$0x7f] }
0x10ed   :  { %v8626_v8 = vpop.eup %8625 }
0x10ee   :  { %v2492_v9 = vmul.f32 %v8626_v8, %v2480_v53  ;;  %v2507_v15 = vadd.f32 %v2506_v7, %v2499_v28 }
0x10f0   :  { %7487 = vmatprep.mubr.msk.f32.mxu1 %vm140_vm1, %v2507_v15  ;;  %v2500_v17 = vmul.f32 %v2498_v33, %v2492_v9 }
0x10f2   :  { %v2508_v22 = vadd.f32 %v2506_v7, %v2500_v17 }
0x10f4   :  { %v8628_v3 = vpop.eup %8627  ;;  %7488 = vmatmul.mubr.msk.f32.vlgmr.msra.gmra.mrb[22].mxu1 %vm140_vm1, %v2508_v22 }
0x10f5   :  { %v8630_v27 = vpop.eup %8629  ;;  %v2494_v5 = vmul.f32 %v8628_v3, %v2482_v24 }
0x10f6   :  { %v2493_v29 = vmul.f32 %v8630_v27, %v2481_v4 }
0x10f7   :  { %v2502_v30 = vmul.f32 %v2498_v33, %v2494_v5  ;;  %v2673_v5 = vrot.slane %v9514_v52, %v9045_v11 }
0x10f8   :  { %v2501_v35 = vmul.f32 %v2498_v33, %v2493_v29 }
0x10f9   :  { %v2510_v36 = vadd.f32 %v2506_v7, %v2502_v30 }
0x10fa   :  { %v2509_v18 = vadd.f32 %v2506_v7, %v2501_v35  ;;  %v2665_v7 = vrot.slane %v9514_v52, %v9037_v6 }
0x10fc   :  { %7490 = vmatprep.mubr.msk.f32.mxu1 %vm140_vm1, %v2509_v18 }
0x10fd   :  { %7491 = vmatmul.mubr.msk.f32.gmra.mrb[24].mxu1 %vm140_vm1, %v2510_v36 }
0x11c7   :  { %v7489_v16 = vpop.f32.mrb[22].mxu1 }
0x11c8   :  { %v2604_v38 = vadd.f32 %v7489_v16, %v6838_v37  ;;  %v2598_v25 = vpop.f32.mrb[23].mxu1 }
0x11c9   :  { %v2599_v41 = vadd.f32 %v6838_v37, %v2598_v25 }
0x11ca   :  { %v2618_v23 = vsub.f32 0.0, %v2604_v38 }
0x11cb   :  { %v2617_v43 = vsub.f32 0.0, %v2599_v41 }
0x11cc   :  { %v2623_v13 = vmul.f32 1.442695, %v2618_v23 }
0x11cd   :  { %v2621_v39 = vmul.f32 1.442695, %v2617_v43 }
0x11ce   :  { %8631 = vpow2.f32 %v2623_v13 }
0x11cf   :  { %8633 = vpow2.f32 %v2621_v39 }
0x11d0   :  { %v7492_v10 = vpop.f32.mrb[24].mxu1 }
0x11d1   :  { %v2614_v40 = vadd.f32 %v7492_v10, %v6838_v37  ;;  %v2608_v44 = vpop.f32.mrb[25].mxu1  ;;  %v2689_v10 = vrot.slane %v9514_v52, %v9160_v49 }
0x11d2   :  { %v2609_v45 = vadd.f32 %v6838_v37, %v2608_v44 }
0x11d3   :  { %v2620_v1 = vsub.f32 0.0, %v2614_v40 }
0x11d4   :  { %v2619_v46 = vsub.f32 0.0, %v2609_v45 }
0x11d5   :  { %v2627_v47 = vmul.f32 1.442695, %v2620_v1 }
0x11d6   :  { %v2625_v62 = vmul.f32 1.442695, %v2619_v46 }
0x11d7   :  { %8635 = vpow2.f32 %v2627_v47 }
0x11d8   :  { %v8632_v48 = vpop.eup %8631  ;;  %8637 = vpow2.f32 %v2625_v62  ;;  %v2697_v62 = vrot.slane %v9514_v52, %v9163_v54 }
0x11d9   :  { %v8634_v50 = vpop.eup %8633  ;;  %v2630_v51 = vadd.f32 1.0, %v8632_v48 }
0x11da   :  { %v2629_v55 = vadd.f32 1.0, %v8634_v50 }
0x11db   :  { %8639 = vrcp.f32 %v2630_v51 }
0x11dc   :  { %8641 = vrcp.f32 %v2629_v55 }
0x11e1   :  { %v8636_v20 = vpop.eup %8635 }
0x11e2   :  { %v8638_v32 = vpop.eup %8637  ;;  %v2632_v58 = vadd.f32 1.0, %v8636_v20 }
0x11e3   :  { %v2631_v19 = vadd.f32 1.0, %v8638_v32 }
0x11e5   :  { %v8640_v34 = vpop.eup %8639  ;;  %8643 = vrcp.f32 %v2631_v19  ;;  %v2705_v19 = vrot.slane %v9514_v52, %v9429_v26 }
0x11e6   :  { %v8642_v0 = vpop.eup %8641  ;;  %2647 = vrot.lane.b32.xlu1 %v8640_v34, %s8889_s8  ;;  %8645 = vrcp.f32 %v2632_v58 }
0x11e7   :  { %2645 = vrot.lane.b32.xlu0 %v8642_v0, %s8889_s8 }
0x11ef   :  { %v8644_v33 = vpop.eup %8643 }
0x11f0   :  { %2649 = vrot.lane.b32.xlu1 %v8644_v33, %s8889_s8  ;;  %v8646_v2 = vpop.eup %8645 }
0x11f4   :  { %2651 = vrot.lane.b32.xlu1 %v8646_v2, %s8889_s8 }
0x1258   :  { %v2648_v53 = vpop.permute.xlu1 %2647 }
0x1259   :  { %v9518_v28 = vmul.f32 %v2648_v53, %v2604_v38  ;;  %v2646_v8 = vpop.permute.xlu0 %2645  ;;  %v2681_v38 = vrot.slane %v9514_v52, %v9111_v42 }
0x125a   :  { %v9520_v9 = vmul.f32 %v2646_v8, %v2599_v41 }
0x125b   :  { %v2667_v15 = vmul.f32 %v2665_v7, %v9518_v28  ;;  %v2675_v36 = vmul.f32 %v2673_v5, %v9518_v28  ;;  %v2683_v43 = vmul.f32 %v2681_v38, %v9518_v28  ;;  %v2691_v1 = vmul.f32 %v2689_v10, %v9518_v28 }
0x125c   :  { %v2666_v17 = vmul.f32 %v2665_v7, %v9520_v9  ;;  %v2674_v18 = vmul.f32 %v2673_v5, %v9520_v9  ;;  %v2682_v23 = vmul.f32 %v2681_v38, %v9520_v9  ;;  %v2698_v51 = vmul.f32 %v2697_v62, %v9520_v9 }
0x125d   :  { %v2699_v55 = vmul.f32 %v2697_v62, %v9518_v28  ;;  %v2706_v0 = vmul.f32 %v2705_v19, %v9520_v9  ;;  %v2707_v33 = vmul.f32 %v2705_v19, %v9518_v28 }
0x125e   :  { %v8014_v22 = vpack.c.bf16 %v2667_v15, %v2666_v17  ;;  %v8020_v37 = vpack.c.bf16 %v2675_v36, %v2674_v18  ;;  %v8026_v13 = vpack.c.bf16 %v2683_v43, %v2682_v23  ;;  %v2857_v18 = vld [vmem:[%s10571_s1 + $0x2c8] sm:$0xff] }
0x125f   :  { %v8038_v20 = vpack.c.bf16 %v2699_v55, %v2698_v51  ;;  %v8044_v2 = vpack.c.bf16 %v2707_v33, %v2706_v0 }
0x1260   :  { %8015 = vmatpush1.bf16.msra.mxu0 %v8014_v22 }
0x1261   :  { %8016 = vmatprep.subr.bf16.mxu0 %v8903_v56 }
0x1262   :  { %v2650_v24 = vpop.permute.xlu1 %2649 }
0x1263   :  { %v9525_v3 = vmul.f32 %v2650_v24, %v2609_v45  ;;  %v2690_v45 = vmul.f32 %v2689_v10, %v9520_v9 }
0x1265   :  { %v2668_v29 = vmul.f32 %v2665_v7, %v9525_v3  ;;  %v2676_v25 = vmul.f32 %v2673_v5, %v9525_v3  ;;  %v8032_v46 = vpack.c.bf16 %v2691_v1, %v2690_v45  ;;  %v2692_v48 = vmul.f32 %v2689_v10, %v9525_v3 }
0x1266   :  { %v2652_v4 = vpop.permute.xlu1 %2651  ;;  %v2700_v34 = vmul.f32 %v2697_v62, %v9525_v3  ;;  %v2708_v53 = vmul.f32 %v2705_v19, %v9525_v3 }
0x1267   :  { %v9527_v27 = vmul.f32 %v2652_v4, %v2614_v40  ;;  %v2684_v40 = vmul.f32 %v2681_v38, %v9525_v3 }
0x1269   :  { %v2669_v30 = vmul.f32 %v2665_v7, %v9527_v27  ;;  %v2677_v16 = vmul.f32 %v2673_v5, %v9527_v27  ;;  %v2685_v39 = vmul.f32 %v2681_v38, %v9527_v27  ;;  %v2693_v47 = vmul.f32 %v2689_v10, %v9527_v27  ;;  %v2718_v5 = vld [vmem:[%s10575_s5] sm:$0xff] }
0x126a   :  { %v2701_v32 = vmul.f32 %v2697_v62, %v9527_v27  ;;  %v2709_v61 = vmul.f32 %v2705_v19, %v9527_v27  ;;  %v2713_v7 = vrot.slane %v9514_v52, %v9483_v57 }
0x126b   :  { %v8017_v35 = vpack.c.bf16 %v2669_v30, %v2668_v29  ;;  %v8023_v41 = vpack.c.bf16 %v2677_v16, %v2676_v25  ;;  %v8029_v44 = vpack.c.bf16 %v2685_v39, %v2684_v40  ;;  %v8035_v50 = vpack.c.bf16 %v2693_v47, %v2692_v48  ;;  %v2725_v29 = vld [vmem:[%s10575_s5 + $0x38] sm:$0xff]  ;;  %v2724_v30 = vld [vmem:[%s10575_s5 + $0x30] sm:$0xff]  ;;  %v9618_v25 = vld [vmem:[%s10571_s1 + $0x68] sm:$0x7f] }
0x126c   :  { %v8041_v58 = vpack.c.bf16 %v2701_v32, %v2700_v34  ;;  %v8047_v8 = vpack.c.bf16 %v2709_v61, %v2708_v53  ;;  %v2714_v15 = vmul.f32 %v2713_v7, %v9520_v9  ;;  %v2715_v17 = vmul.f32 %v2713_v7, %v9518_v28  ;;  %v2721_v28 = vld [vmem:[%s10575_s5 + $0x18] sm:$0xff]  ;;  %v2720_v9 = vld [vmem:[%s10575_s5 + $0x10] sm:$0xff] }
0x126d   :  { %8018 = vmatpush1.bf16.msra.mxu0 %v8017_v35  ;;  %v2717_v24 = vmul.f32 %v2713_v7, %v9527_v27  ;;  %v2716_v4 = vmul.f32 %v2713_v7, %v9525_v3  ;;  %v2723_v3 = vld [vmem:[%s10575_s5 + $0x28] sm:$0xff]  ;;  %v2722_v27 = vld [vmem:[%s10575_s5 + $0x20] sm:$0xff]  ;;  %v2859_v16 = vld [vmem:[%s10571_s1 + $0x2d8] sm:$0xff] }
0x126e   :  { %8019 = vmatprep.subr.bf16.mxu0 %v8903_v56  ;;  %v8050_v22 = vpack.c.bf16 %v2715_v17, %v2714_v15  ;;  %v2856_v35 = vld [vmem:[%s10571_s1 + $0x2c0] sm:$0xff] }
0x126f   :  { %v8053_v52 = vpack.c.bf16 %v2717_v24, %v2716_v4  ;;  %v8055_v36 = vpack.c.bf16 %v2857_v18, %v2856_v35  ;;  %v2961_v18 = vmul.f32 2.0, %v9442_v60 }
0x1271   :  { %8021 = vmatpush1.bf16.msra.mxu0 %v8020_v37  ;;  %8056 = vmatprep.subr.bf16.mxu1 %v8055_v36  ;;  %v2858_v37 = vld [vmem:[%s10571_s1 + $0x2d0] sm:$0xff] }
0x1272   :  { %8022 = vmatprep.subr.bf16.mxu0 %v8903_v56  ;;  %8058 = vmatpush3.bf16.msra.mxu1 %v8055_v36  ;;  %v8059_v38 = vpack.c.bf16 %v2859_v16, %v2858_v37 }
0x1274   :  { %8060 = vmatprep.subr.bf16.mxu1 %v8059_v38 }
0x1275   :  { %8024 = vmatpush1.bf16.msra.mxu0 %v8023_v41  ;;  %v2729_v41 = vrot.slane %v9618_v25, %v9037_v6 }
0x1276   :  { %8025 = vmatprep.subr.bf16.mxu0 %v8903_v56  ;;  %8062 = vmatpush3.bf16.msra.mxu1 %v8059_v38 }
0x1279   :  { %8027 = vmatpush1.bf16.msra.mxu0 %v8026_v13 }
0x127a   :  { %8028 = vmatprep.subr.bf16.mxu0 %v8903_v56 }
0x127d   :  { %8030 = vmatpush1.bf16.msra.mxu0 %v8029_v44 }
0x127e   :  { %8031 = vmatprep.subr.bf16.mxu0 %v8903_v56 }
0x1281   :  { %8033 = vmatpush1.bf16.msra.mxu0 %v8032_v46 }
0x1282   :  { %8034 = vmatprep.subr.bf16.mxu0 %v8903_v56 }
0x1285   :  { %8036 = vmatpush1.bf16.msra.mxu0 %v8035_v50 }
0x1286   :  { %8037 = vmatprep.subr.bf16.mxu0 %v8903_v56 }
0x1289   :  { %8039 = vmatpush1.bf16.msra.mxu0 %v8038_v20 }
0x128a   :  { %8040 = vmatprep.subr.bf16.mxu0 %v8903_v56 }
0x128d   :  { %8042 = vmatpush1.bf16.msra.mxu0 %v8041_v58 }
0x128e   :  { %8043 = vmatprep.subr.bf16.mxu0 %v8903_v56 }
0x1291   :  { %8045 = vmatpush1.bf16.msra.mxu0 %v8044_v2 }
0x1292   :  { %8046 = vmatprep.subr.bf16.mxu0 %v8903_v56 }
0x1295   :  { %8048 = vmatpush1.bf16.msra.mxu0 %v8047_v8 }
0x1296   :  { %8049 = vmatprep.subr.bf16.mxu0 %v8903_v56 }
0x1299   :  { %8051 = vmatpush1.bf16.msra.mxu0 %v8050_v22 }
0x129a   :  { %8052 = vmatprep.subr.bf16.mxu0 %v8903_v56 }
0x129d   :  { %8054 = vmatpush1.bf16.msra.mxu0 %v8053_v52 }
0x12a0   :  { %2808 = vmatmul.mubr.f32.vlgmr.msra.gmra.mrb[30].mxu0 %v2718_v5 }
0x12a1   :  { %6844 = vmatprep.mubr.msk.f32.mxu0 %vm2730_vm6, %v2721_v28 }
0x12a4   :  { %2813 = vmatmul.mubr.f32.gmra.mrb[32].mxu0 %v2720_v9  ;;  %v2863_v9 = vrot.slane %v9618_v25, %v9045_v11 }
0x12a5   :  { %6845 = vmatprep.mubr.msk.f32.mxu0 %vm2730_vm6, %v2723_v3 }
0x12a8   :  { %2818 = vmatmul.mubr.f32.gmra.mrb[34].mxu0 %v2722_v27 }
0x12a9   :  { %6846 = vmatprep.mubr.msk.f32.mxu0 %vm2730_vm6, %v2725_v29  ;;  %v2962_v29 = vmul.f32 2.0, %v9439_v59 }
0x12ac   :  { %2823 = vmatmul.mubr.f32.gmra.mrb[36].mxu0 %v2724_v30 }
0x1373   :  { %v2809_v23 = vpop.f32.mrb[30].mxu0 }
0x1374   :  { %v2810_v43 = vadd.f32 %v2809_v23, %v2729_v41  ;;  %v2811_v13 = vpop.f32.mrb[31].mxu0 }
0x1376   :  { %v2828_v39 = vsub.f32 0.0, %v2810_v43 }
0x1377   :  { %v2814_v10 = vpop.f32.mrb[32].mxu0 }
0x1378   :  { %v2832_v40 = vmul.f32 1.442695, %v2828_v39  ;;  %v2815_v44 = vadd.f32 %v2814_v10, %v2729_v41  ;;  %v2816_v45 = vpop.f32.mrb[33].mxu0 }
0x137a   :  { %8647 = vpow2.f32 %v2832_v40  ;;  %v2829_v1 = vsub.f32 0.0, %v2815_v44 }
0x137b   :  { %v2819_v46 = vpop.f32.mrb[34].mxu0 }
0x137c   :  { %v2834_v47 = vmul.f32 1.442695, %v2829_v1  ;;  %v2820_v62 = vadd.f32 %v2819_v46, %v2729_v41  ;;  %v2821_v48 = vpop.f32.mrb[35].mxu0 }
0x137e   :  { %8649 = vpow2.f32 %v2834_v47  ;;  %v2830_v50 = vsub.f32 0.0, %v2820_v62 }
0x137f   :  { %v2824_v51 = vpop.f32.mrb[36].mxu0 }
0x1380   :  { %v2836_v55 = vmul.f32 1.442695, %v2830_v50  ;;  %v2825_v20 = vadd.f32 %v2824_v51, %v2729_v41  ;;  %v2826_v32 = vpop.f32.mrb[37].mxu0  ;;  %v3045_v50 = vld [vmem:[%s10572_s2 + $0x28] sm:$0xff]  ;;  %v3046_v51 = vld [vmem:[%s10572_s2 + $0x30] sm:$0xff] }
0x1381   :  { %v3048_v32 = vld [vmem:[%s10572_s2 + $0x40] sm:$0xff] }
0x1382   :  { %8651 = vpow2.f32 %v2836_v55  ;;  %v2831_v19 = vsub.f32 0.0, %v2825_v20  ;;  %v8063_v55 = vpack.c.bf16 %v3046_v51, %v3045_v50 }
0x1384   :  { %v8648_v34 = vpop.eup %8647  ;;  %v2838_v58 = vmul.f32 1.442695, %v2831_v19  ;;  %8064 = vmatprep.subr.bf16.mxu1 %v8063_v55 }
0x1385   :  { %v2840_v0 = vadd.f32 1.0, %v8648_v34 }
0x1386   :  { %8653 = vpow2.f32 %v2838_v58 }
0x1387   :  { %8655 = vrcp.f32 %v2840_v0 }
0x1388   :  { %v8650_v33 = vpop.eup %8649 }
0x1389   :  { %v2841_v2 = vadd.f32 1.0, %v8650_v33 }
0x138b   :  { %8657 = vrcp.f32 %v2841_v2 }
0x138c   :  { %v8652_v61 = vpop.eup %8651 }
0x138d   :  { %v2842_v7 = vadd.f32 1.0, %v8652_v61 }
0x138f   :  { %8659 = vrcp.f32 %v2842_v7 }
0x1390   :  { %v8654_v53 = vpop.eup %8653 }
0x1391   :  { %v8656_v8 = vpop.eup %8655  ;;  %v2843_v15 = vadd.f32 1.0, %v8654_v53 }
0x1392   :  { %v2852_v17 = vmul.f32 %v8656_v8, %v2810_v43  ;;  %v2964_v43 = vmul.f32 2.0, %v9455_v12 }
0x1393   :  { %8661 = vrcp.f32 %v2843_v15 }
0x1394   :  { %7501 = vmatprep.mubr.msk.f32.mxu1 %vm140_vm1, %v2852_v17 }
0x1395   :  { %v8658_v22 = vpop.eup %8657 }
0x1396   :  { %v2853_v24 = vmul.f32 %v8658_v22, %v2815_v44  ;;  %v2963_v44 = vmul.f32 2.0, %v9458_v14 }
0x1398   :  { %7502 = vmatmul.mubr.msk.f32.vlgmr.msra.gmra.mrb[26].mxu1 %vm140_vm1, %v2853_v24 }
0x1399   :  { %v8660_v4 = vpop.eup %8659  ;;  %8066 = vmatpush3.bf16.msra.mxu1 %v8063_v55 }
0x139a   :  { %v2854_v52 = vmul.f32 %v8660_v4, %v2820_v62 }
0x139c   :  { %7504 = vmatprep.mubr.msk.f32.mxu1 %vm140_vm1, %v2854_v52 }
0x139d   :  { %v8662_v5 = vpop.eup %8661 }
0x139e   :  { %v2855_v28 = vmul.f32 %v8662_v5, %v2825_v20  ;;  %v3047_v20 = vld [vmem:[%s10572_s2 + $0x38] sm:$0xff] }
0x139f   :  { %v8067_v19 = vpack.c.bf16 %v3048_v32, %v3047_v20 }
0x13a0   :  { %7505 = vmatmul.mubr.msk.f32.gmra.mrb[28].mxu1 %vm140_vm1, %v2855_v28 }
0x13a1   :  { %8068 = vmatprep.subr.bf16.mxu1 %v8067_v19 }
0x13a2   :  { %8070 = vmatpush3.bf16.msra.mxu1 %v8067_v19 }
0x146b   :  { %v7503_v3 = vpop.f32.mrb[26].mxu1 }
0x146c   :  { %v2948_v27 = vadd.f32 %v7503_v3, %v2863_v9  ;;  %v2942_v30 = vpop.f32.mrb[27].mxu1 }
0x146d   :  { %v2943_v35 = vadd.f32 %v2942_v30, %v2863_v9 }
0x146e   :  { %v9630_v36 = vadd.f32 %v2962_v29, %v2948_v27 }
0x146f   :  { %v9632_v37 = vadd.f32 %v2961_v18, %v2943_v35 }
0x1470   :  { %v2972_v16 = vsel %vm140_vm1, %v9630_v36, 0.0  ;;  %v2986_v10 = vmul.f32 %v9630_v36, %v9630_v36 }
0x1471   :  { %2973 = vadd.xlane.f32.xlu1 %v2972_v16  ;;  %v2969_v38 = vsel %vm140_vm1, %v9632_v37, 0.0  ;;  %v2985_v41 = vmul.f32 %v9632_v37, %v9632_v37 }
0x1472   :  { %2970 = vadd.xlane.f32.xlu0 %v2969_v38  ;;  %v2992_v12 = vsel %vm140_vm1, %v2986_v10, 0.0 }
0x1473   :  { %v7506_v59 = vpop.f32.mrb[28].mxu1  ;;  %v2989_v39 = vsel %vm140_vm1, %v2985_v41, 0.0 }
0x1474   :  { %v2958_v23 = vadd.f32 %v7506_v59, %v2863_v9  ;;  %v2952_v60 = vpop.f32.mrb[29].mxu1 }
0x1475   :  { %v2953_v13 = vadd.f32 %v2952_v60, %v2863_v9 }
0x1476   :  { %v9644_v40 = vadd.f32 %v2964_v43, %v2958_v23  ;;  %2990 = vadd.xlane.f32.xlu0 %v2989_v39  ;;  %v3032_v23 = vrot.slane %v9618_v25, %v9111_v42  ;;  %v3040_v39 = vrot.slane %v9618_v25, %v9160_v49 }
0x1477   :  { %v9651_v46 = vadd.f32 %v2963_v44, %v2953_v13 }
0x1478   :  { %v2978_v45 = vsel %vm140_vm1, %v9644_v40, 0.0  ;;  %v2988_v1 = vmul.f32 %v9644_v40, %v9644_v40 }
0x1479   :  { %2979 = vadd.xlane.f32.xlu1 %v2978_v45  ;;  %v2975_v62 = vsel %vm140_vm1, %v9651_v46, 0.0  ;;  %v2987_v14 = vmul.f32 %v9651_v46, %v9651_v46 }
0x147a   :  { %2993 = vadd.xlane.f32.xlu0 %v2992_v12  ;;  %v2998_v47 = vsel %vm140_vm1, %v2988_v1, 0.0 }
0x147b   :  { %v2995_v48 = vsel %vm140_vm1, %v2987_v14, 0.0 }
0x147d   :  { %2999 = vadd.xlane.f32.xlu1 %v2998_v47 }
0x147e   :  { %2976 = vadd.xlane.f32.xlu0 %v2975_v62 }
0x1482   :  { %2996 = vadd.xlane.f32.xlu0 %v2995_v48 }
0x14fe   :  { %v2974_v0 = vpop.xlane.xlu1 %2973 }
0x14ff   :  { %v2971_v34 = vpop.xlane.xlu0 %2970  ;;  %v2982_v2 = vmul.f32 0.03125, %v2974_v0  ;;  %v3179_v0 = vld [vmem:[%s10571_s1 + $0x100] sm:$0xff] }
0x1500   :  { %v2981_v58 = vmul.f32 0.03125, %v2971_v34 }
0x1501   :  { %v3006_v22 = vmul.f32 %v2982_v2, %v2982_v2  ;;  %v3014_v10 = vsub.f32 %v9630_v36, %v2982_v2 }
0x1502   :  { %v3005_v61 = vmul.f32 %v2981_v58, %v2981_v58  ;;  %v3013_v59 = vsub.f32 %v9632_v37, %v2981_v58 }
0x1503   :  { %v2991_v33 = vpop.xlane.xlu0 %2990 }
0x1504   :  { %v3001_v7 = vmul.f32 0.03125, %v2991_v33  ;;  %v3180_v33 = vld [vmem:[%s10571_s1 + $0x108] sm:$0xff] }
0x1505   :  { %v8071_v2 = vpack.c.bf16 %v3180_v33, %v3179_v0 }
0x1506   :  { %v3009_v53 = vsub.f32 %v3001_v7, %v3005_v61  ;;  %v2980_v8 = vpop.xlane.xlu1 %2979  ;;  %v3181_v61 = vld [vmem:[%s10571_s1 + $0x110] sm:$0xff]  ;;  %v3182_v7 = vld [vmem:[%s10571_s1 + $0x118] sm:$0xff] }
0x1507   :  { %v2984_v15 = vmul.f32 0.03125, %v2980_v8  ;;  %v2994_v17 = vpop.xlane.xlu0 %2993  ;;  %8072 = vmatprep.subr.bf16.mxu1 %v8071_v2  ;;  %v3183_v8 = vld [vmem:[%s10571_s1 + $0x120] sm:$0xff] }
0x1508   :  { %v3017_v24 = vadd.f32 1e-05, %v3009_v53  ;;  %v3002_v4 = vmul.f32 0.03125, %v2994_v17  ;;  %v8075_v53 = vpack.c.bf16 %v3182_v7, %v3181_v61 }
0x1509   :  { %v3008_v28 = vmul.f32 %v2984_v15, %v2984_v15  ;;  %v3016_v14 = vsub.f32 %v9644_v40, %v2984_v15  ;;  %v3184_v15 = vld [vmem:[%s10571_s1 + $0x128] sm:$0xff] }
0x150a   :  { %8663 = vrsqrt.f32 %v3017_v24  ;;  %v3010_v52 = vsub.f32 %v3002_v4, %v3006_v22  ;;  %v3000_v5 = vpop.xlane.xlu1 %2999  ;;  %v8079_v17 = vpack.c.bf16 %v3184_v15, %v3183_v8  ;;  %v3185_v22 = vld [vmem:[%s10571_s1 + $0x130] sm:$0xff]  ;;  %v3186_v24 = vld [vmem:[%s10571_s1 + $0x138] sm:$0xff] }
0x150b   :  { %v3004_v9 = vmul.f32 0.03125, %v3000_v5  ;;  %v2977_v3 = vpop.xlane.xlu0 %2976  ;;  %v8083_v4 = vpack.c.bf16 %v3186_v24, %v3185_v22  ;;  %v3188_v5 = vld [vmem:[%s10571_s1 + $0x148] sm:$0xff]  ;;  %v3198_v22 = vrot.slane %v9618_v25, %v9163_v54 }
0x150c   :  { %v3018_v27 = vadd.f32 1e-05, %v3010_v52  ;;  %v2983_v29 = vmul.f32 0.03125, %v2977_v3  ;;  %v3187_v52 = vld [vmem:[%s10571_s1 + $0x140] sm:$0xff]  ;;  %v3190_v3 = vld [vmem:[%s10571_s1 + $0x158] sm:$0xff] }
0x150d   :  { %v3012_v30 = vsub.f32 %v3004_v9, %v3008_v28  ;;  %v8087_v28 = vpack.c.bf16 %v3188_v5, %v3187_v52  ;;  %v3189_v9 = vld [vmem:[%s10571_s1 + $0x150] sm:$0xff] }
0x150e   :  { %8665 = vrsqrt.f32 %v3018_v27  ;;  %v3007_v16 = vmul.f32 %v2983_v29, %v2983_v29  ;;  %v3015_v51 = vsub.f32 %v9651_v46, %v2983_v29  ;;  %v8091_v27 = vpack.c.bf16 %v3190_v3, %v3189_v9  ;;  %v3191_v29 = vld [vmem:[%s10571_s1 + $0x160] sm:$0xff] }
0x150f   :  { %v3020_v35 = vadd.f32 1e-05, %v3012_v30  ;;  %v2997_v18 = vpop.xlane.xlu0 %2996  ;;  %v3192_v30 = vld [vmem:[%s10571_s1 + $0x168] sm:$0xff]  ;;  %v3284_v3 = vmul.f32 1.5, %v9632_v37 }
0x1510   :  { %v3003_v38 = vmul.f32 0.03125, %v2997_v18  ;;  %v3193_v18 = vld [vmem:[%s10571_s1 + $0x170] sm:$0xff] }
0x1511   :  { %8667 = vrsqrt.f32 %v3020_v35  ;;  %v8095_v35 = vpack.c.bf16 %v3192_v30, %v3191_v29 }
0x1512   :  { %v3011_v41 = vsub.f32 %v3003_v38, %v3007_v16  ;;  %v3194_v16 = vld [vmem:[%s10571_s1 + $0x178] sm:$0xff] }
0x1513   :  { %v8099_v38 = vpack.c.bf16 %v3194_v16, %v3193_v18 }
0x1514   :  { %v8664_v43 = vpop.eup %8663  ;;  %v3019_v60 = vadd.f32 1e-05, %v3011_v41  ;;  %v6851_v41 = vld [vmem:[%s10572_s2 + $0x48] ss:$0 sm:$0xff] }
0x1515   :  { %v3025_v13 = vmul.f32 %v8664_v43, %v3013_v59 }
0x1516   :  { %8669 = vrsqrt.f32 %v3019_v60 }
0x1517   :  { %v3033_v44 = vmul.f32 %v3032_v23, %v3025_v13 }
0x1518   :  { %v8666_v45 = vpop.eup %8665 }
0x1519   :  { %v3026_v1 = vmul.f32 %v8666_v45, %v3014_v10  ;;  %v3041_v12 = vadd.f32 %v3040_v39, %v3033_v44 }
0x151b   :  { %v8668_v47 = vpop.eup %8667  ;;  %7515 = vmatprep.mubr.msk.f32.mxu1 %vm140_vm1, %v3041_v12  ;;  %v3034_v62 = vmul.f32 %v3032_v23, %v3026_v1 }
0x151c   :  { %v3028_v50 = vmul.f32 %v8668_v47, %v3016_v14 }
0x151d   :  { %v3042_v48 = vadd.f32 %v3040_v39, %v3034_v62 }
0x151e   :  { %v3036_v32 = vmul.f32 %v3032_v23, %v3028_v50 }
0x151f   :  { %7516 = vmatmul.mubr.msk.f32.vlgmr.msra.gmra.mrb[30].mxu1 %vm140_vm1, %v3042_v48 }
0x1520   :  { %v8670_v55 = vpop.eup %8669  ;;  %v3044_v58 = vadd.f32 %v3040_v39, %v3036_v32  ;;  %8074 = vmatpush3.bf16.msra.mxu1 %v8071_v2 }
0x1521   :  { %v3027_v20 = vmul.f32 %v8670_v55, %v3015_v51  ;;  %8076 = vmatprep.subr.bf16.mxu1 %v8075_v53 }
0x1523   :  { %v3035_v19 = vmul.f32 %v3032_v23, %v3027_v20 }
0x1524   :  { %8078 = vmatpush3.bf16.msra.mxu1 %v8075_v53 }
0x1525   :  { %v3043_v34 = vadd.f32 %v3040_v39, %v3035_v19  ;;  %8080 = vmatprep.subr.bf16.mxu1 %v8079_v17 }
0x1527   :  { %7518 = vmatprep.mubr.msk.f32.mxu1 %vm140_vm1, %v3043_v34 }
0x1528   :  { %7519 = vmatmul.mubr.msk.f32.gmra.mrb[32].mxu1 %vm140_vm1, %v3044_v58 }
0x1529   :  { %8082 = vmatpush3.bf16.msra.mxu1 %v8079_v17 }
0x152a   :  { %8084 = vmatprep.subr.bf16.mxu1 %v8083_v4 }
0x152d   :  { %8086 = vmatpush3.bf16.msra.mxu1 %v8083_v4 }
0x152e   :  { %8088 = vmatprep.subr.bf16.mxu1 %v8087_v28 }
0x1531   :  { %8090 = vmatpush3.bf16.msra.mxu1 %v8087_v28  ;;  %v3285_v28 = vmul.f32 1.5, %v9630_v36 }
0x1532   :  { %8092 = vmatprep.subr.bf16.mxu1 %v8091_v27 }
0x1535   :  { %8094 = vmatpush3.bf16.msra.mxu1 %v8091_v27 }
0x1536   :  { %8096 = vmatprep.subr.bf16.mxu1 %v8095_v35 }
0x1539   :  { %8098 = vmatpush3.bf16.msra.mxu1 %v8095_v35 }
0x153a   :  { %8100 = vmatprep.subr.bf16.mxu1 %v8099_v38 }
0x153d   :  { %8102 = vmatpush3.bf16.msra.mxu1 %v8099_v38 }
0x15f2   :  { %v7517_v59 = vpop.f32.mrb[30].mxu1 }
0x15f3   :  { %v3138_v23 = vadd.f32 %v7517_v59, %v6851_v41  ;;  %v3132_v43 = vpop.f32.mrb[31].mxu1 }
0x15f4   :  { %v3133_v60 = vadd.f32 %v6851_v41, %v3132_v43  ;;  %v3287_v43 = vmul.f32 1.5, %v9644_v40 }
0x15f5   :  { %v3152_v13 = vsub.f32 0.0, %v3138_v23 }
0x15f6   :  { %v3151_v39 = vsub.f32 0.0, %v3133_v60 }
0x15f7   :  { %v3157_v10 = vmul.f32 1.442695, %v3152_v13 }
0x15f8   :  { %v3155_v44 = vmul.f32 1.442695, %v3151_v39  ;;  %v3286_v39 = vmul.f32 1.5, %v9651_v46 }
0x15f9   :  { %8671 = vpow2.f32 %v3157_v10 }
0x15fa   :  { %8673 = vpow2.f32 %v3155_v44 }
0x15fb   :  { %v7520_v45 = vpop.f32.mrb[32].mxu1 }
0x15fc   :  { %v3148_v1 = vadd.f32 %v7520_v45, %v6851_v41  ;;  %v3142_v12 = vpop.f32.mrb[33].mxu1 }
0x15fd   :  { %v3143_v47 = vadd.f32 %v6851_v41, %v3142_v12 }
0x15fe   :  { %v3154_v62 = vsub.f32 0.0, %v3148_v1 }
0x15ff   :  { %v3153_v14 = vsub.f32 0.0, %v3143_v47 }
0x1600   :  { %v3161_v48 = vmul.f32 1.442695, %v3154_v62 }
0x1601   :  { %v3159_v50 = vmul.f32 1.442695, %v3153_v14 }
0x1602   :  { %8675 = vpow2.f32 %v3161_v48 }
0x1603   :  { %v8672_v51 = vpop.eup %8671  ;;  %8677 = vpow2.f32 %v3159_v50 }
0x1604   :  { %v8674_v55 = vpop.eup %8673  ;;  %v3164_v20 = vadd.f32 1.0, %v8672_v51 }
0x1605   :  { %v3163_v32 = vadd.f32 1.0, %v8674_v55 }
0x1606   :  { %8679 = vrcp.f32 %v3164_v20 }
0x1607   :  { %8681 = vrcp.f32 %v3163_v32 }
0x160c   :  { %v8676_v19 = vpop.eup %8675 }
0x160d   :  { %v8678_v34 = vpop.eup %8677  ;;  %v3166_v58 = vadd.f32 1.0, %v8676_v19 }
0x160e   :  { %v3165_v0 = vadd.f32 1.0, %v8678_v34 }
0x160f   :  { %8683 = vrcp.f32 %v3166_v58 }
0x1610   :  { %v8680_v33 = vpop.eup %8679  ;;  %8685 = vrcp.f32 %v3165_v0 }
0x1611   :  { %v8682_v2 = vpop.eup %8681  ;;  %v3176_v7 = vmul.f32 %v8680_v33, %v3138_v23 }
0x1612   :  { %v3175_v61 = vmul.f32 %v8682_v2, %v3133_v60 }
0x1614   :  { %7553 = vmatprep.mubr.f32.mxu1 %v3175_v61 }
0x1615   :  { %7554 = vmatmul.mubr.f32.vlgmr.msra.gmra.mrb[34].mxu1 %v3176_v7 }
0x1619   :  { %v8684_v53 = vpop.eup %8683 }
0x161a   :  { %v8686_v8 = vpop.eup %8685  ;;  %v3178_v17 = vmul.f32 %v8684_v53, %v3148_v1 }
0x161b   :  { %v3177_v15 = vmul.f32 %v8686_v8, %v3143_v47 }
0x161d   :  { %7556 = vmatprep.mubr.f32.mxu1 %v3177_v15 }
0x161e   :  { %7557 = vmatmul.mubr.f32.gmra.mrb[36].mxu1 %v3178_v17 }
0x16e8   :  { %v7555_v24 = vpop.f32.mrb[34].mxu1 }
0x16e9   :  { %v3271_v4 = vadd.f32 %v7555_v24, %v3198_v22  ;;  %v3265_v52 = vpop.f32.mrb[35].mxu1 }
0x16ea   :  { %v3266_v5 = vadd.f32 %v3265_v52, %v3198_v22 }
0x16eb   :  { %v3289_v9 = vmul.f32 0.5, %v3271_v4 }
0x16ec   :  { %v3288_v27 = vmul.f32 0.5, %v3266_v5 }
0x16ed   :  { %v9739_v29 = vadd.f32 %v3289_v9, %v3285_v28 }
0x16ee   :  { %v9741_v30 = vadd.f32 %v3288_v27, %v3284_v3 }
0x16ef   :  { %v3299_v35 = vsel %vm140_vm1, %v9739_v29, 0.0  ;;  %v3313_v18 = vmul.f32 %v9739_v29, %v9739_v29 }
0x16f0   :  { %3300 = vadd.xlane.f32.xlu1 %v3299_v35  ;;  %v3296_v16 = vsel %vm140_vm1, %v9741_v30, 0.0  ;;  %v3312_v36 = vmul.f32 %v9741_v30, %v9741_v30 }
0x16f1   :  { %3297 = vadd.xlane.f32.xlu0 %v3296_v16  ;;  %v7558_v37 = vpop.f32.mrb[36].mxu1  ;;  %v3319_v23 = vsel %vm140_vm1, %v3313_v18, 0.0  ;;  %v3359_v18 = vrot.slane %v9618_v25, %v9429_v26 }
0x16f2   :  { %v3281_v38 = vadd.f32 %v7558_v37, %v3198_v22  ;;  %v3275_v41 = vpop.f32.mrb[37].mxu1  ;;  %v3316_v13 = vsel %vm140_vm1, %v3312_v36, 0.0 }
0x16f3   :  { %v3276_v59 = vadd.f32 %v3275_v41, %v3198_v22  ;;  %v3367_v41 = vrot.slane %v9618_v25, %v9483_v57 }
0x16f4   :  { %v3291_v60 = vmul.f32 0.5, %v3281_v38  ;;  %3320 = vadd.xlane.f32.xlu1 %v3319_v23 }
0x16f5   :  { %v3290_v10 = vmul.f32 0.5, %v3276_v59  ;;  %3317 = vadd.xlane.f32.xlu0 %v3316_v13 }
0x16f6   :  { %v9755_v44 = vadd.f32 %v3291_v60, %v3287_v43 }
0x16f7   :  { %v9757_v45 = vadd.f32 %v3290_v10, %v3286_v39 }
0x16f8   :  { %v3305_v1 = vsel %vm140_vm1, %v9755_v44, 0.0  ;;  %v3315_v12 = vmul.f32 %v9755_v44, %v9755_v44 }
0x16f9   :  { %3306 = vadd.xlane.f32.xlu1 %v3305_v1  ;;  %v3302_v40 = vsel %vm140_vm1, %v9757_v45, 0.0  ;;  %v3314_v47 = vmul.f32 %v9757_v45, %v9757_v45 }
0x16fa   :  { %3303 = vadd.xlane.f32.xlu0 %v3302_v40  ;;  %v3325_v46 = vsel %vm140_vm1, %v3315_v12, 0.0 }
0x16fb   :  { %v3322_v62 = vsel %vm140_vm1, %v3314_v47, 0.0 }
0x16fd   :  { %3326 = vadd.xlane.f32.xlu1 %v3325_v46 }
0x16fe   :  { %3323 = vadd.xlane.f32.xlu0 %v3322_v62 }
0x177d   :  { %v3301_v14 = vpop.xlane.xlu1 %3300 }
0x177e   :  { %v3309_v48 = vmul.f32 0.03125, %v3301_v14  ;;  %v3298_v50 = vpop.xlane.xlu0 %3297 }
0x177f   :  { %v3308_v51 = vmul.f32 0.03125, %v3298_v50 }
0x1780   :  { %v3333_v20 = vmul.f32 %v3309_v48, %v3309_v48  ;;  %v3341_v35 = vsub.f32 %v9739_v29, %v3309_v48 }
0x1781   :  { %v3321_v55 = vpop.xlane.xlu1 %3320  ;;  %v3332_v34 = vmul.f32 %v3308_v51, %v3308_v51  ;;  %v3340_v36 = vsub.f32 %v9741_v30, %v3308_v51 }
0x1782   :  { %v3329_v32 = vmul.f32 0.03125, %v3321_v55  ;;  %v3318_v19 = vpop.xlane.xlu0 %3317 }
0x1783   :  { %v3328_v58 = vmul.f32 0.03125, %v3318_v19 }
0x1784   :  { %v3337_v0 = vsub.f32 %v3329_v32, %v3333_v20 }
0x1785   :  { %v3336_v33 = vsub.f32 %v3328_v58, %v3332_v34  ;;  %v3450_v58 = vld [vmem:[%s10572_s2 + $0x50] sm:$0xff] }
0x1786   :  { %v3345_v2 = vadd.f32 1e-05, %v3337_v0  ;;  %v3307_v61 = vpop.xlane.xlu1 %3306  ;;  %v3451_v0 = vld [vmem:[%s10572_s2 + $0x58] sm:$0xff] }
0x1787   :  { %v3344_v7 = vadd.f32 1e-05, %v3336_v33  ;;  %v3311_v53 = vmul.f32 0.03125, %v3307_v61  ;;  %v3304_v8 = vpop.xlane.xlu0 %3303  ;;  %v3452_v33 = vld [vmem:[%s10572_s2 + $0x60] sm:$0xff]  ;;  %v3453_v61 = vld [vmem:[%s10572_s2 + $0x68] sm:$0xff] }
0x1788   :  { %8687 = vrsqrt.f32 %v3345_v2  ;;  %v3310_v15 = vmul.f32 0.03125, %v3304_v8  ;;  %v8103_v2 = vpack.c.bf16 %v3451_v0, %v3450_v58 }
0x1789   :  { %8689 = vrsqrt.f32 %v3344_v7  ;;  %v3335_v22 = vmul.f32 %v3311_v53, %v3311_v53  ;;  %v3343_v30 = vsub.f32 %v9755_v44, %v3311_v53  ;;  %v8107_v7 = vpack.c.bf16 %v3453_v61, %v3452_v33 }
0x178a   :  { %v3327_v17 = vpop.xlane.xlu1 %3326  ;;  %v3334_v52 = vmul.f32 %v3310_v15, %v3310_v15  ;;  %v3342_v12 = vsub.f32 %v9757_v45, %v3310_v15  ;;  %8104 = vmatprep.subr.bf16.mxu1 %v8103_v2 }
0x178b   :  { %v3331_v24 = vmul.f32 0.03125, %v3327_v17  ;;  %v3324_v4 = vpop.xlane.xlu0 %3323  ;;  %8106 = vmatpush3.bf16.msra.mxu1 %v8103_v2 }
0x178c   :  { %v3330_v5 = vmul.f32 0.03125, %v3324_v4  ;;  %8108 = vmatprep.subr.bf16.mxu1 %v8107_v7 }
0x178d   :  { %v3339_v28 = vsub.f32 %v3331_v24, %v3335_v22 }
0x178e   :  { %v3338_v9 = vsub.f32 %v3330_v5, %v3334_v52 }
0x178f   :  { %v3347_v3 = vadd.f32 1e-05, %v3339_v28  ;;  %8110 = vmatpush3.bf16.msra.mxu1 %v8107_v7 }
0x1790   :  { %v3346_v27 = vadd.f32 1e-05, %v3338_v9 }
0x1791   :  { %8691 = vrsqrt.f32 %v3347_v3 }
0x1792   :  { %v8688_v16 = vpop.eup %8687  ;;  %8693 = vrsqrt.f32 %v3346_v27 }
0x1793   :  { %v8690_v37 = vpop.eup %8689  ;;  %v3353_v38 = vmul.f32 %v8688_v16, %v3341_v35 }
0x1794   :  { %v3352_v59 = vmul.f32 %v8690_v37, %v3340_v36 }
0x1795   :  { %v3361_v23 = vmul.f32 %v3359_v18, %v3353_v38 }
0x1796   :  { %v3360_v43 = vmul.f32 %v3359_v18, %v3352_v59 }
0x1797   :  { %v9775_v60 = vadd.f32 %v3367_v41, %v3361_v23 }
0x1798   :  { %v9777_v13 = vadd.f32 %v3367_v41, %v3360_v43 }
0x1799   :  { %v3377_v29 = vsel %vm140_vm1, %v9775_v60, 0.0  ;;  %v3391_v39 = vmul.f32 %v9775_v60, %v9775_v60 }
0x179a   :  { %3378 = vadd.xlane.f32.xlu1 %v3377_v29  ;;  %v3374_v10 = vsel %vm140_vm1, %v9777_v13, 0.0  ;;  %v3390_v25 = vmul.f32 %v9777_v13, %v9777_v13 }
0x179b   :  { %v8692_v1 = vpop.eup %8691  ;;  %3375 = vadd.xlane.f32.xlu0 %v3374_v10  ;;  %v3397_v46 = vsel %vm140_vm1, %v3391_v39, 0.0  ;;  %v9820_v10 = vld [vmem:[%s10571_s1 + $0x70] sm:$0xff] }
0x179c   :  { %v8694_v40 = vpop.eup %8693  ;;  %v3355_v47 = vmul.f32 %v8692_v1, %v3343_v30  ;;  %v3394_v14 = vsel %vm140_vm1, %v3390_v25, 0.0 }
0x179d   :  { %v3354_v62 = vmul.f32 %v8694_v40, %v3342_v12  ;;  %v3437_v40 = vrot.slane %v9820_v10, %v9037_v6 }
0x179e   :  { %3398 = vadd.xlane.f32.xlu1 %v3397_v46  ;;  %v3363_v44 = vmul.f32 %v3359_v18, %v3355_v47 }
0x179f   :  { %3395 = vadd.xlane.f32.xlu0 %v3394_v14  ;;  %v3362_v48 = vmul.f32 %v3359_v18, %v3354_v62 }
0x17a0   :  { %v9791_v50 = vadd.f32 %v3367_v41, %v3363_v44 }
0x17a1   :  { %v9793_v51 = vadd.f32 %v3367_v41, %v3362_v48  ;;  %v3445_v48 = vrot.slane %v9820_v10, %v9045_v11 }
0x17a2   :  { %v3383_v55 = vsel %vm140_vm1, %v9791_v50, 0.0  ;;  %v3393_v45 = vmul.f32 %v9791_v50, %v9791_v50 }
0x17a3   :  { %3384 = vadd.xlane.f32.xlu1 %v3383_v55  ;;  %v3380_v20 = vsel %vm140_vm1, %v9793_v51, 0.0  ;;  %v3392_v32 = vmul.f32 %v9793_v51, %v9793_v51 }
0x17a4   :  { %3381 = vadd.xlane.f32.xlu0 %v3380_v20  ;;  %v3403_v19 = vsel %vm140_vm1, %v3393_v45, 0.0 }
0x17a5   :  { %v3400_v34 = vsel %vm140_vm1, %v3392_v32, 0.0 }
0x17a7   :  { %3404 = vadd.xlane.f32.xlu1 %v3403_v19 }
0x17a8   :  { %3401 = vadd.xlane.f32.xlu0 %v3400_v34 }
0x1827   :  { %v3379_v53 = vpop.xlane.xlu1 %3378 }
0x1828   :  { %v3387_v8 = vmul.f32 0.03125, %v3379_v53  ;;  %v3376_v15 = vpop.xlane.xlu0 %3375 }
0x1829   :  { %v3386_v17 = vmul.f32 0.03125, %v3376_v15  ;;  %v3584_v15 = vld [vmem:[%s10571_s1 + $0x180] sm:$0xff] }
0x182a   :  { %v3411_v24 = vmul.f32 %v3387_v8, %v3387_v8  ;;  %v3419_v12 = vsub.f32 %v9775_v60, %v3387_v8 }
0x182b   :  { %v3399_v22 = vpop.xlane.xlu1 %3398  ;;  %v3410_v5 = vmul.f32 %v3386_v17, %v3386_v17  ;;  %v3418_v46 = vsub.f32 %v9777_v13, %v3386_v17  ;;  %v3585_v17 = vld [vmem:[%s10571_s1 + $0x188] sm:$0xff] }
0x182c   :  { %v3407_v4 = vmul.f32 0.03125, %v3399_v22  ;;  %v3396_v52 = vpop.xlane.xlu0 %3395  ;;  %v8111_v22 = vpack.c.bf16 %v3585_v17, %v3584_v15 }
0x182d   :  { %v3406_v28 = vmul.f32 0.03125, %v3396_v52 }
0x182e   :  { %v3415_v9 = vsub.f32 %v3407_v4, %v3411_v24  ;;  %8112 = vmatprep.subr.bf16.mxu0 %v8111_v22  ;;  %v3586_v24 = vld [vmem:[%s10571_s1 + $0x190] sm:$0xff]  ;;  %v3587_v4 = vld [vmem:[%s10571_s1 + $0x198] sm:$0xff] }
0x182f   :  { %v3414_v3 = vsub.f32 %v3406_v28, %v3410_v5  ;;  %8114 = vmatpush3.bf16.msra.mxu0 %v8111_v22  ;;  %v8115_v52 = vpack.c.bf16 %v3587_v4, %v3586_v24  ;;  %v3588_v5 = vld [vmem:[%s10571_s1 + $0x1a0] sm:$0xff]  ;;  %v3589_v28 = vld [vmem:[%s10571_s1 + $0x1a8] sm:$0xff] }
0x1830   :  { %v3423_v27 = vadd.f32 1e-05, %v3415_v9  ;;  %v3385_v35 = vpop.xlane.xlu1 %3384  ;;  %v8119_v9 = vpack.c.bf16 %v3589_v28, %v3588_v5 }
0x1831   :  { %v3422_v18 = vadd.f32 1e-05, %v3414_v3  ;;  %v3389_v16 = vmul.f32 0.03125, %v3385_v35  ;;  %v3382_v36 = vpop.xlane.xlu0 %3381  ;;  %8116 = vmatprep.subr.bf16.mxu0 %v8115_v52  ;;  %v3590_v3 = vld [vmem:[%s10571_s1 + $0x1b0] sm:$0xff] }
0x1832   :  { %8695 = vrsqrt.f32 %v3423_v27  ;;  %v3388_v37 = vmul.f32 0.03125, %v3382_v36  ;;  %v3591_v27 = vld [vmem:[%s10571_s1 + $0x1b8] sm:$0xff] }
0x1833   :  { %8697 = vrsqrt.f32 %v3422_v18  ;;  %v3413_v41 = vmul.f32 %v3389_v16, %v3389_v16  ;;  %v3421_v19 = vsub.f32 %v9791_v50, %v3389_v16  ;;  %8118 = vmatpush3.bf16.msra.mxu0 %v8115_v52  ;;  %v8123_v35 = vpack.c.bf16 %v3591_v27, %v3590_v3  ;;  %v3592_v18 = vld [vmem:[%s10571_s1 + $0x1c0] sm:$0xff]  ;;  %v3593_v16 = vld [vmem:[%s10571_s1 + $0x1c8] sm:$0xff] }
0x1834   :  { %v3405_v38 = vpop.xlane.xlu1 %3404  ;;  %v3412_v43 = vmul.f32 %v3388_v37, %v3388_v37  ;;  %v3420_v58 = vsub.f32 %v9793_v51, %v3388_v37  ;;  %8120 = vmatprep.subr.bf16.mxu0 %v8119_v9  ;;  %v8127_v36 = vpack.c.bf16 %v3593_v16, %v3592_v18  ;;  %v3594_v37 = vld [vmem:[%s10571_s1 + $0x1d0] sm:$0xff]  ;;  %v3603_v3 = vrot.slane %v9820_v10, %v9111_v42 }
0x1835   :  { %v3409_v59 = vmul.f32 0.03125, %v3405_v38  ;;  %v3402_v23 = vpop.xlane.xlu0 %3401  ;;  %v3595_v38 = vld [vmem:[%s10571_s1 + $0x1d8] sm:$0xff] }
0x1836   :  { %v3408_v29 = vmul.f32 0.03125, %v3402_v23  ;;  %v3597_v23 = vld [vmem:[%s10571_s1 + $0x1e8] sm:$0xff] }
0x1837   :  { %v3417_v39 = vsub.f32 %v3409_v59, %v3413_v41  ;;  %8122 = vmatpush3.bf16.msra.mxu0 %v8119_v9  ;;  %v8131_v41 = vpack.c.bf16 %v3595_v38, %v3594_v37  ;;  %v3596_v59 = vld [vmem:[%s10571_s1 + $0x1e0] sm:$0xff]  ;;  %v3689_v38 = vmul.f32 1.5, %v9777_v13 }
0x1838   :  { %v3416_v30 = vsub.f32 %v3408_v29, %v3412_v43  ;;  %8124 = vmatprep.subr.bf16.mxu0 %v8123_v35  ;;  %v8135_v43 = vpack.c.bf16 %v3597_v23, %v3596_v59  ;;  %v3598_v29 = vld [vmem:[%s10571_s1 + $0x1f0] sm:$0xff] }
0x1839   :  { %v3425_v25 = vadd.f32 1e-05, %v3417_v39  ;;  %v3599_v39 = vld [vmem:[%s10571_s1 + $0x1f8] sm:$0xff] }
0x183a   :  { %v3424_v1 = vadd.f32 1e-05, %v3416_v30  ;;  %v8139_v30 = vpack.c.bf16 %v3599_v39, %v3598_v29 }
0x183b   :  { %8699 = vrsqrt.f32 %v3425_v25  ;;  %8126 = vmatpush3.bf16.msra.mxu0 %v8123_v35  ;;  %v6856_v25 = vld [vmem:[%s10572_s2 + $0x70] ss:$0 sm:$0xff] }
0x183c   :  { %v8696_v47 = vpop.eup %8695  ;;  %8701 = vrsqrt.f32 %v3424_v1  ;;  %8128 = vmatprep.subr.bf16.mxu0 %v8127_v36 }
0x183d   :  { %v8698_v62 = vpop.eup %8697  ;;  %v3431_v14 = vmul.f32 %v8696_v47, %v3419_v12 }
0x183e   :  { %v3430_v44 = vmul.f32 %v8698_v62, %v3418_v46 }
0x183f   :  { %v3439_v55 = vmul.f32 %v3437_v40, %v3431_v14  ;;  %8130 = vmatpush3.bf16.msra.mxu0 %v8127_v36  ;;  %v3690_v36 = vmul.f32 1.5, %v9775_v60 }
0x1840   :  { %v3438_v45 = vmul.f32 %v3437_v40, %v3430_v44  ;;  %8132 = vmatprep.subr.bf16.mxu0 %v8131_v41 }
0x1841   :  { %v3447_v32 = vadd.f32 %v3445_v48, %v3439_v55 }
0x1842   :  { %v3446_v20 = vadd.f32 %v3445_v48, %v3438_v45 }
0x1843   :  { %8134 = vmatpush3.bf16.msra.mxu0 %v8131_v41 }
0x1844   :  { %7567 = vmatprep.mubr.msk.f32.mxu1 %vm140_vm1, %v3446_v20  ;;  %8136 = vmatprep.subr.bf16.mxu0 %v8135_v43 }
0x1845   :  { %v8700_v34 = vpop.eup %8699  ;;  %7568 = vmatmul.mubr.msk.f32.vlgmr.msra.gmra.mrb[38].mxu1 %vm140_vm1, %v3447_v32 }
0x1846   :  { %v8702_v0 = vpop.eup %8701  ;;  %v3433_v33 = vmul.f32 %v8700_v34, %v3421_v19 }
0x1847   :  { %v3432_v2 = vmul.f32 %v8702_v0, %v3420_v58  ;;  %8138 = vmatpush3.bf16.msra.mxu0 %v8135_v43 }
0x1848   :  { %v3441_v61 = vmul.f32 %v3437_v40, %v3433_v33  ;;  %8140 = vmatprep.subr.bf16.mxu0 %v8139_v30 }
0x1849   :  { %v3440_v7 = vmul.f32 %v3437_v40, %v3432_v2 }
0x184a   :  { %v3449_v8 = vadd.f32 %v3445_v48, %v3441_v61 }
0x184b   :  { %v3448_v53 = vadd.f32 %v3445_v48, %v3440_v7  ;;  %8142 = vmatpush3.bf16.msra.mxu0 %v8139_v30 }
0x184d   :  { %7570 = vmatprep.mubr.msk.f32.mxu1 %vm140_vm1, %v3448_v53 }
0x184e   :  { %7571 = vmatmul.mubr.msk.f32.gmra.mrb[40].mxu1 %vm140_vm1, %v3449_v8 }
0x1918   :  { %v7569_v1 = vpop.f32.mrb[38].mxu1 }
0x1919   :  { %v3543_v12 = vadd.f32 %v7569_v1, %v6856_v25  ;;  %v3537_v40 = vpop.f32.mrb[39].mxu1 }
0x191a   :  { %v3538_v47 = vadd.f32 %v6856_v25, %v3537_v40  ;;  %v3692_v40 = vmul.f32 1.5, %v9791_v50 }
0x191b   :  { %v3557_v46 = vsub.f32 0.0, %v3543_v12 }
0x191c   :  { %v3556_v62 = vsub.f32 0.0, %v3538_v47 }
0x191d   :  { %v3562_v14 = vmul.f32 1.442695, %v3557_v46 }
0x191e   :  { %v3560_v44 = vmul.f32 1.442695, %v3556_v62  ;;  %v3691_v62 = vmul.f32 1.5, %v9793_v51 }
0x191f   :  { %8703 = vpow2.f32 %v3562_v14 }
0x1920   :  { %8705 = vpow2.f32 %v3560_v44 }
0x1921   :  { %v7572_v48 = vpop.f32.mrb[40].mxu1 }
0x1922   :  { %v3553_v55 = vadd.f32 %v7572_v48, %v6856_v25  ;;  %v3547_v45 = vpop.f32.mrb[41].mxu1 }
0x1923   :  { %v3548_v20 = vadd.f32 %v6856_v25, %v3547_v45 }
0x1924   :  { %v3559_v32 = vsub.f32 0.0, %v3553_v55 }
0x1925   :  { %v3558_v19 = vsub.f32 0.0, %v3548_v20 }
0x1926   :  { %v3566_v34 = vmul.f32 1.442695, %v3559_v32 }
0x1927   :  { %v3564_v58 = vmul.f32 1.442695, %v3558_v19  ;;  %v3777_v19 = vld [vmem:[%s10573_s3 + $0x28] sm:$0xff] }
0x1928   :  { %8707 = vpow2.f32 %v3566_v34  ;;  %v3778_v34 = vld [vmem:[%s10573_s3 + $0x30] sm:$0xff] }
0x1929   :  { %v8704_v0 = vpop.eup %8703  ;;  %8709 = vpow2.f32 %v3564_v58  ;;  %v3779_v58 = vld [vmem:[%s10573_s3 + $0x38] sm:$0xff] }
0x192a   :  { %v8706_v33 = vpop.eup %8705  ;;  %v3569_v2 = vadd.f32 1.0, %v8704_v0  ;;  %v8143_v0 = vpack.c.bf16 %v3778_v34, %v3777_v19 }
0x192b   :  { %v3568_v61 = vadd.f32 1.0, %v8706_v33  ;;  %v3780_v33 = vld [vmem:[%s10573_s3 + $0x40] sm:$0xff] }
0x192c   :  { %8711 = vrcp.f32 %v3569_v2  ;;  %v8147_v2 = vpack.c.bf16 %v3780_v33, %v3779_v58  ;;  %8144 = vmatprep.subr.bf16.mxu1 %v8143_v0 }
0x192d   :  { %8713 = vrcp.f32 %v3568_v61  ;;  %8146 = vmatpush3.bf16.msra.mxu1 %v8143_v0 }
0x192e   :  { %8148 = vmatprep.subr.bf16.mxu1 %v8147_v2 }
0x1931   :  { %8150 = vmatpush3.bf16.msra.mxu1 %v8147_v2 }
0x1932   :  { %v8708_v7 = vpop.eup %8707 }
0x1933   :  { %v8710_v53 = vpop.eup %8709  ;;  %v3571_v8 = vadd.f32 1.0, %v8708_v7 }
0x1934   :  { %v3570_v15 = vadd.f32 1.0, %v8710_v53 }
0x1935   :  { %8715 = vrcp.f32 %v3571_v8 }
0x1936   :  { %v8712_v17 = vpop.eup %8711  ;;  %8717 = vrcp.f32 %v3570_v15 }
0x1937   :  { %v8714_v22 = vpop.eup %8713  ;;  %v3581_v4 = vmul.f32 %v8712_v17, %v3543_v12 }
0x1938   :  { %v3580_v24 = vmul.f32 %v8714_v22, %v3538_v47 }
0x193a   :  { %7605 = vmatprep.mubr.f32.mxu0 %v3580_v24 }
0x193b   :  { %7606 = vmatmul.mubr.f32.vlgmr.msra.gmra.mrb[38].mxu0 %v3581_v4 }
0x193f   :  { %v8716_v52 = vpop.eup %8715 }
0x1940   :  { %v8718_v5 = vpop.eup %8717  ;;  %v3583_v9 = vmul.f32 %v8716_v52, %v3553_v55 }
0x1941   :  { %v3582_v28 = vmul.f32 %v8718_v5, %v3548_v20 }
0x1943   :  { %7608 = vmatprep.mubr.f32.mxu0 %v3582_v28 }
0x1944   :  { %7609 = vmatmul.mubr.f32.gmra.mrb[40].mxu0 %v3583_v9 }
0x1a0e   :  { %v7607_v27 = vpop.f32.mrb[38].mxu0 }
0x1a0f   :  { %v3676_v35 = vadd.f32 %v7607_v27, %v3603_v3  ;;  %v3670_v18 = vpop.f32.mrb[39].mxu0 }
0x1a10   :  { %v3671_v16 = vadd.f32 %v3670_v18, %v3603_v3 }
0x1a11   :  { %v3694_v37 = vmul.f32 0.5, %v3676_v35 }
0x1a12   :  { %v3693_v41 = vmul.f32 0.5, %v3671_v16 }
0x1a13   :  { %v9889_v59 = vadd.f32 %v3694_v37, %v3690_v36 }
0x1a14   :  { %v9891_v23 = vadd.f32 %v3693_v41, %v3689_v38 }
0x1a15   :  { %v3704_v43 = vsel %vm140_vm1, %v9889_v59, 0.0  ;;  %v3718_v29 = vmul.f32 %v9889_v59, %v9889_v59 }
0x1a16   :  { %3705 = vadd.xlane.f32.xlu1 %v3704_v43  ;;  %v3701_v39 = vsel %vm140_vm1, %v9891_v23, 0.0  ;;  %v3717_v60 = vmul.f32 %v9891_v23, %v9891_v23 }
0x1a17   :  { %3702 = vadd.xlane.f32.xlu0 %v3701_v39  ;;  %v7610_v13 = vpop.f32.mrb[40].mxu0  ;;  %v3724_v12 = vsel %vm140_vm1, %v3718_v29, 0.0 }
0x1a18   :  { %v3686_v30 = vadd.f32 %v7610_v13, %v3603_v3  ;;  %v3680_v25 = vpop.f32.mrb[41].mxu0  ;;  %v3721_v46 = vsel %vm140_vm1, %v3717_v60, 0.0 }
0x1a19   :  { %v3681_v1 = vadd.f32 %v3680_v25, %v3603_v3 }
0x1a1a   :  { %v3696_v47 = vmul.f32 0.5, %v3686_v30  ;;  %3725 = vadd.xlane.f32.xlu1 %v3724_v12 }
0x1a1b   :  { %v3695_v14 = vmul.f32 0.5, %v3681_v1  ;;  %3722 = vadd.xlane.f32.xlu0 %v3721_v46  ;;  %v3764_v1 = vrot.slane %v9820_v10, %v9160_v49 }
0x1a1c   :  { %v9905_v44 = vadd.f32 %v3696_v47, %v3692_v40 }
0x1a1d   :  { %v9907_v48 = vadd.f32 %v3695_v14, %v3691_v62  ;;  %v3772_v14 = vrot.slane %v9820_v10, %v9163_v54 }
0x1a1e   :  { %v3710_v55 = vsel %vm140_vm1, %v9905_v44, 0.0  ;;  %v3720_v45 = vmul.f32 %v9905_v44, %v9905_v44 }
0x1a1f   :  { %3711 = vadd.xlane.f32.xlu1 %v3710_v55  ;;  %v3707_v50 = vsel %vm140_vm1, %v9907_v48, 0.0  ;;  %v3719_v20 = vmul.f32 %v9907_v48, %v9907_v48 }
0x1a20   :  { %3708 = vadd.xlane.f32.xlu0 %v3707_v50  ;;  %v3730_v51 = vsel %vm140_vm1, %v3720_v45, 0.0 }
0x1a21   :  { %v3727_v32 = vsel %vm140_vm1, %v3719_v20, 0.0 }
0x1a23   :  { %3731 = vadd.xlane.f32.xlu1 %v3730_v51 }
0x1a24   :  { %3728 = vadd.xlane.f32.xlu0 %v3727_v32 }
0x1aa3   :  { %v3706_v61 = vpop.xlane.xlu1 %3705 }
0x1aa4   :  { %v3714_v7 = vmul.f32 0.03125, %v3706_v61  ;;  %v3703_v53 = vpop.xlane.xlu0 %3702 }
0x1aa5   :  { %v3713_v8 = vmul.f32 0.03125, %v3703_v53 }
0x1aa6   :  { %v3738_v17 = vmul.f32 %v3714_v7, %v3714_v7  ;;  %v3746_v25 = vsub.f32 %v9889_v59, %v3714_v7  ;;  %v6861_v7 = vld [vmem:[%s10573_s3 + $0x48] ss:$0 sm:$0xff] }
0x1aa7   :  { %v3726_v15 = vpop.xlane.xlu1 %3725  ;;  %v3737_v4 = vmul.f32 %v3713_v8, %v3713_v8  ;;  %v3745_v40 = vsub.f32 %v9891_v23, %v3713_v8 }
0x1aa8   :  { %v3734_v22 = vmul.f32 0.03125, %v3726_v15  ;;  %v3723_v24 = vpop.xlane.xlu0 %3722 }
0x1aa9   :  { %v3733_v52 = vmul.f32 0.03125, %v3723_v24 }
0x1aaa   :  { %v3742_v5 = vsub.f32 %v3734_v22, %v3738_v17 }
0x1aab   :  { %v3741_v28 = vsub.f32 %v3733_v52, %v3737_v4 }
0x1aac   :  { %v3750_v9 = vadd.f32 1e-05, %v3742_v5  ;;  %v3712_v3 = vpop.xlane.xlu1 %3711 }
0x1aad   :  { %v3749_v27 = vadd.f32 1e-05, %v3741_v28  ;;  %v3716_v35 = vmul.f32 0.03125, %v3712_v3  ;;  %v3709_v18 = vpop.xlane.xlu0 %3708 }
0x1aae   :  { %8719 = vrsqrt.f32 %v3750_v9  ;;  %v3715_v16 = vmul.f32 0.03125, %v3709_v18 }
0x1aaf   :  { %8721 = vrsqrt.f32 %v3749_v27  ;;  %v3740_v37 = vmul.f32 %v3716_v35, %v3716_v35  ;;  %v3748_v51 = vsub.f32 %v9905_v44, %v3716_v35 }
0x1ab0   :  { %v3732_v36 = vpop.xlane.xlu1 %3731  ;;  %v3739_v43 = vmul.f32 %v3715_v16, %v3715_v16  ;;  %v3747_v19 = vsub.f32 %v9907_v48, %v3715_v16 }
0x1ab1   :  { %v3736_v38 = vmul.f32 0.03125, %v3732_v36  ;;  %v3729_v41 = vpop.xlane.xlu0 %3728 }
0x1ab2   :  { %v3735_v29 = vmul.f32 0.03125, %v3729_v41 }
0x1ab3   :  { %v3744_v39 = vsub.f32 %v3736_v38, %v3740_v37 }
0x1ab4   :  { %v3743_v60 = vsub.f32 %v3735_v29, %v3739_v43 }
0x1ab5   :  { %v3752_v13 = vadd.f32 1e-05, %v3744_v39 }
0x1ab6   :  { %v3751_v30 = vadd.f32 1e-05, %v3743_v60 }
0x1ab7   :  { %8723 = vrsqrt.f32 %v3752_v13 }
0x1ab8   :  { %v8720_v12 = vpop.eup %8719  ;;  %8725 = vrsqrt.f32 %v3751_v30 }
0x1ab9   :  { %v8722_v47 = vpop.eup %8721  ;;  %v3758_v46 = vmul.f32 %v8720_v12, %v3746_v25 }
0x1aba   :  { %v3757_v62 = vmul.f32 %v8722_v47, %v3745_v40 }
0x1abb   :  { %v3766_v55 = vmul.f32 %v3764_v1, %v3758_v46 }
0x1abc   :  { %v3765_v45 = vmul.f32 %v3764_v1, %v3757_v62 }
0x1abd   :  { %v3774_v20 = vadd.f32 %v3772_v14, %v3766_v55 }
0x1abe   :  { %v3773_v50 = vadd.f32 %v3772_v14, %v3765_v45 }
0x1ac0   :  { %7619 = vmatprep.mubr.msk.f32.mxu1 %vm140_vm1, %v3773_v50 }
0x1ac1   :  { %v8724_v32 = vpop.eup %8723  ;;  %7620 = vmatmul.mubr.msk.f32.vlgmr.msra.gmra.mrb[42].mxu1 %vm140_vm1, %v3774_v20 }
0x1ac2   :  { %v8726_v34 = vpop.eup %8725  ;;  %v3760_v58 = vmul.f32 %v8724_v32, %v3748_v51 }
0x1ac3   :  { %v3759_v0 = vmul.f32 %v8726_v34, %v3747_v19 }
0x1ac4   :  { %v3768_v33 = vmul.f32 %v3764_v1, %v3760_v58 }
0x1ac5   :  { %v3767_v2 = vmul.f32 %v3764_v1, %v3759_v0 }
0x1ac6   :  { %v3776_v10 = vadd.f32 %v3772_v14, %v3768_v33 }
0x1ac7   :  { %v3775_v61 = vadd.f32 %v3772_v14, %v3767_v2 }
0x1ac9   :  { %7622 = vmatprep.mubr.msk.f32.mxu1 %vm140_vm1, %v3775_v61 }
0x1aca   :  { %7623 = vmatmul.mubr.msk.f32.gmra.mrb[44].mxu1 %vm140_vm1, %v3776_v10 }
0x1b94   :  { %v7621_v53 = vpop.f32.mrb[42].mxu1 }
0x1b95   :  { %v9946_v8 = vadd.f32 %v7621_v53, %v6861_v7  ;;  %v3864_v15 = vpop.f32.mrb[43].mxu1 }
0x1b96   :  { %v9948_v17 = vadd.f32 %v6861_v7, %v3864_v15 }
0x1b98   :  { %7629 = vmatprep.mubr.msk.f32.mxu1 %vm657_vm2, %v9948_v17  ;;  %v9954_v22 = vpack.i.bf16 %v9946_v8, %v9948_v17 }
0x1b9a   :  { %8448 = vrot.lane.b32.xlu0 %v9954_v22, %s8889_s8 }
0x1b9d   :  { %v7624_v24 = vpop.f32.mrb[44].mxu1 }
0x1b9e   :  { %v9958_v4 = vadd.f32 %v7624_v24, %v6861_v7  ;;  %v3874_v52 = vpop.f32.mrb[45].mxu1 }
0x1b9f   :  { %v9960_v5 = vadd.f32 %v6861_v7, %v3874_v52 }
0x1ba1   :  { %v9964_v28 = vpack.i.bf16 %v9958_v4, %v9960_v5 }
0x1ba3   :  { %8453 = vrot.lane.b32.xlu1 %v9964_v28, %s8889_s8 }
0x1c0c   :  { %v8449_v9 = vpop.permute.xlu0 %8448 }
0x1c0d   :  { %v8451_v3 = vunpack.i.h.bf16 %v8449_v9  ;;  %v8450_v27 = vunpack.i.l.bf16 %v8449_v9 }
0x1c0f   :  { %v8151_v35 = vpack.c.bf16 %v8451_v3, %v8450_v27 }
0x1c11   :  { %8153 = vmatprep.subr.msk.bf16.mxu1 %vm9204_vm3, %v8151_v35 }
0x1c12   :  { %8156 = vmatpush3.bf16.xpose.msk.msra.mxu1 %vm9204_vm3, %v8151_v35 }
0x1c15   :  { %v8454_v18 = vpop.permute.xlu1 %8453 }
0x1c16   :  { %v8456_v16 = vunpack.i.h.bf16 %v8454_v18  ;;  %v8455_v36 = vunpack.i.l.bf16 %v8454_v18 }
0x1c18   :  { %v8157_v37 = vpack.c.bf16 %v8456_v16, %v8455_v36 }
0x1c19   :  { %7630 = vmatmul.mubr.msk.f32.vlgmr.msra.gmra.mrb[46].mxu1 %vm657_vm2, %v9946_v8 }
0x1c1a   :  { %8159 = vmatprep.subr.msk.bf16.mxu1 %vm9204_vm3, %v8157_v37  ;;  %7636 = vmatprep.mubr.msk.f32.mxu1 %vm657_vm2, %v9960_v5 }
0x1c1b   :  { %8162 = vmatpush3.bf16.xpose.msk.msra.mxu1 %vm9204_vm3, %v8157_v37 }
0x1c22   :  { %7637 = vmatmul.mubr.msk.f32.vlgmr.msra.gmra.mrb[48].mxu1 %vm657_vm2, %v9958_v4 }
0x1cec   :  { %v7631_v38 = vpop.f32.mrb[46].mxu1 }
0x1ced   :  { %v4062_v41 = vmul.f32 0.35355338, %v7631_v38  ;;  %v3963_v43 = vpop.f32.mrb[47].mxu1 }
0x1cee   :  { %v4061_v29 = vmul.f32 0.35355338, %v3963_v43 }
0x1cef   :  { %v4068_v39 = vsel %vm834_vm4, %v4062_v41, -inf }
0x1cf0   :  { %4069 = vmax.xlane.f32.xlu0 %v4068_v39  ;;  %v4065_v60 = vsel %vm834_vm4, %v4061_v29, -inf }
0x1cf1   :  { %4066 = vmax.xlane.f32.xlu1 %v4065_v60 }
0x1cf5   :  { %v7638_v13 = vpop.f32.mrb[48].mxu1 }
0x1cf6   :  { %v4064_v30 = vmul.f32 0.35355338, %v7638_v13  ;;  %v4052_v25 = vpop.f32.mrb[49].mxu1 }
0x1cf7   :  { %v4063_v1 = vmul.f32 0.35355338, %v4052_v25 }
0x1cf8   :  { %v4074_v12 = vsel %vm834_vm4, %v4064_v30, -inf }
0x1cf9   :  { %4075 = vmax.xlane.f32.xlu1 %v4074_v12  ;;  %v4071_v40 = vsel %vm834_vm4, %v4063_v1, -inf }
0x1cfa   :  { %4072 = vmax.xlane.f32.xlu0 %v4071_v40 }
0x1d7d   :  { %v4070_v47 = vpop.xlane.xlu0 %4069 }
0x1d7e   :  { %v4078_v46 = vsub.f32 %v4062_v41, %v4070_v47  ;;  %v4067_v62 = vpop.xlane.xlu1 %4066 }
0x1d7f   :  { %v4077_v14 = vsub.f32 %v4061_v29, %v4067_v62 }
0x1d80   :  { %v4083_v55 = vmul.f32 1.442695, %v4078_v46 }
0x1d81   :  { %v4081_v45 = vmul.f32 1.442695, %v4077_v14 }
0x1d82   :  { %8727 = vpow2.f32 %v4083_v55 }
0x1d83   :  { %8729 = vpow2.f32 %v4081_v45 }
0x1d86   :  { %v4076_v58 = vpop.xlane.xlu1 %4075 }
0x1d87   :  { %v4073_v19 = vpop.xlane.xlu0 %4072  ;;  %v4080_v33 = vsub.f32 %v4064_v30, %v4076_v58 }
0x1d88   :  { %v4079_v34 = vsub.f32 %v4063_v1, %v4073_v19 }
0x1d89   :  { %v4087_v2 = vmul.f32 1.442695, %v4080_v33 }
0x1d8a   :  { %v4085_v0 = vmul.f32 1.442695, %v4079_v34 }
0x1d8c   :  { %v8728_v50 = vpop.eup %8727  ;;  %8731 = vpow2.f32 %v4085_v0 }
0x1d8d   :  { %v8730_v20 = vpop.eup %8729  ;;  %v4092_v51 = vsel %vm834_vm4, %v8728_v50, 0.0  ;;  %8733 = vpow2.f32 %v4087_v2 }
0x1d8e   :  { %4093 = vadd.xlane.f32.xlu1 %v4092_v51  ;;  %v4089_v32 = vsel %vm834_vm4, %v8730_v20, 0.0 }
0x1d8f   :  { %4090 = vadd.xlane.f32.xlu0 %v4089_v32 }
0x1d96   :  { %v8732_v61 = vpop.eup %8731 }
0x1d97   :  { %v4095_v10 = vsel %vm834_vm4, %v8732_v61, 0.0  ;;  %v8734_v7 = vpop.eup %8733 }
0x1d98   :  { %v4098_v53 = vsel %vm834_vm4, %v8734_v7, 0.0 }
0x1d9f   :  { %8463 = vrot.lane.b32.xlu1 %v9964_v28, %s8890_s9 }
0x1da3   :  { %8468 = vrot.lane.b32.xlu1 %v9954_v22, %s8891_s10 }
0x1da5   :  { %8458 = vrot.lane.b32.xlu0 %v9954_v22, %s8890_s9 }
0x1da7   :  { %8473 = vrot.lane.b32.xlu1 %v9964_v28, %s8891_s10 }
0x1dc4   :  { %4096 = vadd.xlane.f32.xlu0 %v4095_v10 }
0x1dcb   :  { %4099 = vadd.xlane.f32.xlu1 %v4098_v53 }
0x1dda   :  { %4283 = vrot.lane.b32.xlu0 %v9948_v17, %s8892_s11 }
0x1ddc   :  { %4285 = vrot.lane.b32.xlu1 %v9946_v8, %s8892_s11 }
0x1dde   :  { %4374 = vrot.lane.b32.xlu0 %v9960_v5, %s8892_s11 }
0x1de0   :  { %4376 = vrot.lane.b32.xlu1 %v9958_v4, %s8892_s11 }
0x1e1b   :  { %v4094_v15 = vpop.xlane.xlu1 %4093 }
0x1e1c   :  { %8735 = vrcp.f32 %v4094_v15  ;;  %v4091_v24 = vpop.xlane.xlu0 %4090 }
0x1e1d   :  { %8737 = vrcp.f32 %v4091_v24 }
0x1e1f   :  { %v8464_v52 = vpop.permute.xlu1 %8463 }
0x1e20   :  { %v8459_v9 = vpop.permute.xlu0 %8458  ;;  %v8466_v3 = vunpack.i.h.bf16 %v8464_v52  ;;  %v8465_v27 = vunpack.i.l.bf16 %v8464_v52 }
0x1e21   :  { %v8461_v35 = vunpack.i.h.bf16 %v8459_v9  ;;  %v8460_v18 = vunpack.i.l.bf16 %v8459_v9 }
0x1e22   :  { %v8167_v41 = vpack.c.bf16 %v8466_v3, %v8465_v27 }
0x1e23   :  { %v8163_v16 = vpack.c.bf16 %v8461_v35, %v8460_v18  ;;  %v8469_v36 = vpop.permute.xlu1 %8468 }
0x1e24   :  { %v8471_v37 = vunpack.i.h.bf16 %v8469_v36  ;;  %v8470_v38 = vunpack.i.l.bf16 %v8469_v36 }
0x1e25   :  { %8164 = vmatprep.subr.bf16.mxu1 %v8163_v16 }
0x1e26   :  { %v8736_v43 = vpop.eup %8735  ;;  %v8171_v29 = vpack.c.bf16 %v8471_v37, %v8470_v38  ;;  %8166 = vmatpush3.bf16.msra.mxu1 %v8163_v16 }
0x1e27   :  { %v8738_v39 = vpop.eup %8737  ;;  %v8474_v60 = vpop.permute.xlu1 %8473  ;;  %8168 = vmatprep.subr.bf16.mxu1 %v8167_v41  ;;  %v4106_v1 = vmul.f32 %v8736_v43, %v8728_v50 }
0x1e28   :  { %v8476_v13 = vunpack.i.h.bf16 %v8474_v60  ;;  %v8475_v30 = vunpack.i.l.bf16 %v8474_v60  ;;  %8173 = vmatprep.subr.msk.bf16.mxu0 %vm9204_vm3, %v8171_v29  ;;  %v4105_v25 = vmul.f32 %v8738_v39, %v8730_v20 }
0x1e29   :  { %8176 = vmatpush3.bf16.xpose.msk.msra.mxu0 %vm9204_vm3, %v8171_v29 }
0x1e2a   :  { %v8177_v12 = vpack.c.bf16 %v8476_v13, %v8475_v30  ;;  %7643 = vmatprep.mubr.msk.f32.mxu1 %vm834_vm4, %v4105_v25 }
0x1e2b   :  { %7644 = vmatmul.mubr.msk.f32.vlgmr.msra.gmra.mrb[50].mxu1 %vm834_vm4, %v4106_v1 }
0x1e2c   :  { %8170 = vmatpush3.bf16.msra.mxu1 %v8167_v41 }
0x1e2d   :  { %8179 = vmatprep.subr.msk.bf16.mxu1 %vm9204_vm3, %v8177_v12 }
0x1e51   :  { %v4097_v40 = vpop.xlane.xlu0 %4096 }
0x1e52   :  { %8739 = vrcp.f32 %v4097_v40 }
0x1e55   :  { %v4284_v47 = vpop.permute.xlu0 %4283 }
0x1e56   :  { %7657 = vmatprep.mubr.msk.f32.mxu0 %vm657_vm2, %v4284_v47 }
0x1e58   :  { %v4100_v46 = vpop.xlane.xlu1 %4099 }
0x1e59   :  { %8741 = vrcp.f32 %v4100_v46  ;;  %v4375_v20 = vpop.permute.xlu0 %4374 }
0x1e5c   :  { %v8740_v62 = vpop.eup %8739  ;;  %v4286_v14 = vpop.permute.xlu1 %4285 }
0x1e5d   :  { %7658 = vmatmul.mubr.msk.f32.vlgmr.msra.gmra.mrb[42].mxu0 %vm657_vm2, %v4286_v14  ;;  %v4107_v55 = vmul.f32 %v8740_v62, %v8732_v61 }
0x1e5f   :  { %7650 = vmatprep.mubr.msk.f32.mxu1 %vm834_vm4, %v4107_v55 }
0x1e60   :  { %v4377_v51 = vpop.permute.xlu1 %4376 }
0x1e63   :  { %v8742_v45 = vpop.eup %8741 }
0x1e64   :  { %v4108_v50 = vmul.f32 %v8742_v45, %v8734_v7 }
0x1e66   :  { %7651 = vmatmul.mubr.msk.f32.vlgmr.msra.gmra.mrb[52].mxu1 %vm834_vm4, %v4108_v50 }
0x1e67   :  { %8182 = vmatpush3.bf16.xpose.msk.msra.mxu1 %vm9204_vm3, %v8177_v12  ;;  %7664 = vmatprep.mubr.msk.f32.mxu1 %vm657_vm2, %v4375_v20 }
0x1e6e   :  { %7665 = vmatmul.mubr.msk.f32.vlgmr.msra.gmra.mrb[54].mxu1 %vm657_vm2, %v4377_v51 }
0x1efe   :  { %v10022_v32 = vpop.f32.mrb[50].mxu1 }
0x1eff   :  { %v10024_v19 = vpop.f32.mrb[51].mxu1 }
0x1f30   :  { %v7659_v34 = vpop.f32.mrb[42].mxu0 }
0x1f31   :  { %v4466_v58 = vmul.f32 0.35355338, %v7659_v34  ;;  %v4365_v0 = vpop.f32.mrb[43].mxu0 }
0x1f32   :  { %v4465_v33 = vmul.f32 0.35355338, %v4365_v0 }
0x1f33   :  { %v4472_v2 = vsel %vm834_vm4, %v4466_v58, -inf }
0x1f34   :  { %4473 = vmax.xlane.f32.xlu1 %v4472_v2  ;;  %v4469_v61 = vsel %vm834_vm4, %v4465_v33, -inf }
0x1f35   :  { %4470 = vmax.xlane.f32.xlu0 %v4469_v61 }
0x1f39   :  { %v10028_v10 = vpop.f32.mrb[52].mxu1 }
0x1f3a   :  { %v10030_v7 = vpop.f32.mrb[53].mxu1 }
0x1f41   :  { %v7666_v53 = vpop.f32.mrb[54].mxu1 }
0x1f42   :  { %v4456_v15 = vpop.f32.mrb[55].mxu1  ;;  %v4468_v52 = vmul.f32 0.35355338, %v7666_v53 }
0x1f43   :  { %v4467_v24 = vmul.f32 0.35355338, %v4456_v15 }
0x1f44   :  { %v4478_v3 = vsel %vm834_vm4, %v4468_v52, -inf }
0x1f45   :  { %v4475_v9 = vsel %vm834_vm4, %v4467_v24, -inf }
0x1f46   :  { %4476 = vmax.xlane.f32.xlu0 %v4475_v9 }
0x1f4a   :  { %4479 = vmax.xlane.f32.xlu0 %v4478_v3 }
0x1fc1   :  { %v4474_v27 = vpop.xlane.xlu1 %4473 }
0x1fc2   :  { %v4482_v35 = vsub.f32 %v4466_v58, %v4474_v27  ;;  %v4471_v18 = vpop.xlane.xlu0 %4470 }
0x1fc3   :  { %v4481_v16 = vsub.f32 %v4465_v33, %v4471_v18 }
0x1fc4   :  { %v4487_v36 = vmul.f32 1.442695, %v4482_v35 }
0x1fc5   :  { %v4485_v37 = vmul.f32 1.442695, %v4481_v16 }
0x1fc6   :  { %8743 = vpow2.f32 %v4487_v36 }
0x1fc7   :  { %8745 = vpow2.f32 %v4485_v37 }
0x1fd0   :  { %v8744_v38 = vpop.eup %8743 }
0x1fd1   :  { %v8746_v41 = vpop.eup %8745  ;;  %v4496_v43 = vsel %vm834_vm4, %v8744_v38, 0.0 }
0x1fd2   :  { %4497 = vadd.xlane.f32.xlu1 %v4496_v43  ;;  %v4493_v29 = vsel %vm834_vm4, %v8746_v41, 0.0 }
0x1fd3   :  { %4494 = vadd.xlane.f32.xlu0 %v4493_v29  ;;  %v4477_v39 = vpop.xlane.xlu0 %4476 }
0x1fd4   :  { %v4483_v60 = vsub.f32 %v4467_v24, %v4477_v39 }
0x1fd6   :  { %v4489_v13 = vmul.f32 1.442695, %v4483_v60 }
0x1fd7   :  { %v4480_v30 = vpop.xlane.xlu0 %4479 }
0x1fd8   :  { %v4484_v25 = vsub.f32 %v4468_v52, %v4480_v30  ;;  %8747 = vpow2.f32 %v4489_v13 }
0x1fda   :  { %v4491_v1 = vmul.f32 1.442695, %v4484_v25 }
0x1fdc   :  { %8749 = vpow2.f32 %v4491_v1 }
0x1fe2   :  { %v8748_v12 = vpop.eup %8747 }
0x1fe3   :  { %8483 = vrot.lane.b32.xlu1 %v9964_v28, %s8893_s12  ;;  %v4499_v40 = vsel %vm834_vm4, %v8748_v12, 0.0 }
0x1fe6   :  { %v8750_v47 = vpop.eup %8749 }
0x1fe7   :  { %8488 = vrot.lane.b32.xlu1 %v9954_v22, %s8894_s13  ;;  %v4502_v46 = vsel %vm834_vm4, %v8750_v47, 0.0 }
0x1fe9   :  { %8478 = vrot.lane.b32.xlu0 %v9954_v22, %s8893_s12 }
0x1feb   :  { %8493 = vrot.lane.b32.xlu1 %v9964_v28, %s8894_s13 }
0x2008   :  { %4500 = vadd.xlane.f32.xlu0 %v4499_v40 }
0x200f   :  { %4503 = vadd.xlane.f32.xlu1 %v4502_v46 }
0x201e   :  { %4687 = vrot.lane.b32.xlu0 %v9948_v17, %s8895_s14 }
0x2020   :  { %4689 = vrot.lane.b32.xlu1 %v9946_v8, %s8895_s14 }
0x2022   :  { %4778 = vrot.lane.b32.xlu0 %v9960_v5, %s8895_s14 }
0x2024   :  { %4780 = vrot.lane.b32.xlu1 %v9958_v4, %s8895_s14 }
0x205f   :  { %v4498_v62 = vpop.xlane.xlu1 %4497 }
0x2060   :  { %8751 = vrcp.f32 %v4498_v62  ;;  %v4495_v14 = vpop.xlane.xlu0 %4494 }
0x2061   :  { %8753 = vrcp.f32 %v4495_v14 }
0x2063   :  { %v8484_v55 = vpop.permute.xlu1 %8483 }
0x2064   :  { %v8486_v45 = vunpack.i.h.bf16 %v8484_v55  ;;  %v8485_v50 = vunpack.i.l.bf16 %v8484_v55  ;;  %v8479_v20 = vpop.permute.xlu0 %8478 }
0x2065   :  { %v8481_v51 = vunpack.i.h.bf16 %v8479_v20  ;;  %v8480_v34 = vunpack.i.l.bf16 %v8479_v20 }
0x2066   :  { %v8187_v58 = vpack.c.bf16 %v8486_v45, %v8485_v50 }
0x2067   :  { %v8183_v0 = vpack.c.bf16 %v8481_v51, %v8480_v34  ;;  %v8489_v33 = vpop.permute.xlu1 %8488 }
0x2068   :  { %v8491_v2 = vunpack.i.h.bf16 %v8489_v33  ;;  %v8490_v61 = vunpack.i.l.bf16 %v8489_v33  ;;  %8188 = vmatprep.subr.bf16.mxu1 %v8187_v58 }
0x2069   :  { %8184 = vmatprep.subr.bf16.mxu0 %v8183_v0  ;;  %8190 = vmatpush3.bf16.msra.mxu1 %v8187_v58 }
0x206a   :  { %v8752_v53 = vpop.eup %8751  ;;  %v8191_v15 = vpack.c.bf16 %v8491_v2, %v8490_v61  ;;  %8186 = vmatpush3.bf16.msra.mxu0 %v8183_v0 }
0x206b   :  { %v8754_v24 = vpop.eup %8753  ;;  %v8494_v52 = vpop.permute.xlu1 %8493  ;;  %v4510_v35 = vmul.f32 %v8752_v53, %v8744_v38 }
0x206c   :  { %v8496_v9 = vunpack.i.h.bf16 %v8494_v52  ;;  %v8495_v3 = vunpack.i.l.bf16 %v8494_v52  ;;  %8193 = vmatprep.subr.msk.bf16.mxu0 %vm9204_vm3, %v8191_v15  ;;  %v4509_v27 = vmul.f32 %v8754_v24, %v8746_v41 }
0x206e   :  { %v8197_v18 = vpack.c.bf16 %v8496_v9, %v8495_v3  ;;  %7671 = vmatprep.mubr.msk.f32.mxu0 %vm834_vm4, %v4509_v27 }
0x206f   :  { %7672 = vmatmul.mubr.msk.f32.vlgmr.msra.gmra.mrb[44].mxu0 %vm834_vm4, %v4510_v35 }
0x2070   :  { %8199 = vmatprep.subr.msk.bf16.mxu1 %vm9204_vm3, %v8197_v18 }
0x2073   :  { %8196 = vmatpush3.bf16.xpose.msk.msra.mxu0 %vm9204_vm3, %v8191_v15 }
0x2095   :  { %v4501_v16 = vpop.xlane.xlu0 %4500 }
0x2096   :  { %8755 = vrcp.f32 %v4501_v16 }
0x2099   :  { %v4688_v36 = vpop.permute.xlu0 %4687 }
0x209a   :  { %7685 = vmatprep.mubr.msk.f32.mxu0 %vm657_vm2, %v4688_v36 }
0x209c   :  { %v4504_v37 = vpop.xlane.xlu1 %4503 }
0x209d   :  { %8757 = vrcp.f32 %v4504_v37  ;;  %v4779_v60 = vpop.permute.xlu0 %4778 }
0x20a0   :  { %v8756_v41 = vpop.eup %8755  ;;  %v4690_v38 = vpop.permute.xlu1 %4689 }
0x20a1   :  { %7686 = vmatmul.mubr.msk.f32.vlgmr.msra.gmra.mrb[46].mxu0 %vm657_vm2, %v4690_v38  ;;  %v4511_v43 = vmul.f32 %v8756_v41, %v8748_v12 }
0x20a3   :  { %7678 = vmatprep.mubr.msk.f32.mxu1 %vm834_vm4, %v4511_v43 }
0x20a4   :  { %v4781_v13 = vpop.permute.xlu1 %4780 }
0x20a7   :  { %v8758_v29 = vpop.eup %8757 }
0x20a8   :  { %v4512_v39 = vmul.f32 %v8758_v29, %v8750_v47 }
0x20aa   :  { %7679 = vmatmul.mubr.msk.f32.vlgmr.msra.gmra.mrb[56].mxu1 %vm834_vm4, %v4512_v39 }
0x20ab   :  { %8202 = vmatpush3.bf16.xpose.msk.msra.mxu1 %vm9204_vm3, %v8197_v18  ;;  %7692 = vmatprep.mubr.msk.f32.mxu1 %vm657_vm2, %v4779_v60 }
0x20b2   :  { %7693 = vmatmul.mubr.msk.f32.vlgmr.msra.gmra.mrb[58].mxu1 %vm657_vm2, %v4781_v13 }
0x2142   :  { %v10070_v30 = vpop.f32.mrb[44].mxu0 }
0x2143   :  { %v10072_v25 = vpop.f32.mrb[45].mxu0 }
0x2174   :  { %v7687_v1 = vpop.f32.mrb[46].mxu0 }
0x2175   :  { %v4870_v12 = vmul.f32 0.35355338, %v7687_v1  ;;  %v4769_v40 = vpop.f32.mrb[47].mxu0 }
0x2176   :  { %v4869_v46 = vmul.f32 0.35355338, %v4769_v40 }
0x2177   :  { %v4876_v47 = vsel %vm834_vm4, %v4870_v12, -inf }
0x2178   :  { %4877 = vmax.xlane.f32.xlu1 %v4876_v47  ;;  %v4873_v62 = vsel %vm834_vm4, %v4869_v46, -inf }
0x2179   :  { %4874 = vmax.xlane.f32.xlu0 %v4873_v62 }
0x217d   :  { %v10076_v14 = vpop.f32.mrb[56].mxu1 }
0x217e   :  { %v10078_v55 = vpop.f32.mrb[57].mxu1 }
0x2185   :  { %v7694_v45 = vpop.f32.mrb[58].mxu1 }
0x2186   :  { %v4860_v50 = vpop.f32.mrb[59].mxu1  ;;  %v4872_v51 = vmul.f32 0.35355338, %v7694_v45 }
0x2187   :  { %v4871_v20 = vmul.f32 0.35355338, %v4860_v50 }
0x2188   :  { %v4882_v58 = vsel %vm834_vm4, %v4872_v51, -inf }
0x2189   :  { %v4879_v34 = vsel %vm834_vm4, %v4871_v20, -inf }
0x218a   :  { %4880 = vmax.xlane.f32.xlu0 %v4879_v34 }
0x218e   :  { %4883 = vmax.xlane.f32.xlu0 %v4882_v58 }
0x2205   :  { %v4878_v0 = vpop.xlane.xlu1 %4877 }
0x2206   :  { %v4886_v33 = vsub.f32 %v4870_v12, %v4878_v0  ;;  %v4875_v2 = vpop.xlane.xlu0 %4874 }
0x2207   :  { %v4885_v61 = vsub.f32 %v4869_v46, %v4875_v2 }
0x2208   :  { %v4891_v53 = vmul.f32 1.442695, %v4886_v33 }
0x2209   :  { %v4889_v15 = vmul.f32 1.442695, %v4885_v61 }
0x220a   :  { %8759 = vpow2.f32 %v4891_v53 }
0x220b   :  { %8761 = vpow2.f32 %v4889_v15 }
0x2214   :  { %v8760_v24 = vpop.eup %8759 }
0x2215   :  { %v8762_v52 = vpop.eup %8761  ;;  %v4900_v9 = vsel %vm834_vm4, %v8760_v24, 0.0 }
0x2216   :  { %4901 = vadd.xlane.f32.xlu1 %v4900_v9  ;;  %v4897_v3 = vsel %vm834_vm4, %v8762_v52, 0.0 }
0x2217   :  { %4898 = vadd.xlane.f32.xlu0 %v4897_v3  ;;  %v4881_v27 = vpop.xlane.xlu0 %4880 }
0x2218   :  { %v4887_v35 = vsub.f32 %v4871_v20, %v4881_v27 }
0x221a   :  { %v4893_v18 = vmul.f32 1.442695, %v4887_v35 }
0x221b   :  { %v4884_v16 = vpop.xlane.xlu0 %4883 }
0x221c   :  { %v4888_v36 = vsub.f32 %v4872_v51, %v4884_v16  ;;  %8763 = vpow2.f32 %v4893_v18 }
0x221e   :  { %v4895_v37 = vmul.f32 1.442695, %v4888_v36 }
0x2220   :  { %8765 = vpow2.f32 %v4895_v37 }
0x2226   :  { %v8764_v41 = vpop.eup %8763 }
0x2227   :  { %8503 = vrot.lane.b32.xlu1 %v9964_v28, %s8896_s15  ;;  %v4903_v38 = vsel %vm834_vm4, %v8764_v41, 0.0 }
0x222a   :  { %v8766_v43 = vpop.eup %8765 }
0x222b   :  { %8508 = vrot.lane.b32.xlu1 %v9954_v22, %s8897_s16  ;;  %v4906_v29 = vsel %vm834_vm4, %v8766_v43, 0.0 }
0x222d   :  { %8498 = vrot.lane.b32.xlu0 %v9954_v22, %s8896_s15 }
0x222f   :  { %8513 = vrot.lane.b32.xlu1 %v9964_v28, %s8897_s16 }
0x224c   :  { %4904 = vadd.xlane.f32.xlu0 %v4903_v38 }
0x2253   :  { %4907 = vadd.xlane.f32.xlu1 %v4906_v29 }
0x2262   :  { %5091 = vrot.lane.b32.xlu0 %v9948_v17, %s8898_s17 }
0x2264   :  { %5093 = vrot.lane.b32.xlu1 %v9946_v8, %s8898_s17 }
0x2266   :  { %5182 = vrot.lane.b32.xlu0 %v9960_v5, %s8898_s17 }
0x2268   :  { %5184 = vrot.lane.b32.xlu1 %v9958_v4, %s8898_s17 }
0x22a3   :  { %v4902_v39 = vpop.xlane.xlu1 %4901 }
0x22a4   :  { %8767 = vrcp.f32 %v4902_v39  ;;  %v4899_v60 = vpop.xlane.xlu0 %4898 }
0x22a5   :  { %8769 = vrcp.f32 %v4899_v60 }
0x22a7   :  { %v8504_v13 = vpop.permute.xlu1 %8503 }
0x22a8   :  { %v8506_v1 = vunpack.i.h.bf16 %v8504_v13  ;;  %v8505_v12 = vunpack.i.l.bf16 %v8504_v13  ;;  %v8499_v40 = vpop.permute.xlu0 %8498 }
0x22a9   :  { %v8501_v46 = vunpack.i.h.bf16 %v8499_v40  ;;  %v8500_v47 = vunpack.i.l.bf16 %v8499_v40 }
0x22aa   :  { %v8207_v17 = vpack.c.bf16 %v8506_v1, %v8505_v12 }
0x22ab   :  { %v8203_v62 = vpack.c.bf16 %v8501_v46, %v8500_v47  ;;  %v8509_v45 = vpop.permute.xlu1 %8508 }
0x22ac   :  { %v8511_v8 = vunpack.i.h.bf16 %v8509_v45  ;;  %v8510_v50 = vunpack.i.l.bf16 %v8509_v45  ;;  %8208 = vmatprep.subr.bf16.mxu1 %v8207_v17 }
0x22ad   :  { %8204 = vmatprep.subr.bf16.mxu0 %v8203_v62  ;;  %8210 = vmatpush3.bf16.msra.mxu1 %v8207_v17 }
0x22ae   :  { %v8768_v5 = vpop.eup %8767  ;;  %v8211_v4 = vpack.c.bf16 %v8511_v8, %v8510_v50  ;;  %8206 = vmatpush3.bf16.msra.mxu0 %v8203_v62 }
0x22af   :  { %v8770_v20 = vpop.eup %8769  ;;  %v8514_v51 = vpop.permute.xlu1 %8513  ;;  %v4914_v33 = vmul.f32 %v8768_v5, %v8760_v24 }
0x22b0   :  { %v8516_v34 = vunpack.i.h.bf16 %v8514_v51  ;;  %v8515_v58 = vunpack.i.l.bf16 %v8514_v51  ;;  %8213 = vmatprep.subr.msk.bf16.mxu0 %vm9204_vm3, %v8211_v4  ;;  %v4913_v0 = vmul.f32 %v8770_v20, %v8762_v52 }
0x22b2   :  { %v8217_v2 = vpack.c.bf16 %v8516_v34, %v8515_v58  ;;  %7699 = vmatprep.mubr.msk.f32.mxu0 %vm834_vm4, %v4913_v0 }
0x22b3   :  { %7700 = vmatmul.mubr.msk.f32.vlgmr.msra.gmra.mrb[48].mxu0 %vm834_vm4, %v4914_v33 }
0x22b4   :  { %8219 = vmatprep.subr.msk.bf16.mxu1 %vm9204_vm3, %v8217_v2 }
0x22b7   :  { %8216 = vmatpush3.bf16.xpose.msk.msra.mxu0 %vm9204_vm3, %v8211_v4 }
0x22d9   :  { %v4905_v61 = vpop.xlane.xlu0 %4904 }
0x22da   :  { %8771 = vrcp.f32 %v4905_v61 }
0x22dd   :  { %v5092_v53 = vpop.permute.xlu0 %5091 }
0x22de   :  { %7713 = vmatprep.mubr.msk.f32.mxu0 %vm657_vm2, %v5092_v53 }
0x22e0   :  { %v4908_v15 = vpop.xlane.xlu1 %4907 }
0x22e1   :  { %8773 = vrcp.f32 %v4908_v15  ;;  %v5183_v35 = vpop.permute.xlu0 %5182 }
0x22e4   :  { %v8772_v52 = vpop.eup %8771  ;;  %v5094_v24 = vpop.permute.xlu1 %5093 }
0x22e5   :  { %7714 = vmatmul.mubr.msk.f32.vlgmr.msra.gmra.mrb[50].mxu0 %vm657_vm2, %v5094_v24  ;;  %v4915_v9 = vmul.f32 %v8772_v52, %v8764_v41 }
0x22e7   :  { %7706 = vmatprep.mubr.msk.f32.mxu1 %vm834_vm4, %v4915_v9 }
0x22e8   :  { %v5185_v18 = vpop.permute.xlu1 %5184 }
0x22eb   :  { %v8774_v3 = vpop.eup %8773 }
0x22ec   :  { %v4916_v27 = vmul.f32 %v8774_v3, %v8766_v43 }
0x22ee   :  { %7707 = vmatmul.mubr.msk.f32.vlgmr.msra.gmra.mrb[60].mxu1 %vm834_vm4, %v4916_v27 }
0x22ef   :  { %8222 = vmatpush3.bf16.xpose.msk.msra.mxu1 %vm9204_vm3, %v8217_v2  ;;  %7720 = vmatprep.mubr.msk.f32.mxu1 %vm657_vm2, %v5183_v35 }
0x22f6   :  { %7721 = vmatmul.mubr.msk.f32.vlgmr.msra.gmra.mrb[62].mxu1 %vm657_vm2, %v5185_v18 }
0x2386   :  { %v7701_v16 = vpop.f32.mrb[48].mxu0 }
0x2387   :  { %v4995_v36 = vpop.f32.mrb[49].mxu0 }
0x23b8   :  { %v7715_v37 = vpop.f32.mrb[50].mxu0 }
0x23b9   :  { %v5274_v38 = vmul.f32 0.35355338, %v7715_v37  ;;  %v5173_v41 = vpop.f32.mrb[51].mxu0 }
0x23ba   :  { %v5273_v29 = vmul.f32 0.35355338, %v5173_v41 }
0x23bb   :  { %v5280_v39 = vsel %vm834_vm4, %v5274_v38, -inf }
0x23bc   :  { %5281 = vmax.xlane.f32.xlu1 %v5280_v39  ;;  %v5277_v43 = vsel %vm834_vm4, %v5273_v29, -inf }
0x23bd   :  { %5278 = vmax.xlane.f32.xlu0 %v5277_v43 }
0x23c1   :  { %v10120_v60 = vpop.f32.mrb[60].mxu1 }
0x23c2   :  { %v10122_v31 = vpop.f32.mrb[61].mxu1 }
0x23c9   :  { %v7722_v13 = vpop.f32.mrb[62].mxu1 }
0x23ca   :  { %v5264_v1 = vpop.f32.mrb[63].mxu1  ;;  %v5276_v40 = vmul.f32 0.35355338, %v7722_v13 }
0x23cb   :  { %v5275_v12 = vmul.f32 0.35355338, %v5264_v1 }
0x23cc   :  { %v5286_v47 = vsel %vm834_vm4, %v5276_v40, -inf }
0x23cd   :  { %v5283_v46 = vsel %vm834_vm4, %v5275_v12, -inf }
0x23ce   :  { %5284 = vmax.xlane.f32.xlu0 %v5283_v46  ;;  %v5555_v46 = vld [vmem:[%s10571_s1 + $0x2a0] sm:$0xff] }
0x23d2   :  { %5287 = vmax.xlane.f32.xlu0 %v5286_v47  ;;  %v5556_v47 = vld [vmem:[%s10571_s1 + $0x2a8] sm:$0xff] }
0x2449   :  { %v5282_v17 = vpop.xlane.xlu1 %5281 }
0x244a   :  { %v5290_v62 = vsub.f32 %v5274_v38, %v5282_v17  ;;  %v5279_v45 = vpop.xlane.xlu0 %5278  ;;  %v5557_v17 = vld [vmem:[%s10571_s1 + $0x2b0] sm:$0xff] }
0x244b   :  { %v5289_v8 = vsub.f32 %v5273_v29, %v5279_v45  ;;  %v5558_v45 = vld [vmem:[%s10571_s1 + $0x2b8] sm:$0xff] }
0x244c   :  { %v5295_v50 = vmul.f32 1.442695, %v5290_v62  ;;  %v8231_v62 = vpack.c.bf16 %v5556_v47, %v5555_v46 }
0x244d   :  { %v5293_v5 = vmul.f32 1.442695, %v5289_v8  ;;  %v8235_v8 = vpack.c.bf16 %v5558_v45, %v5557_v17 }
0x244e   :  { %8775 = vpow2.f32 %v5295_v50 }
0x244f   :  { %8777 = vpow2.f32 %v5293_v5 }
0x2458   :  { %v8776_v4 = vpop.eup %8775 }
0x2459   :  { %v8778_v20 = vpop.eup %8777  ;;  %v5304_v51 = vsel %vm834_vm4, %v8776_v4, 0.0 }
0x245a   :  { %5305 = vadd.xlane.f32.xlu1 %v5304_v51  ;;  %v5301_v34 = vsel %vm834_vm4, %v8778_v20, 0.0 }
0x245b   :  { %v5285_v58 = vpop.xlane.xlu0 %5284  ;;  %5302 = vadd.xlane.f32.xlu0 %v5301_v34 }
0x245c   :  { %v5291_v0 = vsub.f32 %v5275_v12, %v5285_v58 }
0x245e   :  { %v5297_v33 = vmul.f32 1.442695, %v5291_v0 }
0x245f   :  { %v5288_v2 = vpop.xlane.xlu0 %5287 }
0x2460   :  { %8779 = vpow2.f32 %v5297_v33  ;;  %v5292_v61 = vsub.f32 %v5276_v40, %v5288_v2 }
0x2462   :  { %v5299_v53 = vmul.f32 1.442695, %v5292_v61 }
0x2464   :  { %8781 = vpow2.f32 %v5299_v53 }
0x246a   :  { %v8780_v15 = vpop.eup %8779 }
0x246b   :  { %v5307_v52 = vsel %vm834_vm4, %v8780_v15, 0.0 }
0x246c   :  { %5308 = vadd.xlane.f32.xlu0 %v5307_v52 }
0x246e   :  { %v8782_v24 = vpop.eup %8781 }
0x246f   :  { %v5310_v9 = vsel %vm834_vm4, %v8782_v24, 0.0 }
0x2470   :  { %5311 = vadd.xlane.f32.xlu1 %v5310_v9 }
0x2481   :  { %8523 = vrot.lane.b32.xlu1 %v9964_v28, %s8899_s18 }
0x2482   :  { %8518 = vrot.lane.b32.xlu0 %v9954_v22, %s8899_s18 }
0x2485   :  { %5499 = vrot.lane.b32.xlu1 %v10072_v25, %s8900_s19 }
0x2486   :  { %5515 = vrot.lane.b32.xlu0 %v4995_v36, %s8901_s20 }
0x2489   :  { %5501 = vrot.lane.b32.xlu1 %v10070_v30, %s8900_s19 }
0x248d   :  { %5517 = vrot.lane.b32.xlu1 %v7701_v16, %s8901_s20 }
0x24e7   :  { %v5306_v35 = vpop.xlane.xlu1 %5305 }
0x24e8   :  { %v5303_v3 = vpop.xlane.xlu0 %5302 }
0x24e9   :  { %8783 = vrcp.f32 %v5303_v3 }
0x24ea   :  { %8785 = vrcp.f32 %v5306_v35 }
0x24f3   :  { %v8784_v27 = vpop.eup %8783 }
0x24f4   :  { %v5317_v18 = vmul.f32 %v8784_v27, %v8778_v20  ;;  %v8786_v41 = vpop.eup %8785 }
0x24f5   :  { %v5318_v43 = vmul.f32 %v8786_v41, %v8776_v4 }
0x24f6   :  { %7727 = vmatprep.mubr.msk.f32.mxu0 %vm834_vm4, %v5317_v18 }
0x24f9   :  { %v5309_v28 = vpop.xlane.xlu0 %5308 }
0x24fa   :  { %8787 = vrcp.f32 %v5309_v28 }
0x24fd   :  { %v5312_v22 = vpop.xlane.xlu1 %5311  ;;  %v8519_v37 = vpop.permute.xlu0 %8518 }
0x24fe   :  { %8789 = vrcp.f32 %v5312_v22  ;;  %v8521_v25 = vunpack.i.h.bf16 %v8519_v37  ;;  %v8520_v36 = vunpack.i.l.bf16 %v8519_v37 }
0x2500   :  { %v8223_v38 = vpack.c.bf16 %v8521_v25, %v8520_v36 }
0x2501   :  { %v8524_v30 = vpop.permute.xlu1 %8523  ;;  %v5516_v0 = vpop.permute.xlu0 %5515 }
0x2502   :  { %v8526_v29 = vunpack.i.h.bf16 %v8524_v30  ;;  %v8525_v16 = vunpack.i.l.bf16 %v8524_v30  ;;  %8224 = vmatprep.subr.bf16.mxu0 %v8223_v38 }
0x2503   :  { %8226 = vmatpush3.bf16.msra.mxu0 %v8223_v38 }
0x2504   :  { %v8788_v39 = vpop.eup %8787  ;;  %v8227_v13 = vpack.c.bf16 %v8526_v29, %v8525_v16  ;;  %8232 = vmatprep.subr.bf16.mxu0 %v8231_v62 }
0x2505   :  { %v5319_v1 = vmul.f32 %v8788_v39, %v8780_v15  ;;  %v5500_v51 = vpop.permute.xlu1 %5499 }
0x2506   :  { %7728 = vmatmul.mubr.msk.f32.vlgmr.msra.gmra.mrb[52].mxu0 %vm834_vm4, %v5318_v43  ;;  %8228 = vmatprep.subr.bf16.mxu1 %v8227_v13 }
0x2507   :  { %8230 = vmatpush3.bf16.msra.mxu1 %v8227_v13  ;;  %7734 = vmatprep.mubr.msk.f32.mxu1 %vm834_vm4, %v5319_v1 }
0x2508   :  { %v8790_v12 = vpop.eup %8789  ;;  %8234 = vmatpush3.bf16.msra.mxu0 %v8231_v62 }
0x2509   :  { %v5320_v40 = vmul.f32 %v8790_v12, %v8782_v24  ;;  %8236 = vmatprep.subr.bf16.mxu0 %v8235_v8  ;;  %v5502_v34 = vpop.permute.xlu1 %5501 }
0x250b   :  { %7735 = vmatmul.mubr.msk.f32.vlgmr.msra.gmra.mrb[64].mxu1 %vm834_vm4, %v5320_v40 }
0x250c   :  { %8238 = vmatpush3.bf16.msra.mxu0 %v8235_v8 }
0x250d   :  { %8247 = vmatprep.subr.bf16.mxu0 %v8903_v56  ;;  %v5518_v58 = vpop.permute.xlu1 %5517 }
0x25d9   :  { %v7729_v50 = vpop.f32.mrb[52].mxu0 }
0x25da   :  { %5533 = vrot.lane.b32.xlu1 %v7729_v50, %s8902_s28  ;;  %v5399_v5 = vpop.f32.mrb[53].mxu0  ;;  %v5740_v50 = vld [vmem:[%s10574_s4 + $0x28] sm:$0xff] }
0x25db   :  { %5531 = vrot.lane.b32.xlu0 %v5399_v5, %s8902_s28  ;;  %v5741_v5 = vld [vmem:[%s10574_s4 + $0x30] sm:$0xff] }
0x25de   :  { %v7736_v4 = vpop.f32.mrb[64].mxu1  ;;  %5505 = vrot.lane.b32.xlu1 %v10076_v14, %s8900_s19  ;;  %v5543_v14 = vsel %vm657_vm2, %v10024_v19, %v5500_v51  ;;  %v5743_v51 = vld [vmem:[%s10574_s4 + $0x40] sm:$0xff] }
0x25df   :  { %v5486_v20 = vpop.f32.mrb[65].mxu1  ;;  %5503 = vrot.lane.b32.xlu0 %v10078_v55, %s8900_s19  ;;  %v5544_v55 = vsel %vm657_vm2, %v10022_v32, %v5502_v34 }
0x25e2   :  { %5521 = vrot.lane.b32.xlu1 %v10120_v60, %s8901_s20  ;;  %v5547_v60 = vsel %vm834_vm4, %v5543_v14, %v5516_v0 }
0x25e3   :  { %5519 = vrot.lane.b32.xlu0 %v10122_v31, %s8901_s20  ;;  %v5548_v31 = vsel %vm834_vm4, %v5544_v55, %v5518_v58 }
0x25e6   :  { %5537 = vrot.lane.b32.xlu1 %v7736_v4, %s8902_s28  ;;  %v8239_v4 = vpack.c.bf16 %v5741_v5, %v5740_v50 }
0x25e7   :  { %5535 = vrot.lane.b32.xlu0 %v5486_v20, %s8902_s28  ;;  %v5742_v20 = vld [vmem:[%s10574_s4 + $0x38] sm:$0xff] }
0x25e8   :  { %8240 = vmatprep.subr.bf16.mxu1 %v8239_v4  ;;  %v8243_v34 = vpack.c.bf16 %v5743_v51, %v5742_v20  ;;  %v6918_v51 = vld [vmem:[%s10574_s4 + $0x48] ss:$0 sm:$0xff] }
0x25e9   :  { %8242 = vmatpush3.bf16.msra.mxu1 %v8239_v4 }
0x25ea   :  { %8244 = vmatprep.subr.bf16.mxu1 %v8243_v34 }
0x25ed   :  { %8246 = vmatpush3.bf16.msra.mxu1 %v8243_v34 }
0x264c   :  { %v5534_v33 = vpop.permute.xlu1 %5533 }
0x264d   :  { %v5532_v2 = vpop.permute.xlu0 %5531  ;;  %v5552_v53 = vsel %vm2321_vm5, %v5548_v31, %v5534_v33 }
0x264e   :  { %v5551_v61 = vsel %vm2321_vm5, %v5547_v60, %v5532_v2 }
0x264f   :  { %7745 = vmatprep.mubr.msk.f32.mxu0 %vm140_vm1, %v5551_v61 }
0x2650   :  { %v5506_v15 = vpop.permute.xlu1 %5505  ;;  %7746 = vmatmul.mubr.msk.f32.vlgmr.msra.gmra.mrb[54].mxu0 %vm140_vm1, %v5552_v53 }
0x2651   :  { %v5504_v52 = vpop.permute.xlu0 %5503  ;;  %v5546_v3 = vsel %vm657_vm2, %v10028_v10, %v5506_v15 }
0x2652   :  { %v5545_v32 = vsel %vm657_vm2, %v10030_v7, %v5504_v52  ;;  %v10192_v7 = vld [vmem:[%s10571_s1 + $0x70] sm:$0xff] }
0x2653   :  { %v5562_v10 = vrot.slane %v10192_v7, %v9429_v26 }
0x2654   :  { %v5522_v19 = vpop.permute.xlu1 %5521 }
0x2655   :  { %v5520_v24 = vpop.permute.xlu0 %5519  ;;  %v5550_v18 = vsel %vm834_vm4, %v5546_v3, %v5522_v19 }
0x2656   :  { %v5549_v27 = vsel %vm834_vm4, %v5545_v32, %v5520_v24 }
0x2658   :  { %v5538_v9 = vpop.permute.xlu1 %5537 }
0x2659   :  { %v5536_v35 = vpop.permute.xlu0 %5535  ;;  %v5554_v22 = vsel %vm2321_vm5, %v5550_v18, %v5538_v9 }
0x265a   :  { %v5553_v28 = vsel %vm2321_vm5, %v5549_v27, %v5536_v35 }
0x265b   :  { %7748 = vmatprep.mubr.msk.f32.mxu0 %vm140_vm1, %v5553_v28 }
0x265c   :  { %7749 = vmatmul.mubr.msk.f32.gmra.mrb[56].mxu0 %vm140_vm1, %v5554_v22 }
0x2723   :  { %v7747_v37 = vpop.f32.mrb[54].mxu0 }
0x2724   :  { %v5647_v25 = vadd.f32 %v7747_v37, %v5562_v10  ;;  %v5641_v36 = vpop.f32.mrb[55].mxu0 }
0x2725   :  { %v5642_v38 = vadd.f32 %v5641_v36, %v5562_v10 }
0x2726   :  { %v10197_v41 = vadd.f32 %v5647_v25, %v9889_v59 }
0x2727   :  { %v10200_v30 = vadd.f32 %v5642_v38, %v9891_v23 }
0x2728   :  { %v5667_v29 = vsel %vm140_vm1, %v10197_v41, 0.0  ;;  %v5681_v59 = vmul.f32 %v10197_v41, %v10197_v41 }
0x2729   :  { %5668 = vadd.xlane.f32.xlu1 %v5667_v29  ;;  %v5664_v16 = vsel %vm140_vm1, %v10200_v30, 0.0  ;;  %v5680_v39 = vmul.f32 %v10200_v30, %v10200_v30 }
0x272a   :  { %5665 = vadd.xlane.f32.xlu0 %v5664_v16  ;;  %v5687_v40 = vsel %vm140_vm1, %v5681_v59, 0.0  ;;  %v5727_v16 = vrot.slane %v10192_v7, %v9483_v57 }
0x272b   :  { %v5684_v43 = vsel %vm140_vm1, %v5680_v39, 0.0 }
0x272e   :  { %5685 = vadd.xlane.f32.xlu0 %v5684_v43 }
0x272f   :  { %v7750_v13 = vpop.f32.mrb[56].mxu0 }
0x2730   :  { %v5657_v23 = vadd.f32 %v7750_v13, %v5562_v10  ;;  %v5651_v1 = vpop.f32.mrb[57].mxu0  ;;  %v5735_v13 = vrot.slane %v10192_v7, %v2505_v21 }
0x2731   :  { %v5652_v12 = vadd.f32 %v5651_v1, %v5562_v10 }
0x2732   :  { %v10213_v46 = vadd.f32 %v5657_v23, %v9905_v44  ;;  %5688 = vadd.xlane.f32.xlu0 %v5687_v40 }
0x2733   :  { %v10216_v47 = vadd.f32 %v5652_v12, %v9907_v48 }
0x2734   :  { %v5673_v17 = vsel %vm140_vm1, %v10213_v46, 0.0  ;;  %v5683_v62 = vmul.f32 %v10213_v46, %v10213_v46 }
0x2735   :  { %5674 = vadd.xlane.f32.xlu1 %v5673_v17  ;;  %v5670_v45 = vsel %vm140_vm1, %v10216_v47, 0.0  ;;  %v5682_v8 = vmul.f32 %v10216_v47, %v10216_v47 }
0x2736   :  { %5671 = vadd.xlane.f32.xlu0 %v5670_v45  ;;  %v5693_v44 = vsel %vm140_vm1, %v5683_v62, 0.0 }
0x2737   :  { %v5690_v48 = vsel %vm140_vm1, %v5682_v8, 0.0 }
0x2739   :  { %5694 = vadd.xlane.f32.xlu1 %v5693_v44 }
0x273a   :  { %5691 = vadd.xlane.f32.xlu0 %v5690_v48 }
0x27b6   :  { %v5669_v14 = vpop.xlane.xlu1 %5668 }
0x27b7   :  { %v5666_v58 = vpop.xlane.xlu0 %5665  ;;  %v5677_v55 = vmul.f32 0.03125, %v5669_v14 }
0x27b8   :  { %v5676_v0 = vmul.f32 0.03125, %v5666_v58 }
0x27b9   :  { %v5701_v53 = vmul.f32 %v5677_v55, %v5677_v55  ;;  %v5709_v23 = vsub.f32 %v10197_v41, %v5677_v55 }
0x27ba   :  { %v5700_v60 = vmul.f32 %v5676_v0, %v5676_v0  ;;  %v5708_v38 = vsub.f32 %v10200_v30, %v5676_v0 }
0x27bb   :  { %v5686_v33 = vpop.xlane.xlu0 %5685 }
0x27bc   :  { %v5696_v2 = vmul.f32 0.03125, %v5686_v33 }
0x27be   :  { %v5704_v31 = vsub.f32 %v5696_v2, %v5700_v60 }
0x27bf   :  { %v5689_v61 = vpop.xlane.xlu0 %5688 }
0x27c0   :  { %v5712_v15 = vadd.f32 1e-05, %v5704_v31  ;;  %v5697_v52 = vmul.f32 0.03125, %v5689_v61 }
0x27c2   :  { %8791 = vrsqrt.f32 %v5712_v15  ;;  %v5705_v19 = vsub.f32 %v5697_v52, %v5701_v53  ;;  %v5675_v24 = vpop.xlane.xlu1 %5674 }
0x27c3   :  { %v5679_v32 = vmul.f32 0.03125, %v5675_v24  ;;  %v5672_v9 = vpop.xlane.xlu0 %5671 }
0x27c4   :  { %v5713_v3 = vadd.f32 1e-05, %v5705_v19  ;;  %v5678_v27 = vmul.f32 0.03125, %v5672_v9 }
0x27c5   :  { %v5703_v18 = vmul.f32 %v5679_v32, %v5679_v32  ;;  %v5711_v8 = vsub.f32 %v10213_v46, %v5679_v32 }
0x27c6   :  { %8793 = vrsqrt.f32 %v5713_v3  ;;  %v5695_v35 = vpop.xlane.xlu1 %5694  ;;  %v5702_v10 = vmul.f32 %v5678_v27, %v5678_v27  ;;  %v5710_v48 = vsub.f32 %v10216_v47, %v5678_v27 }
0x27c7   :  { %v5699_v28 = vmul.f32 0.03125, %v5695_v35  ;;  %v5692_v22 = vpop.xlane.xlu0 %5691 }
0x27c8   :  { %v5698_v37 = vmul.f32 0.03125, %v5692_v22 }
0x27c9   :  { %v5707_v25 = vsub.f32 %v5699_v28, %v5703_v18 }
0x27ca   :  { %v5706_v36 = vsub.f32 %v5698_v37, %v5702_v10 }
0x27cb   :  { %v5715_v29 = vadd.f32 1e-05, %v5707_v25 }
0x27cc   :  { %v8792_v39 = vpop.eup %8791  ;;  %v5714_v43 = vadd.f32 1e-05, %v5706_v36 }
0x27cd   :  { %8795 = vrsqrt.f32 %v5715_v29  ;;  %v5720_v59 = vmul.f32 %v8792_v39, %v5708_v38  ;;  %v5948_v29 = vld [vmem:[%s10575_s5 + $0x8] sm:$0xff] }
0x27ce   :  { %8797 = vrsqrt.f32 %v5714_v43  ;;  %6923 = vmatprep.mubr.msk.f32.mxu0 %vm2730_vm6, %v5948_v29 }
0x27cf   :  { %v5728_v1 = vmul.f32 %v5727_v16, %v5720_v59 }
0x27d0   :  { %v8794_v12 = vpop.eup %8793 }
0x27d1   :  { %v5721_v40 = vmul.f32 %v8794_v12, %v5709_v23  ;;  %v5736_v17 = vadd.f32 %v5735_v13, %v5728_v1 }
0x27d3   :  { %7759 = vmatprep.mubr.msk.f32.mxu1 %vm140_vm1, %v5736_v17  ;;  %v5729_v62 = vmul.f32 %v5727_v16, %v5721_v40 }
0x27d5   :  { %v5737_v45 = vadd.f32 %v5735_v13, %v5729_v62 }
0x27d7   :  { %v8796_v44 = vpop.eup %8795  ;;  %7760 = vmatmul.mubr.msk.f32.vlgmr.msra.gmra.mrb[66].mxu1 %vm140_vm1, %v5737_v45 }
0x27d8   :  { %v8798_v63 = vpop.eup %8797  ;;  %v5723_v21 = vmul.f32 %v8796_v44, %v5711_v8 }
0x27d9   :  { %v5722_v7 = vmul.f32 %v8798_v63, %v5710_v48 }
0x27da   :  { %v5731_v50 = vmul.f32 %v5727_v16, %v5723_v21 }
0x27db   :  { %v5730_v5 = vmul.f32 %v5727_v16, %v5722_v7  ;;  %v10267_v16 = vld [vmem:[%s10571_s1 + $0x308] sm:$0x7f] }
0x27dc   :  { %v5739_v20 = vadd.f32 %v5735_v13, %v5731_v50  ;;  %v5894_v39 = vrot.slane %v10267_v16, %v9037_v6  ;;  %v5902_v44 = vrot.slane %v10267_v16, %v9045_v11 }
0x27dd   :  { %v5738_v4 = vadd.f32 %v5735_v13, %v5730_v5 }
0x27df   :  { %7762 = vmatprep.mubr.msk.f32.mxu1 %vm140_vm1, %v5738_v4 }
0x27e0   :  { %7763 = vmatmul.mubr.msk.f32.gmra.mrb[68].mxu1 %vm140_vm1, %v5739_v20  ;;  %v5910_v20 = vrot.slane %v10267_v16, %v9111_v42 }
0x28aa   :  { %v7761_v34 = vpop.f32.mrb[66].mxu1 }
0x28ab   :  { %v5833_v58 = vadd.f32 %v7761_v34, %v6918_v51  ;;  %v5827_v0 = vpop.f32.mrb[67].mxu1 }
0x28ac   :  { %v5828_v14 = vadd.f32 %v6918_v51, %v5827_v0 }
0x28ad   :  { %v5847_v33 = vsub.f32 0.0, %v5833_v58 }
0x28ae   :  { %v5846_v55 = vsub.f32 0.0, %v5828_v14 }
0x28af   :  { %v5852_v60 = vmul.f32 1.442695, %v5847_v33 }
0x28b0   :  { %v5850_v2 = vmul.f32 1.442695, %v5846_v55  ;;  %v5918_v55 = vrot.slane %v10267_v16, %v9160_v49 }
0x28b1   :  { %8799 = vpow2.f32 %v5852_v60 }
0x28b2   :  { %8801 = vpow2.f32 %v5850_v2 }
0x28b3   :  { %v7764_v31 = vpop.f32.mrb[68].mxu1 }
0x28b4   :  { %v5843_v61 = vadd.f32 %v7764_v31, %v6918_v51  ;;  %v5837_v53 = vpop.f32.mrb[69].mxu1 }
0x28b5   :  { %v5838_v15 = vadd.f32 %v6918_v51, %v5837_v53 }
0x28b6   :  { %v5849_v52 = vsub.f32 0.0, %v5843_v61 }
0x28b7   :  { %v5848_v19 = vsub.f32 0.0, %v5838_v15 }
0x28b8   :  { %v5856_v24 = vmul.f32 1.442695, %v5849_v52  ;;  %v5926_v52 = vrot.slane %v10267_v16, %v9163_v54 }
0x28b9   :  { %v5854_v32 = vmul.f32 1.442695, %v5848_v19 }
0x28ba   :  { %8803 = vpow2.f32 %v5856_v24 }
0x28bb   :  { %v8800_v9 = vpop.eup %8799  ;;  %8805 = vpow2.f32 %v5854_v32 }
0x28bc   :  { %v8802_v3 = vpop.eup %8801  ;;  %v5859_v27 = vadd.f32 1.0, %v8800_v9 }
0x28bd   :  { %v5858_v35 = vadd.f32 1.0, %v8802_v3 }
0x28be   :  { %8807 = vrcp.f32 %v5859_v27 }
0x28bf   :  { %8809 = vrcp.f32 %v5858_v35  ;;  %v5934_v35 = vrot.slane %v10267_v16, %v9429_v26 }
0x28c4   :  { %v8804_v18 = vpop.eup %8803 }
0x28c5   :  { %v8806_v28 = vpop.eup %8805  ;;  %v5861_v37 = vadd.f32 1.0, %v8804_v18 }
0x28c6   :  { %v5860_v22 = vadd.f32 1.0, %v8806_v28 }
0x28c8   :  { %v8808_v10 = vpop.eup %8807  ;;  %8811 = vrcp.f32 %v5860_v22 }
0x28c9   :  { %v8810_v25 = vpop.eup %8809  ;;  %5876 = vrot.lane.b32.xlu1 %v8808_v10, %s8889_s8  ;;  %8813 = vrcp.f32 %v5861_v37 }
0x28ca   :  { %5874 = vrot.lane.b32.xlu0 %v8810_v25, %s8889_s8 }
0x28d2   :  { %v8812_v36 = vpop.eup %8811 }
0x28d3   :  { %5878 = vrot.lane.b32.xlu1 %v8812_v36, %s8889_s8  ;;  %v8814_v38 = vpop.eup %8813  ;;  %v5942_v36 = vrot.slane %v10267_v16, %v9483_v57 }
0x28d7   :  { %5880 = vrot.lane.b32.xlu1 %v8814_v38, %s8889_s8 }
0x293b   :  { %v5877_v43 = vpop.permute.xlu1 %5876 }
0x293c   :  { %v10271_v59 = vmul.f32 %v5877_v43, %v5833_v58  ;;  %v5875_v13 = vpop.permute.xlu0 %5874 }
0x293d   :  { %v10273_v23 = vmul.f32 %v5875_v13, %v5828_v14 }
0x293e   :  { %v5896_v1 = vmul.f32 %v5894_v39, %v10271_v59  ;;  %v5904_v50 = vmul.f32 %v5902_v44, %v10271_v59  ;;  %v5912_v0 = vmul.f32 %v5910_v20, %v10271_v59  ;;  %v5928_v9 = vmul.f32 %v5926_v52, %v10271_v59 }
0x293f   :  { %v5895_v12 = vmul.f32 %v5894_v39, %v10273_v23  ;;  %v5903_v7 = vmul.f32 %v5902_v44, %v10273_v23  ;;  %v5911_v58 = vmul.f32 %v5910_v20, %v10273_v23  ;;  %v5919_v31 = vmul.f32 %v5918_v55, %v10273_v23 }
0x2940   :  { %v5927_v32 = vmul.f32 %v5926_v52, %v10273_v23  ;;  %v5935_v22 = vmul.f32 %v5934_v35, %v10273_v23  ;;  %v5936_v10 = vmul.f32 %v5934_v35, %v10271_v59  ;;  %v5944_v43 = vmul.f32 %v5942_v36, %v10271_v59 }
0x2941   :  { %v8248_v40 = vpack.c.bf16 %v5896_v1, %v5895_v12  ;;  %v8254_v5 = vpack.c.bf16 %v5904_v50, %v5903_v7  ;;  %v8260_v14 = vpack.c.bf16 %v5912_v0, %v5911_v58  ;;  %v6087_v7 = vld [vmem:[%s10571_s1 + $0x2f8] sm:$0xff] }
0x2942   :  { %v8272_v3 = vpack.c.bf16 %v5928_v9, %v5927_v32  ;;  %v8278_v37 = vpack.c.bf16 %v5936_v10, %v5935_v22 }
0x2943   :  { %8249 = vmatpush1.bf16.msra.mxu0 %v8248_v40  ;;  %v5947_v40 = vld [vmem:[%s10575_s5] sm:$0xff] }
0x2944   :  { %8250 = vmatprep.subr.bf16.mxu0 %v8903_v56 }
0x2945   :  { %v5879_v17 = vpop.permute.xlu1 %5878 }
0x2946   :  { %v10278_v62 = vmul.f32 %v5879_v17, %v5838_v15  ;;  %v5952_v17 = vld [vmem:[%s10575_s5 + $0x28] sm:$0xff] }
0x2948   :  { %v5897_v48 = vmul.f32 %v5894_v39, %v10278_v62  ;;  %v5905_v51 = vmul.f32 %v5902_v44, %v10278_v62  ;;  %v5913_v60 = vmul.f32 %v5910_v20, %v10278_v62  ;;  %v5921_v19 = vmul.f32 %v5918_v55, %v10278_v62 }
0x2949   :  { %v5881_v45 = vpop.permute.xlu1 %5880  ;;  %v5929_v18 = vmul.f32 %v5926_v52, %v10278_v62  ;;  %v5937_v38 = vmul.f32 %v5934_v35, %v10278_v62  ;;  %v5945_v12 = vmul.f32 %v5942_v36, %v10278_v62  ;;  %v5951_v62 = vld [vmem:[%s10575_s5 + $0x20] sm:$0xff] }
0x294a   :  { %v10280_v8 = vmul.f32 %v5881_v45, %v5843_v61  ;;  %v5920_v61 = vmul.f32 %v5918_v55, %v10271_v59  ;;  %v5950_v59 = vld [vmem:[%s10575_s5 + $0x18] sm:$0xff] }
0x294b   :  { %v5954_v45 = vld [vmem:[%s10575_s5 + $0x38] sm:$0xff] }
0x294c   :  { %v5898_v63 = vmul.f32 %v5894_v39, %v10280_v8  ;;  %v5906_v4 = vmul.f32 %v5902_v44, %v10280_v8  ;;  %v5914_v33 = vmul.f32 %v5910_v20, %v10280_v8  ;;  %v8266_v53 = vpack.c.bf16 %v5920_v61, %v5919_v31  ;;  %v6084_v44 = vld [vmem:[%s10571_s1 + $0x2e0] sm:$0xff] }
0x294d   :  { %v5922_v15 = vmul.f32 %v5918_v55, %v10280_v8  ;;  %v5930_v27 = vmul.f32 %v5926_v52, %v10280_v8  ;;  %v5938_v25 = vmul.f32 %v5934_v35, %v10280_v8  ;;  %v5943_v39 = vmul.f32 %v5942_v36, %v10273_v23  ;;  %v5949_v23 = vld [vmem:[%s10575_s5 + $0x10] sm:$0xff] }
0x294e   :  { %v8251_v21 = vpack.c.bf16 %v5898_v63, %v5897_v48  ;;  %v8257_v34 = vpack.c.bf16 %v5906_v4, %v5905_v51  ;;  %v8263_v2 = vpack.c.bf16 %v5914_v33, %v5913_v60  ;;  %v5946_v1 = vmul.f32 %v5942_v36, %v10280_v8  ;;  %v5953_v8 = vld [vmem:[%s10575_s5 + $0x30] sm:$0xff]  ;;  %v6085_v48 = vld [vmem:[%s10571_s1 + $0x2e8] sm:$0xff]  ;;  %s6764_s5 = sshll.u32 %s8906_s26, 4  ;;  %s6765_s5 = int_to_ptr.vmem [resolvable:$true] %s6764_s5 }
0x294f   :  { %v8269_v24 = vpack.c.bf16 %v5922_v15, %v5921_v19  ;;  %v8275_v28 = vpack.c.bf16 %v5930_v27, %v5929_v18  ;;  %v8281_v29 = vpack.c.bf16 %v5938_v25, %v5937_v38  ;;  %v8284_v13 = vpack.c.bf16 %v5944_v43, %v5943_v39  ;;  %s8865_s0 = scalar_lea.vmem %s6765_s5, 32  ;;  %p8870_p1 = scmp.lt.s32.totalorder %s6765_s5, %s6765_s5 }
0x2950   :  { %8252 = vmatpush1.bf16.msra.mxu0 %v8251_v21  ;;  %v8287_v16 = vpack.c.bf16 %v5946_v1, %v5945_v12  ;;  %v8289_v63 = vpack.c.bf16 %v6085_v48, %v6084_v44  ;;  %v6086_v21 = vld [vmem:[%s10571_s1 + $0x2f0] sm:$0xff]  ;;  %p8866_p0 = scmp.ne.s32.totalorder %s6765_s5, %s8865_s0  ;;  %p8871_p2 = scmp.lt.s32.totalorder %s8865_s0, %s8865_s0 }
0x2951   :  { %8253 = vmatprep.subr.bf16.mxu0 %v8903_v56  ;;  %v8293_v50 = vpack.c.bf16 %v6087_v7, %v6086_v21  ;;  %v6192_v21 = vmul.f32 2.0, %v10213_v46 }
0x2952   :  { %8290 = vmatprep.subr.bf16.mxu1 %v8289_v63  ;;  %p8872_p3 = por %p8871_p2, %p8870_p1 }
0x2953   :  { %8292 = vmatpush3.bf16.msra.mxu1 %v8289_v63 }
0x2954   :  { %8255 = vmatpush1.bf16.msra.mxu0 %v8254_v5  ;;  %8294 = vmatprep.subr.bf16.mxu1 %v8293_v50  ;;  %v10371_v5 = vld [vmem:[%s10571_s1 + $0x78] sm:$0x7f]  ;;  %p8873_p4 = pnand %p8872_p3, %p8866_p0 }
0x2955   :  { %8256 = vmatprep.subr.bf16.mxu0 %v8903_v56  ;;  %v5958_v4 = vrot.slane %v10371_v5, %v9037_v6  ;;  %v6091_v12 = vrot.slane %v10371_v5, %v9045_v11 }
0x2957   :  { %8296 = vmatpush3.bf16.msra.mxu1 %v8293_v50 }
0x2958   :  { %8258 = vmatpush1.bf16.msra.mxu0 %v8257_v34 }
0x2959   :  { %8259 = vmatprep.subr.bf16.mxu0 %v8903_v56 }
0x295c   :  { %8261 = vmatpush1.bf16.msra.mxu0 %v8260_v14 }
0x295d   :  { %8262 = vmatprep.subr.bf16.mxu0 %v8903_v56 }
0x2960   :  { %8264 = vmatpush1.bf16.msra.mxu0 %v8263_v2 }
0x2961   :  { %8265 = vmatprep.subr.bf16.mxu0 %v8903_v56 }
0x2964   :  { %8267 = vmatpush1.bf16.msra.mxu0 %v8266_v53 }
0x2965   :  { %8268 = vmatprep.subr.bf16.mxu0 %v8903_v56 }
0x2968   :  { %8270 = vmatpush1.bf16.msra.mxu0 %v8269_v24 }
0x2969   :  { %8271 = vmatprep.subr.bf16.mxu0 %v8903_v56 }
0x296c   :  { %8273 = vmatpush1.bf16.msra.mxu0 %v8272_v3 }
0x296d   :  { %8274 = vmatprep.subr.bf16.mxu0 %v8903_v56 }
0x2970   :  { %8276 = vmatpush1.bf16.msra.mxu0 %v8275_v28 }
0x2971   :  { %8277 = vmatprep.subr.bf16.mxu0 %v8903_v56 }
0x2974   :  { %8279 = vmatpush1.bf16.msra.mxu0 %v8278_v37 }
0x2975   :  { %8280 = vmatprep.subr.bf16.mxu0 %v8903_v56 }
0x2978   :  { %8282 = vmatpush1.bf16.msra.mxu0 %v8281_v29 }
0x2979   :  { %8283 = vmatprep.subr.bf16.mxu0 %v8903_v56 }
0x297c   :  { %8285 = vmatpush1.bf16.msra.mxu0 %v8284_v13 }
0x297d   :  { %8286 = vmatprep.subr.bf16.mxu0 %v8903_v56 }
0x2980   :  { %8288 = vmatpush1.bf16.msra.mxu0 %v8287_v16 }
0x2983   :  { %6036 = vmatmul.mubr.f32.vlgmr.msra.gmra.mrb[58].mxu0 %v5947_v40 }
0x2984   :  { %6924 = vmatprep.mubr.msk.f32.mxu0 %vm2730_vm6, %v5950_v59  ;;  %v6190_v59 = vmul.f32 2.0, %v10197_v41 }
0x2987   :  { %6041 = vmatmul.mubr.f32.gmra.mrb[60].mxu0 %v5949_v23 }
0x2988   :  { %6925 = vmatprep.mubr.msk.f32.mxu0 %vm2730_vm6, %v5952_v17 }
0x298b   :  { %6046 = vmatmul.mubr.f32.gmra.mrb[62].mxu0 %v5951_v62  ;;  %v6189_v62 = vmul.f32 2.0, %v10200_v30 }
0x298c   :  { %6926 = vmatprep.mubr.msk.f32.mxu0 %vm2730_vm6, %v5954_v45 }
0x298f   :  { %6051 = vmatmul.mubr.f32.gmra.mrb[64].mxu0 %v5953_v8 }
0x2a56   :  { %v6037_v20 = vpop.f32.mrb[58].mxu0 }
0x2a57   :  { %v6038_v51 = vadd.f32 %v6037_v20, %v5958_v4  ;;  %v6039_v34 = vpop.f32.mrb[59].mxu0 }
0x2a59   :  { %v6056_v58 = vsub.f32 0.0, %v6038_v51 }
0x2a5a   :  { %v6042_v0 = vpop.f32.mrb[60].mxu0 }
0x2a5b   :  { %v6060_v14 = vmul.f32 1.442695, %v6056_v58  ;;  %v6043_v33 = vadd.f32 %v6042_v0, %v5958_v4  ;;  %v6044_v55 = vpop.f32.mrb[61].mxu0 }
0x2a5d   :  { %8815 = vpow2.f32 %v6060_v14  ;;  %v6057_v60 = vsub.f32 0.0, %v6043_v33 }
0x2a5e   :  { %v6047_v2 = vpop.f32.mrb[62].mxu0 }
0x2a5f   :  { %v6062_v31 = vmul.f32 1.442695, %v6057_v60  ;;  %v6048_v61 = vadd.f32 %v6047_v2, %v5958_v4  ;;  %v6049_v53 = vpop.f32.mrb[63].mxu0  ;;  %v6273_v60 = vld [vmem:[%s10572_s2 + $0x78] sm:$0xff]  ;;  %v6274_v2 = vld [vmem:[%s10572_s2 + $0x80] sm:$0xff] }
0x2a60   :  { %v6276_v53 = vld [vmem:[%s10572_s2 + $0x90] sm:$0xff] }
0x2a61   :  { %8817 = vpow2.f32 %v6062_v31  ;;  %v6058_v15 = vsub.f32 0.0, %v6048_v61  ;;  %v6275_v31 = vld [vmem:[%s10572_s2 + $0x88] sm:$0xff] }
0x2a62   :  { %v6052_v52 = vpop.f32.mrb[64].mxu0 }
0x2a63   :  { %v6064_v19 = vmul.f32 1.442695, %v6058_v15  ;;  %v6053_v24 = vadd.f32 %v6052_v52, %v5958_v4  ;;  %v6054_v6 = vpop.f32.mrb[65].mxu0  ;;  %v8301_v15 = vpack.c.bf16 %v6276_v53, %v6275_v31  ;;  %v6408_v31 = vld [vmem:[%s10571_s1 + $0x208] sm:$0xff]  ;;  %v6409_v53 = vld [vmem:[%s10571_s1 + $0x210] sm:$0xff] }
0x2a65   :  { %8819 = vpow2.f32 %v6064_v19  ;;  %v6059_v32 = vsub.f32 0.0, %v6053_v24 }
0x2a67   :  { %v8816_v9 = vpop.eup %8815  ;;  %v6066_v3 = vmul.f32 1.442695, %v6059_v32 }
0x2a68   :  { %v6068_v27 = vadd.f32 1.0, %v8816_v9 }
0x2a69   :  { %8821 = vpow2.f32 %v6066_v3 }
0x2a6a   :  { %8823 = vrcp.f32 %v6068_v27 }
0x2a6b   :  { %v8818_v35 = vpop.eup %8817 }
0x2a6c   :  { %v6069_v18 = vadd.f32 1.0, %v8818_v35 }
0x2a6e   :  { %8825 = vrcp.f32 %v6069_v18 }
0x2a6f   :  { %v8820_v28 = vpop.eup %8819 }
0x2a70   :  { %v6070_v22 = vadd.f32 1.0, %v8820_v28 }
0x2a72   :  { %8827 = vrcp.f32 %v6070_v22 }
0x2a73   :  { %v8822_v10 = vpop.eup %8821 }
0x2a74   :  { %v8824_v37 = vpop.eup %8823  ;;  %v6071_v25 = vadd.f32 1.0, %v8822_v10 }
0x2a75   :  { %v6080_v36 = vmul.f32 %v8824_v37, %v6038_v51  ;;  %v6191_v51 = vmul.f32 2.0, %v10216_v47 }
0x2a76   :  { %8829 = vrcp.f32 %v6071_v25 }
0x2a77   :  { %7773 = vmatprep.mubr.msk.f32.mxu1 %vm140_vm1, %v6080_v36 }
0x2a78   :  { %v8826_v38 = vpop.eup %8825 }
0x2a79   :  { %v6081_v29 = vmul.f32 %v8826_v38, %v6043_v33 }
0x2a7b   :  { %7774 = vmatmul.mubr.msk.f32.vlgmr.msra.gmra.mrb[70].mxu1 %vm140_vm1, %v6081_v29 }
0x2a7c   :  { %v8828_v39 = vpop.eup %8827 }
0x2a7d   :  { %v6082_v43 = vmul.f32 %v8828_v39, %v6048_v61  ;;  %v8297_v61 = vpack.c.bf16 %v6274_v2, %v6273_v60 }
0x2a7f   :  { %7776 = vmatprep.mubr.msk.f32.mxu1 %vm140_vm1, %v6082_v43  ;;  %8298 = vmatprep.subr.bf16.mxu1 %v8297_v61 }
0x2a80   :  { %v8830_v13 = vpop.eup %8829  ;;  %8300 = vmatpush3.bf16.msra.mxu1 %v8297_v61 }
0x2a81   :  { %v6083_v1 = vmul.f32 %v8830_v13, %v6053_v24  ;;  %8302 = vmatprep.subr.bf16.mxu1 %v8301_v15 }
0x2a83   :  { %7777 = vmatmul.mubr.msk.f32.gmra.mrb[72].mxu1 %vm140_vm1, %v6083_v1 }
0x2a84   :  { %8304 = vmatpush3.bf16.msra.mxu1 %v8301_v15  ;;  %v6410_v15 = vld [vmem:[%s10571_s1 + $0x218] sm:$0xff] }
0x2b4e   :  { %v7775_v16 = vpop.f32.mrb[70].mxu1 }
0x2b4f   :  { %v6176_v40 = vadd.f32 %v7775_v16, %v6091_v12  ;;  %v6170_v23 = vpop.f32.mrb[71].mxu1 }
0x2b50   :  { %v6171_v17 = vadd.f32 %v6170_v23, %v6091_v12 }
0x2b51   :  { %v10383_v45 = vadd.f32 %v6190_v59, %v6176_v40 }
0x2b52   :  { %v10385_v8 = vadd.f32 %v6189_v62, %v6171_v17 }
0x2b53   :  { %v6200_v44 = vsel %vm140_vm1, %v10383_v45, 0.0  ;;  %v6214_v11 = vmul.f32 %v10383_v45, %v10383_v45 }
0x2b54   :  { %6201 = vadd.xlane.f32.xlu1 %v6200_v44  ;;  %v6197_v48 = vsel %vm140_vm1, %v10385_v8, 0.0  ;;  %v6213_v4 = vmul.f32 %v10385_v8, %v10385_v8 }
0x2b55   :  { %6198 = vadd.xlane.f32.xlu0 %v6197_v48  ;;  %v6220_v50 = vsel %vm140_vm1, %v6214_v11, 0.0  ;;  %v6260_v48 = vrot.slane %v10371_v5, %v9111_v42 }
0x2b56   :  { %v7778_v41 = vpop.f32.mrb[72].mxu1  ;;  %v6217_v46 = vsel %vm140_vm1, %v6213_v4, 0.0 }
0x2b57   :  { %v6186_v63 = vadd.f32 %v7778_v41, %v6091_v12  ;;  %v6180_v30 = vpop.f32.mrb[73].mxu1 }
0x2b58   :  { %v6181_v7 = vadd.f32 %v6180_v30, %v6091_v12 }
0x2b59   :  { %v10397_v20 = vadd.f32 %v6192_v21, %v6186_v63  ;;  %6221 = vadd.xlane.f32.xlu0 %v6220_v50 }
0x2b5a   :  { %v10404_v0 = vadd.f32 %v6191_v51, %v6181_v7  ;;  %v6268_v7 = vrot.slane %v10371_v5, %v9160_v49  ;;  %v6407_v49 = vld [vmem:[%s10571_s1 + $0x200] sm:$0xff] }
0x2b5b   :  { %v6206_v34 = vsel %vm140_vm1, %v10397_v20, 0.0  ;;  %v6216_v58 = vmul.f32 %v10397_v20, %v10397_v20  ;;  %v8305_v61 = vpack.c.bf16 %v6408_v31, %v6407_v49 }
0x2b5c   :  { %6207 = vadd.xlane.f32.xlu1 %v6206_v34  ;;  %v6203_v33 = vsel %vm140_vm1, %v10404_v0, 0.0  ;;  %v6215_v47 = vmul.f32 %v10404_v0, %v10404_v0 }
0x2b5d   :  { %6218 = vadd.xlane.f32.xlu0 %v6217_v46  ;;  %v6226_v14 = vsel %vm140_vm1, %v6216_v58, 0.0  ;;  %8306 = vmatprep.subr.bf16.mxu1 %v8305_v61 }
0x2b5e   :  { %v6223_v55 = vsel %vm140_vm1, %v6215_v47, 0.0 }
0x2b60   :  { %6227 = vadd.xlane.f32.xlu1 %v6226_v14 }
0x2b61   :  { %6204 = vadd.xlane.f32.xlu0 %v6203_v33 }
0x2b65   :  { %6224 = vadd.xlane.f32.xlu0 %v6223_v55 }
0x2be1   :  { %v6202_v52 = vpop.xlane.xlu1 %6201 }
0x2be2   :  { %v6199_v19 = vpop.xlane.xlu0 %6198  ;;  %v6210_v24 = vmul.f32 0.03125, %v6202_v52  ;;  %v8309_v52 = vpack.c.bf16 %v6410_v15, %v6409_v53 }
0x2be3   :  { %v6209_v9 = vmul.f32 0.03125, %v6199_v19  ;;  %v6411_v19 = vld [vmem:[%s10571_s1 + $0x220] sm:$0xff] }
0x2be4   :  { %v6234_v32 = vmul.f32 %v6210_v24, %v6210_v24  ;;  %v6242_v62 = vsub.f32 %v10383_v45, %v6210_v24  ;;  %v6412_v24 = vld [vmem:[%s10571_s1 + $0x228] sm:$0xff] }
0x2be5   :  { %v6233_v22 = vmul.f32 %v6209_v9, %v6209_v9  ;;  %v6241_v41 = vsub.f32 %v10385_v8, %v6209_v9  ;;  %v6414_v9 = vld [vmem:[%s10571_s1 + $0x238] sm:$0xff] }
0x2be6   :  { %v6222_v6 = vpop.xlane.xlu0 %6221 }
0x2be7   :  { %v6230_v3 = vmul.f32 0.03125, %v6222_v6  ;;  %v8313_v6 = vpack.c.bf16 %v6412_v24, %v6411_v19  ;;  %v6513_v24 = vmul.f32 1.5, %v10383_v45 }
0x2be9   :  { %v6238_v27 = vsub.f32 %v6230_v3, %v6234_v32  ;;  %v6208_v35 = vpop.xlane.xlu1 %6207  ;;  %v6413_v32 = vld [vmem:[%s10571_s1 + $0x230] sm:$0xff] }
0x2bea   :  { %v6212_v18 = vmul.f32 0.03125, %v6208_v35  ;;  %v6219_v28 = vpop.xlane.xlu0 %6218  ;;  %v8317_v3 = vpack.c.bf16 %v6414_v9, %v6413_v32  ;;  %v6416_v35 = vld [vmem:[%s10571_s1 + $0x248] sm:$0xff]  ;;  %v6512_v32 = vmul.f32 1.5, %v10385_v8 }
0x2beb   :  { %v6246_v10 = vadd.f32 1e-05, %v6238_v27  ;;  %v6229_v37 = vmul.f32 0.03125, %v6219_v28  ;;  %v6415_v27 = vld [vmem:[%s10571_s1 + $0x240] sm:$0xff]  ;;  %v6417_v28 = vld [vmem:[%s10571_s1 + $0x250] sm:$0xff] }
0x2bec   :  { %v6236_v38 = vmul.f32 %v6212_v18, %v6212_v18  ;;  %v6244_v51 = vsub.f32 %v10397_v20, %v6212_v18  ;;  %v8321_v18 = vpack.c.bf16 %v6416_v35, %v6415_v27 }
0x2bed   :  { %8831 = vrsqrt.f32 %v6246_v10  ;;  %v6237_v25 = vsub.f32 %v6229_v37, %v6233_v22  ;;  %v6228_v36 = vpop.xlane.xlu1 %6227  ;;  %v6418_v22 = vld [vmem:[%s10571_s1 + $0x258] sm:$0xff]  ;;  %v6419_v37 = vld [vmem:[%s10571_s1 + $0x260] sm:$0xff] }
0x2bee   :  { %v6232_v29 = vmul.f32 0.03125, %v6228_v36  ;;  %v6205_v39 = vpop.xlane.xlu0 %6204  ;;  %v8325_v10 = vpack.c.bf16 %v6418_v22, %v6417_v28 }
0x2bef   :  { %v6245_v43 = vadd.f32 1e-05, %v6237_v25  ;;  %v6211_v13 = vmul.f32 0.03125, %v6205_v39  ;;  %v6420_v25 = vld [vmem:[%s10571_s1 + $0x268] sm:$0xff] }
0x2bf0   :  { %v6240_v1 = vsub.f32 %v6232_v29, %v6236_v38  ;;  %v8329_v36 = vpack.c.bf16 %v6420_v25, %v6419_v37  ;;  %v6421_v38 = vld [vmem:[%s10571_s1 + $0x270] sm:$0xff]  ;;  %v6422_v29 = vld [vmem:[%s10571_s1 + $0x278] sm:$0xff]  ;;  %v6515_v37 = vmul.f32 1.5, %v10397_v20 }
0x2bf1   :  { %8833 = vrsqrt.f32 %v6245_v43  ;;  %v6235_v40 = vmul.f32 %v6211_v13, %v6211_v13  ;;  %v6243_v14 = vsub.f32 %v10404_v0, %v6211_v13  ;;  %v8333_v39 = vpack.c.bf16 %v6422_v29, %v6421_v38  ;;  %v6931_v43 = vld [vmem:[%s10572_s2 + $0x98] ss:$0 sm:$0xff] }
0x2bf2   :  { %v6248_v12 = vadd.f32 1e-05, %v6240_v1  ;;  %v6225_v16 = vpop.xlane.xlu0 %6224  ;;  %v6514_v38 = vmul.f32 1.5, %v10404_v0 }
0x2bf3   :  { %v6231_v59 = vmul.f32 0.03125, %v6225_v16 }
0x2bf4   :  { %8835 = vrsqrt.f32 %v6248_v12 }
0x2bf5   :  { %v6239_v23 = vsub.f32 %v6231_v59, %v6235_v40 }
0x2bf7   :  { %v8832_v17 = vpop.eup %8831  ;;  %v6247_v44 = vadd.f32 1e-05, %v6239_v23 }
0x2bf8   :  { %v6254_v11 = vmul.f32 %v8832_v17, %v6242_v62 }
0x2bf9   :  { %8837 = vrsqrt.f32 %v6247_v44 }
0x2bfa   :  { %v6262_v30 = vmul.f32 %v6260_v48, %v6254_v11 }
0x2bfb   :  { %v8834_v63 = vpop.eup %8833 }
0x2bfc   :  { %v6253_v21 = vmul.f32 %v8834_v63, %v6241_v41  ;;  %v6270_v58 = vadd.f32 %v6268_v7, %v6262_v30 }
0x2bfe   :  { %v8836_v50 = vpop.eup %8835  ;;  %v6261_v4 = vmul.f32 %v6260_v48, %v6253_v21 }
0x2bff   :  { %v6256_v46 = vmul.f32 %v8836_v50, %v6244_v51 }
0x2c00   :  { %v6269_v34 = vadd.f32 %v6268_v7, %v6261_v4 }
0x2c01   :  { %v6264_v47 = vmul.f32 %v6260_v48, %v6256_v46 }
0x2c02   :  { %7787 = vmatprep.mubr.msk.f32.mxu1 %vm140_vm1, %v6269_v34 }
0x2c03   :  { %v8838_v42 = vpop.eup %8837  ;;  %7788 = vmatmul.mubr.msk.f32.vlgmr.msra.gmra.mrb[74].mxu1 %vm140_vm1, %v6270_v58  ;;  %v6272_v2 = vadd.f32 %v6268_v7, %v6264_v47 }
0x2c04   :  { %v6255_v33 = vmul.f32 %v8838_v42, %v6243_v14  ;;  %8308 = vmatpush3.bf16.msra.mxu1 %v8305_v61  ;;  %v6426_v61 = vrot.slane %v10371_v5, %v9163_v54 }
0x2c05   :  { %8310 = vmatprep.subr.bf16.mxu1 %v8309_v52 }
0x2c06   :  { %v6263_v55 = vmul.f32 %v6260_v48, %v6255_v33 }
0x2c08   :  { %v6271_v60 = vadd.f32 %v6268_v7, %v6263_v55  ;;  %8312 = vmatpush3.bf16.msra.mxu1 %v8309_v52 }
0x2c09   :  { %8314 = vmatprep.subr.bf16.mxu1 %v8313_v6 }
0x2c0a   :  { %7790 = vmatprep.mubr.msk.f32.mxu1 %vm140_vm1, %v6271_v60 }
0x2c0b   :  { %7791 = vmatmul.mubr.msk.f32.gmra.mrb[76].mxu1 %vm140_vm1, %v6272_v2 }
0x2c0c   :  { %8316 = vmatpush3.bf16.msra.mxu1 %v8313_v6 }
0x2c0d   :  { %8318 = vmatprep.subr.bf16.mxu1 %v8317_v3 }
0x2c10   :  { %8320 = vmatpush3.bf16.msra.mxu1 %v8317_v3 }
0x2c11   :  { %8322 = vmatprep.subr.bf16.mxu1 %v8321_v18 }
0x2c14   :  { %8324 = vmatpush3.bf16.msra.mxu1 %v8321_v18 }
0x2c15   :  { %8326 = vmatprep.subr.bf16.mxu1 %v8325_v10 }
0x2c18   :  { %8328 = vmatpush3.bf16.msra.mxu1 %v8325_v10 }
0x2c19   :  { %8330 = vmatprep.subr.bf16.mxu1 %v8329_v36 }
0x2c1c   :  { %8332 = vmatpush3.bf16.msra.mxu1 %v8329_v36 }
0x2c1d   :  { %8334 = vmatprep.subr.bf16.mxu1 %v8333_v39 }
0x2c20   :  { %8336 = vmatpush3.bf16.msra.mxu1 %v8333_v39 }
0x2c21   :  { %8337 = vmatprep.subr.bf16.mxu1 %v8903_v56 }
0x2cd6   :  { %v7789_v13 = vpop.f32.mrb[74].mxu1 }
0x2cd7   :  { %v6366_v1 = vadd.f32 %v7789_v13, %v6931_v43  ;;  %v6360_v12 = vpop.f32.mrb[75].mxu1 }
0x2cd8   :  { %v6361_v16 = vadd.f32 %v6931_v43, %v6360_v12 }
0x2cd9   :  { %v6380_v40 = vsub.f32 0.0, %v6366_v1 }
0x2cda   :  { %v6379_v59 = vsub.f32 0.0, %v6361_v16 }
0x2cdb   :  { %v6385_v23 = vmul.f32 1.442695, %v6380_v40 }
0x2cdc   :  { %v6383_v17 = vmul.f32 1.442695, %v6379_v59  ;;  %v8905_v59 = vmov 0.0  }
0x2cdd   :  { %8839 = vpow2.f32 %v6385_v23 }
0x2cde   :  { %8841 = vpow2.f32 %v6383_v17  ;;  %v7792_v62 = vpop.f32.mrb[76].mxu1 }
0x2cdf   :  { %v6376_v44 = vadd.f32 %v7792_v62, %v6931_v43  ;;  %v6370_v48 = vpop.f32.mrb[77].mxu1 }
0x2ce0   :  { %v6371_v11 = vadd.f32 %v6931_v43, %v6370_v48 }
0x2ce1   :  { %v6382_v41 = vsub.f32 0.0, %v6376_v44 }
0x2ce2   :  { %v6381_v63 = vsub.f32 0.0, %v6371_v11 }
0x2ce3   :  { %v6389_v21 = vmul.f32 1.442695, %v6382_v41 }
0x2ce4   :  { %v6387_v30 = vmul.f32 1.442695, %v6381_v63 }
0x2ce5   :  { %8843 = vpow2.f32 %v6389_v21 }
0x2ce6   :  { %8845 = vpow2.f32 %v6387_v30 }
0x2ce7   :  { %v8840_v7 = vpop.eup %8839 }
0x2ce8   :  { %v8842_v50 = vpop.eup %8841  ;;  %v6392_v4 = vadd.f32 1.0, %v8840_v7 }
0x2ce9   :  { %v6391_v51 = vadd.f32 1.0, %v8842_v50 }
0x2cea   :  { %8847 = vrcp.f32 %v6392_v4 }
0x2ceb   :  { %8849 = vrcp.f32 %v6391_v51 }
0x2cef   :  { %v8844_v34 = vpop.eup %8843 }
0x2cf0   :  { %v8846_v58 = vpop.eup %8845  ;;  %v6394_v46 = vadd.f32 1.0, %v8844_v34 }
0x2cf1   :  { %v6393_v14 = vadd.f32 1.0, %v8846_v58 }
0x2cf2   :  { %8851 = vrcp.f32 %v6394_v46 }
0x2cf3   :  { %8853 = vrcp.f32 %v6393_v14 }
0x2cf4   :  { %v8848_v42 = vpop.eup %8847 }
0x2cf5   :  { %v8850_v33 = vpop.eup %8849  ;;  %v6404_v55 = vmul.f32 %v8848_v42, %v6366_v1 }
0x2cf6   :  { %v6403_v47 = vmul.f32 %v8850_v33, %v6361_v16 }
0x2cf8   :  { %7825 = vmatprep.mubr.f32.mxu1 %v6403_v47 }
0x2cf9   :  { %7826 = vmatmul.mubr.f32.vlgmr.msra.gmra.mrb[78].mxu1 %v6404_v55 }
0x2cfc   :  { %v8852_v60 = vpop.eup %8851 }
0x2cfd   :  { %v8854_v2 = vpop.eup %8853  ;;  %v6406_v31 = vmul.f32 %v8852_v60, %v6376_v44 }
0x2cfe   :  { %v6405_v49 = vmul.f32 %v8854_v2, %v6371_v11 }
0x2d00   :  { %7828 = vmatprep.mubr.f32.mxu1 %v6405_v49 }
0x2d01   :  { %7829 = vmatmul.mubr.f32.gmra.mrb[80].mxu1 %v6406_v31 }
0x2d02   :  { %7839 = vmatprep.mubr.msk.f32.mxu1 %vm8904_vm7, %v8905_v59 }
0x2dcc   :  { %v7827_v53 = vpop.f32.mrb[78].mxu1 }
0x2dcd   :  { %v6499_v15 = vadd.f32 %v7827_v53, %v6426_v61  ;;  %v6493_v52 = vpop.f32.mrb[79].mxu1 }
0x2dce   :  { %v6494_v19 = vadd.f32 %v6493_v52, %v6426_v61  ;;  %v6587_v52 = vrot.slane %v10371_v5, %v9429_v26 }
0x2dcf   :  { %v6517_v6 = vmul.f32 0.5, %v6499_v15 }
0x2dd0   :  { %v6516_v9 = vmul.f32 0.5, %v6494_v19 }
0x2dd1   :  { %v10493_v3 = vadd.f32 %v6517_v6, %v6513_v24 }
0x2dd2   :  { %v10495_v27 = vadd.f32 %v6516_v9, %v6512_v32  ;;  %v6595_v9 = vrot.slane %v10371_v5, %v9483_v57 }
0x2dd3   :  { %v6527_v35 = vsel %vm140_vm1, %v10493_v3, 0.0  ;;  %v6541_v54 = vmul.f32 %v10493_v3, %v10493_v3 }
0x2dd4   :  { %6528 = vadd.xlane.f32.xlu1 %v6527_v35  ;;  %v7830_v18 = vpop.f32.mrb[80].mxu1  ;;  %v6524_v28 = vsel %vm140_vm1, %v10495_v27, 0.0  ;;  %v6540_v45 = vmul.f32 %v10495_v27, %v10495_v27 }
0x2dd5   :  { %v6509_v8 = vadd.f32 %v7830_v18, %v6426_v61  ;;  %6525 = vadd.xlane.f32.xlu0 %v6524_v28  ;;  %v6503_v22 = vpop.f32.mrb[81].mxu1  ;;  %v6547_v36 = vsel %vm140_vm1, %v6541_v54, 0.0 }
0x2dd6   :  { %v6504_v10 = vadd.f32 %v6503_v22, %v6426_v61  ;;  %v6544_v39 = vsel %vm140_vm1, %v6540_v45, 0.0 }
0x2dd7   :  { %v6519_v25 = vmul.f32 0.5, %v6509_v8 }
0x2dd8   :  { %v6518_v29 = vmul.f32 0.5, %v6504_v10  ;;  %6548 = vadd.xlane.f32.xlu1 %v6547_v36 }
0x2dd9   :  { %v10509_v43 = vadd.f32 %v6519_v25, %v6515_v37  ;;  %6545 = vadd.xlane.f32.xlu0 %v6544_v39 }
0x2dda   :  { %v10511_v13 = vadd.f32 %v6518_v29, %v6514_v38  ;;  %v6674_v38 = vld [vmem:[%s10571_s1 + $0x318] sm:$0xff]  ;;  %v6675_v29 = vld [vmem:[%s10571_s1 + $0x320] sm:$0xff] }
0x2ddb   :  { %v6533_v1 = vsel %vm140_vm1, %v10509_v43, 0.0  ;;  %v6543_v20 = vmul.f32 %v10509_v43, %v10509_v43 }
0x2ddc   :  { %6534 = vadd.xlane.f32.xlu1 %v6533_v1  ;;  %v6530_v12 = vsel %vm140_vm1, %v10511_v13, 0.0  ;;  %v6542_v0 = vmul.f32 %v10511_v13, %v10511_v13  ;;  %v6676_v1 = vld [vmem:[%s10571_s1 + $0x328] sm:$0xff] }
0x2ddd   :  { %6531 = vadd.xlane.f32.xlu0 %v6530_v12  ;;  %v6553_v16 = vsel %vm140_vm1, %v6543_v20, 0.0  ;;  %v6677_v20 = vld [vmem:[%s10571_s1 + $0x330] sm:$0xff] }
0x2dde   :  { %v6550_v40 = vsel %vm140_vm1, %v6542_v0, 0.0  ;;  %v8347_v12 = vpack.c.bf16 %v6677_v20, %v6676_v1 }
0x2de0   :  { %6554 = vadd.xlane.f32.xlu1 %v6553_v16 }
0x2de1   :  { %6551 = vadd.xlane.f32.xlu0 %v6550_v40  ;;  %v6937_v40 = vld [vmem:[%s10571_s1 + $0x338] ss:$0 sm:$0xff] }
0x2e61   :  { %v6529_v23 = vpop.xlane.xlu1 %6528 }
0x2e62   :  { %v6537_v17 = vmul.f32 0.03125, %v6529_v23  ;;  %v6526_v62 = vpop.xlane.xlu0 %6525 }
0x2e63   :  { %v6536_v44 = vmul.f32 0.03125, %v6526_v62 }
0x2e64   :  { %v6561_v11 = vmul.f32 %v6537_v17, %v6537_v17  ;;  %v6569_v15 = vsub.f32 %v10493_v3, %v6537_v17 }
0x2e65   :  { %v6549_v48 = vpop.xlane.xlu1 %6548  ;;  %v6560_v21 = vmul.f32 %v6536_v44, %v6536_v44  ;;  %v6568_v24 = vsub.f32 %v10495_v27, %v6536_v44 }
0x2e66   :  { %v6557_v41 = vmul.f32 0.03125, %v6549_v48  ;;  %v6546_v63 = vpop.xlane.xlu0 %6545 }
0x2e67   :  { %v6556_v30 = vmul.f32 0.03125, %v6546_v63 }
0x2e68   :  { %v6565_v7 = vsub.f32 %v6557_v41, %v6561_v11 }
0x2e69   :  { %v6564_v50 = vsub.f32 %v6556_v30, %v6560_v21  ;;  %v6535_v4 = vpop.xlane.xlu1 %6534 }
0x2e6a   :  { %v6573_v51 = vadd.f32 1e-05, %v6565_v7  ;;  %v6539_v34 = vmul.f32 0.03125, %v6535_v4  ;;  %v6532_v58 = vpop.xlane.xlu0 %6531 }
0x2e6b   :  { %v6572_v46 = vadd.f32 1e-05, %v6564_v50  ;;  %v6538_v14 = vmul.f32 0.03125, %v6532_v58 }
0x2e6c   :  { %8855 = vrsqrt.f32 %v6573_v51  ;;  %v6563_v33 = vmul.f32 %v6539_v34, %v6539_v34  ;;  %v6571_v8 = vsub.f32 %v10509_v43, %v6539_v34  ;;  %v6600_v43 = vld [vmem:[%s10571_s1 + $0x310] sm:$0x3] }
0x2e6d   :  { %8857 = vrsqrt.f32 %v6572_v46  ;;  %v6555_v42 = vpop.xlane.xlu1 %6554  ;;  %v6562_v60 = vmul.f32 %v6538_v14, %v6538_v14  ;;  %v6570_v22 = vsub.f32 %v10511_v13, %v6538_v14  ;;  %v8344_v13 = vpack.c.bf16 %v6675_v29, %v6674_v38 }
0x2e6e   :  { %v6559_v47 = vmul.f32 0.03125, %v6555_v42  ;;  %v6552_v55 = vpop.xlane.xlu0 %6551 }
0x2e6f   :  { %v6558_v2 = vmul.f32 0.03125, %v6552_v55 }
0x2e70   :  { %v6567_v49 = vsub.f32 %v6559_v47, %v6563_v33 }
0x2e71   :  { %v6566_v31 = vsub.f32 %v6558_v2, %v6562_v60 }
0x2e72   :  { %v6575_v61 = vadd.f32 1e-05, %v6567_v49 }
0x2e73   :  { %v6574_v53 = vadd.f32 1e-05, %v6566_v31 }
0x2e74   :  { %8859 = vrsqrt.f32 %v6575_v61 }
0x2e75   :  { %8861 = vrsqrt.f32 %v6574_v53 }
0x2e76   :  { %v8856_v19 = vpop.eup %8855 }
0x2e77   :  { %v8858_v6 = vpop.eup %8857  ;;  %v6581_v32 = vmul.f32 %v8856_v19, %v6569_v15 }
0x2e78   :  { %v6580_v35 = vmul.f32 %v8858_v6, %v6568_v24 }
0x2e79   :  { %v6589_v54 = vmul.f32 %v6587_v52, %v6581_v32 }
0x2e7a   :  { %v6588_v18 = vmul.f32 %v6587_v52, %v6580_v35 }
0x2e7b   :  { %v6597_v28 = vadd.f32 %v6595_v9, %v6589_v54 }
0x2e7c   :  { %v6596_v45 = vadd.f32 %v6595_v9, %v6588_v18 }
0x2e7e   :  { %v8860_v3 = vpop.eup %8859  ;;  %v8338_v10 = vpack.c.bf16 %v6597_v28, %v6596_v45 }
0x2e7f   :  { %v8862_v26 = vpop.eup %8861  ;;  %v6583_v37 = vmul.f32 %v8860_v3, %v6571_v8 }
0x2e80   :  { %8339 = vmatpush3.bf16.msra.mxu1 %v8338_v10  ;;  %v6582_v27 = vmul.f32 %v8862_v26, %v6570_v22 }
0x2e81   :  { %8340 = vmatprep.subr.bf16.mxu1 %v8903_v56  ;;  %v6591_v25 = vmul.f32 %v6587_v52, %v6583_v37 }
0x2e82   :  { %v6590_v36 = vmul.f32 %v6587_v52, %v6582_v27 }
0x2e83   :  { %v6599_v57 = vadd.f32 %v6595_v9, %v6591_v25 }
0x2e84   :  { %v6598_v5 = vadd.f32 %v6595_v9, %v6590_v36 }
0x2e86   :  { %v8341_v39 = vpack.c.bf16 %v6599_v57, %v6598_v5 }
0x2e88   :  { %8342 = vmatpush3.bf16.msra.mxu1 %v8341_v39 }
0x2e89   :  { %8343 = vmatprep.subr.bf16.mxu1 %v8903_v56 }
0x2e8b   :  { %7840 = vmatmul.mubr.msk.f32.vlgmr.msra.gmra.mrb[82].mxu1 %vm140_vm1, %v6600_v43 }
0x2e8c   :  { %8345 = vmatpush3.bf16.msra.mxu1 %v8344_v13  ;;  %7850 = vmatprep.mubr.msk.f32.mxu1 %vm8904_vm7, %v8905_v59 }
0x2e8d   :  { %8346 = vmatprep.subr.bf16.mxu1 %v8903_v56 }
0x2e90   :  { %8348 = vmatpush3.bf16.msra.mxu1 %v8347_v12 }
0x2f5e   :  { %v6670_v0 = vpop.f32.mrb[82].mxu1 }
0x2f5f   :  { %v7841_v16 = vpop.f32.mrb[83].mxu1  ;;  %7851 = vmatmul.mubr.msk.f32.vlgmr.msra.gmra.mrb[84].mxu1 %vm140_vm1, %v6670_v0 }
0x3032   :  { %v6752_v23 = vpop.f32.mrb[84].mxu1 }
0x3033   :  { %v6753_v17 = vadd.f32 %v6937_v40, %v6752_v23  ;;  %v7852_v62 = vpop.f32.mrb[85].mxu1 }
0x3035   :  { %6757 = vst.msk [vmem:[#allocation2] sm:$0x3] %vm6756_vm8, %v6753_v17 }
0x3036   :  { %8876 = shalt.err (!%p8873_p4)
}
0x3037   :  { %s8877_s29 = scalar_lea.hbm %s10576_s6, 32 }
0x3038   :  { %p8878_p5 = scmp.ne.s32.totalorder %s10576_s6, %s8877_s29  ;;  %p8881_p6 = scmp.lt.u32.totalorder %s8877_s29, %s10576_s6 }
0x303a   :  { %p8883_p7 = pnand %p8881_p6, %p8878_p5 }
0x303c   :  { %8886 = shalt.err (!%p8883_p7)
}
0x303d   :  { %6767 = dma.vmem_to_hbm [thread:$0]  %s6765_s5, 32, %s10576_s6, [#allocation3]  }
0x303e   :  { %8887 = dma.done.wait [#allocation3], 32  }
0x303f   :  { %8888 = vsyncadd [#allocation3], 4294967264 }
0x3040   :  { %6771 = vsyncpa [#allocation3], 1 }

</bundles_post_ra>
